<compile_context>
chip_gen: v6e
topology: v6e:2x2x1
jax: 0.10.0
libtpu: 0.0.40
codegen_flags: <defaults>
</compile_context>

<pallas_src>
import functools

import jax
import jax.numpy as jnp
from jax import lax
from jax.experimental import pallas as pl
from jax.experimental.pallas import tpu as pltpu

LN_EPS = 1e-5


def _round_up(x, m):
    return (x + m - 1) // m * m


# ---------------------------------------------------------------------------
# In-kernel helpers
# ---------------------------------------------------------------------------
def _layer_norm(x_f32, gamma, beta, true_dim):
    """LayerNorm over the last axis. x_f32 is lane-padded with zeros beyond `true_dim`;
    gamma/beta are zero in the padded lanes, so padded lanes of the result stay zero."""
    mean = jnp.sum(x_f32, axis=-1, keepdims=True) * (1.0 / true_dim)
    mean_sq = jnp.sum(x_f32 * x_f32, axis=-1, keepdims=True) * (1.0 / true_dim)
    var = mean_sq - mean * mean
    inv = lax.rsqrt(var + LN_EPS)
    return (x_f32 - mean) * inv * gamma + beta


# ---------------------------------------------------------------------------
# Kernels
# ---------------------------------------------------------------------------
def _prenorm_attn_kernel(x_ref, g_ref, b_ref, wqkv_ref, wo_ref, bo_ref, o_ref, *,
                         true_dim, true_n, heads, dh_p, scale, compute_dtype):
    f32 = jnp.float32
    x = x_ref[0]                                   # (n_pad, dim_p)
    n_pad, dim_p = x.shape
    xf = x.astype(f32)
    xn = _layer_norm(xf, g_ref[...].astype(f32), b_ref[...].astype(f32), true_dim)

    # QKV projection: bf16 operands, f32 accumulation. Weight is laid out as
    # [q_h0 | q_h1 | ... | k_h0 | ... | v_h0 | ...], each head chunk padded to dh_p=128.
    qkv = jnp.dot(xn.astype(compute_dtype), wqkv_ref[...],
                  preferred_element_type=f32)      # (n_pad, 3*heads*dh_p)

    y = jnp.zeros((n_pad, dim_p), f32)
    for h in range(heads):                          # static unroll over heads
        q = qkv[:, (0 * heads + h) * dh_p:(0 * heads + h + 1) * dh_p]
        k = qkv[:, (1 * heads + h) * dh_p:(1 * heads + h + 1) * dh_p]
        v = qkv[:, (2 * heads + h) * dh_p:(2 * heads + h + 1) * dh_p]
        logits = lax.dot_general(
            q.astype(compute_dtype), k.astype(compute_dtype),
            (((1,), (1,)), ((), ())), preferred_element_type=f32) * scale
        if n_pad > true_n:                          # mask padded key rows
            kidx = lax.broadcasted_iota(jnp.int32, logits.shape, 1)
            logits = jnp.where(kidx < true_n, logits, -1e30)
        logits = logits - jnp.max(logits, axis=-1, keepdims=True)
        p = jnp.exp(logits)
        p = p / jnp.sum(p, axis=-1, keepdims=True)  # softmax in f32
        oh = jnp.dot(p.astype(compute_dtype), v.astype(compute_dtype),
                     preferred_element_type=f32)    # (n_pad, dh_p)
        # Per-head slice of the output projection (128-aligned row slice).
        y = y + jnp.dot(oh.astype(compute_dtype),
                        wo_ref[h * dh_p:(h + 1) * dh_p, :],
                        preferred_element_type=f32)
    y = y + bo_ref[...].astype(f32)
    o_ref[0] = (y + xf).astype(o_ref.dtype)         # residual add


def _prenorm_ff_kernel(x_ref, g_ref, b_ref, w1_ref, b1_ref, w2_ref, b2_ref, o_ref, *,
                       true_dim, compute_dtype):
    f32 = jnp.float32
    xf = x_ref[...].astype(f32)
    xn = _layer_norm(xf, g_ref[...].astype(f32), b_ref[...].astype(f32), true_dim)
    h = jnp.dot(xn.astype(compute_dtype), w1_ref[...],
                preferred_element_type=f32) + b1_ref[...]
    h = h * jax.nn.sigmoid(h)                        # SiLU, kept in f32
    y = jnp.dot(h.astype(compute_dtype), w2_ref[...],
                preferred_element_type=f32) + b2_ref[...]
    o_ref[...] = (y + xf).astype(o_ref.dtype)        # residual add


# ---------------------------------------------------------------------------
# pallas_call wrappers
# ---------------------------------------------------------------------------
def _attention_block(xg, p, *, true_n, true_dim, heads, dim_head, compute_dtype):
    G, n_pad, dim_p = xg.shape
    dh_p = _round_up(dim_head, 128)
    kernel = functools.partial(
        _prenorm_attn_kernel, true_dim=true_dim, true_n=true_n, heads=heads,
        dh_p=dh_p, scale=float(dim_head) ** -0.5, compute_dtype=compute_dtype)
    return pl.pallas_call(
        kernel,
        out_shape=jax.ShapeDtypeStruct((G, n_pad, dim_p), compute_dtype),
        grid_spec=pltpu.PrefetchScalarGridSpec(
            num_scalar_prefetch=0,
            grid=(G,),
            in_specs=[
                pl.BlockSpec((1, n_pad, dim_p), lambda g: (g, 0, 0)),   # x group
                pl.BlockSpec((1, dim_p), lambda g: (0, 0)),             # LN gamma
                pl.BlockSpec((1, dim_p), lambda g: (0, 0)),             # LN beta
                pl.BlockSpec(p["wqkv"].shape, lambda g: (0, 0)),        # W_qkv (resident)
                pl.BlockSpec(p["wo"].shape, lambda g: (0, 0)),          # W_out (resident)
                pl.BlockSpec((1, dim_p), lambda g: (0, 0)),             # b_out
            ],
            out_specs=pl.BlockSpec((1, n_pad, dim_p), lambda g: (g, 0, 0)),
        ),
        compiler_params=pltpu.CompilerParams(dimension_semantics=("parallel",)),
    )(xg, p["ln_g"], p["ln_b"], p["wqkv"], p["wo"], p["bo"])


def _pick_tm(requested_tm, m, dim_p, hid_p, act_bytes,
             vmem_budget_bytes=12 * 1024 * 1024):
    """Row tile: multiple of 8 sublanes, capped to the token count, and shrunk until
    double-buffered x/out tiles + resident weights + the live f32 hidden activation
    fit a conservative VMEM budget (safe under v5e/v6e/v7x default scoped limits)."""
    tm = max(8, _round_up(min(requested_tm, m), 8))

    def est(t):
        act = 2 * 2 * t * dim_p * act_bytes        # x & out tiles, double-buffered
        wts = 2 * 2 * dim_p * hid_p * act_bytes    # W1 & W2 (double-buffered by Pallas)
        hid = t * hid_p * 4                        # live f32 hidden activation
        return act + wts + hid

    while tm > 8 and est(tm) > vmem_budget_bytes:
        tm = max(8, _round_up(tm // 2, 8))
    return tm


def _ff_block(x2d, p, *, true_dim, tm, compute_dtype):
    m, dim_p = x2d.shape
    hid_p = p["w1"].shape[1]
    tm = _pick_tm(tm, m, dim_p, hid_p, jnp.dtype(compute_dtype).itemsize)
    grid_m = pl.cdiv(m, tm)
    m_pad = grid_m * tm
    if m_pad != m:                                   # tail tile via zero row padding
        x2d = jnp.pad(x2d, ((0, m_pad - m), (0, 0)))
    kernel = functools.partial(_prenorm_ff_kernel, true_dim=true_dim,
                               compute_dtype=compute_dtype)
    out = pl.pallas_call(
        kernel,
        out_shape=jax.ShapeDtypeStruct((m_pad, dim_p), compute_dtype),
        grid_spec=pltpu.PrefetchScalarGridSpec(
            num_scalar_prefetch=0,
            grid=(grid_m,),
            in_specs=[
                pl.BlockSpec((tm, dim_p), lambda i: (i, 0)),    # token tile
                pl.BlockSpec((1, dim_p), lambda i: (0, 0)),     # LN gamma
                pl.BlockSpec((1, dim_p), lambda i: (0, 0)),     # LN beta
                pl.BlockSpec((dim_p, hid_p), lambda i: (0, 0)), # W1 (resident)
                pl.BlockSpec((1, hid_p), lambda i: (0, 0)),     # b1
                pl.BlockSpec((hid_p, dim_p), lambda i: (0, 0)), # W2 (resident)
                pl.BlockSpec((1, dim_p), lambda i: (0, 0)),     # b2
            ],
            out_specs=pl.BlockSpec((tm, dim_p), lambda i: (i, 0)),
        ),
        compiler_params=pltpu.CompilerParams(dimension_semantics=("parallel",)),
    )(x2d, p["ln_g"], p["ln_b"], p["w1"], p["b1"], p["w2"], p["b2"])
    return out[:m]


@functools.partial(jax.jit, static_argnames=("heads", "dim_head", "tm", "compute_dtype"))
def transformer_forward(x, layers, *, heads, dim_head, tm=256,
                        compute_dtype=jnp.bfloat16):
    """x: (B, P, N, dim) -> (B, P, N, dim). `layers` comes from prepare_params()."""
    B, P, N, dim = x.shape
    dim_p = _round_up(dim, 128)
    n_pad = _round_up(N, 8)
    xg = jnp.pad(x, ((0, 0), (0, 0), (0, n_pad - N), (0, dim_p - dim)))
    xg = xg.astype(compute_dtype).reshape(B * P, n_pad, dim_p)
    for layer in layers:
        xg = _attention_block(xg, layer["attn"], true_n=N, true_dim=dim,
                              heads=heads, dim_head=dim_head,
                              compute_dtype=compute_dtype)
        x2d = xg.reshape(B * P * n_pad, dim_p)
        x2d = _ff_block(x2d, layer["ff"], true_dim=dim, tm=tm,
                        compute_dtype=compute_dtype)
        xg = x2d.reshape(B * P, n_pad, dim_p)
    out = xg.reshape(B, P, n_pad, dim_p)[:, :, :N, :dim]
    return out.astype(x.dtype)


# ---------------------------------------------------------------------------
# Parameter packing (lane padding + bf16-at-rest weights)
# ---------------------------------------------------------------------------
def prepare_params(raw_layers, *, dim, heads, dim_head, compute_dtype):
    dim_p = _round_up(dim, 128)
    dh_p = _round_up(dim_head, 128)
    inner = heads * dim_head
    f32 = jnp.float32

    def pad_vec(v, n):
        return jnp.pad(v, (0, n - v.shape[0])).reshape(1, n).astype(f32)

    def pad_mat(a, r, c):
        return jnp.pad(a, ((0, r - a.shape[0]), (0, c - a.shape[1])))

    out = []
    for rl in raw_layers:
        # Pack W_qkv as [q heads | k heads | v heads], each head chunk padded to dh_p.
        wqkv_p = jnp.zeros((dim_p, 3 * heads * dh_p), f32)
        for t in range(3):
            for h in range(heads):
                src = rl["wqkv"][:, t * inner + h * dim_head:
                                 t * inner + (h + 1) * dim_head]
                c0 = (t * heads + h) * dh_p
                wqkv_p = wqkv_p.at[:dim, c0:c0 + dim_head].set(src)
        wo_p = jnp.zeros((heads * dh_p, dim_p), f32)
        for h in range(heads):
            wo_p = wo_p.at[h * dh_p:h * dh_p + dim_head, :dim].set(
                rl["wo"][h * dim_head:(h + 1) * dim_head, :])

        hid = rl["w1"].shape[1]
        hid_p = _round_up(hid, 128)
        attn = dict(
            ln_g=pad_vec(rl["ln1_g"], dim_p),
            ln_b=pad_vec(rl["ln1_b"], dim_p),
            wqkv=wqkv_p.astype(compute_dtype),
            wo=wo_p.astype(compute_dtype),
            bo=pad_vec(rl["bo"], dim_p),
        )
        ff = dict(
            ln_g=pad_vec(rl["ln2_g"], dim_p),
            ln_b=pad_vec(rl["ln2_b"], dim_p),
            w1=pad_mat(rl["w1"], dim_p, hid_p).astype(compute_dtype),
            b1=pad_vec(rl["b1"], hid_p),
            w2=pad_mat(rl["w2"], hid_p, dim_p).astype(compute_dtype),
            b2=pad_vec(rl["b2"], dim_p),
        )
        out.append(dict(attn=attn, ff=ff))
    return out


# ---------------------------------------------------------------------------
# Pure-JAX reference (round_dtype=bf16 mirrors the kernel's MXU-operand casts)
# ---------------------------------------------------------------------------
def reference_transformer(x, raw_layers, *, heads, dim_head, round_dtype=None):
    f32 = jnp.float32
    rnd = ((lambda t: t) if round_dtype is None
           else (lambda t: t.astype(round_dtype).astype(f32)))

    def ln(v, g, b):
        mu = jnp.mean(v, axis=-1, keepdims=True)
        var = jnp.mean(jnp.square(v - mu), axis=-1, keepdims=True)
        return (v - mu) / jnp.sqrt(var + LN_EPS) * g + b

    scale = float(dim_head) ** -0.5
    inner = heads * dim_head
    x = rnd(x.astype(f32))
    for lp in raw_layers:
        xn = rnd(ln(x, lp["ln1_g"], lp["ln1_b"]))
        qkv = xn @ rnd(lp["wqkv"])
        q, k, v = jnp.split(qkv, 3, axis=-1)

        def hsplit(t):
            b, p, n, _ = t.shape
            return t.reshape(b, p, n, heads, dim_head).transpose(0, 1, 3, 2, 4)

        q, k, v = hsplit(rnd(q)), hsplit(rnd(k)), hsplit(rnd(v))
        dots = jnp.einsum("bphnd,bphmd->bphnm", q, k) * scale
        attn = jax.nn.softmax(dots, axis=-1)
        o = jnp.einsum("bphnm,bphmd->bphnd", rnd(attn), v)
        o = o.transpose(0, 1, 3, 2, 4).reshape(x.shape[:3] + (inner,))
        x = rnd(rnd(o) @ rnd(lp["wo"]) + lp["bo"] + x)

        xn = rnd(ln(x, lp["ln2_g"], lp["ln2_b"]))
        h = xn @ rnd(lp["w1"]) + lp["b1"]
        h = h * jax.nn.sigmoid(h)
        x = rnd(rnd(h) @ rnd(lp["w2"]) + lp["b2"] + x)
    return x


# ---------------------------------------------------------------------------
# Demo / self-test
# ---------------------------------------------------------------------------
if __name__ == "__main__":
    # Small MobileViT-style config: (batch, pixels-per-patch, patches, dim)
    B, P, N = 2, 4, 64
    dim, depth, heads, dim_head, mlp_dim = 32, 2, 2, 16, 64
    inner = heads * dim_head

    key = jax.random.PRNGKey(0)
    key, kx = jax.random.split(key)
    x = jax.random.normal(kx, (B, P, N, dim), jnp.float32)

    raw_layers = []
    for _ in range(depth):
        keys = jax.random.split(key, 12)
        key = keys[0]
        raw_layers.append(dict(
            ln1_g=1.0 + 0.1 * jax.random.normal(keys[1], (dim,), jnp.float32),
            ln1_b=0.05 * jax.random.normal(keys[2], (dim,), jnp.float32),
            wqkv=jax.random.normal(keys[3], (dim, 3 * inner), jnp.float32) / dim ** 0.5,
            wo=jax.random.normal(keys[4], (inner, dim), jnp.float32) / inner ** 0.5,
            bo=0.02 * jax.random.normal(keys[5], (dim,), jnp.float32),
            ln2_g=1.0 + 0.1 * jax.random.normal(keys[6], (dim,), jnp.float32),
            ln2_b=0.05 * jax.random.normal(keys[7], (dim,), jnp.float32),
            w1=jax.random.normal(keys[8], (dim, mlp_dim), jnp.float32) / dim ** 0.5,
            b1=0.02 * jax.random.normal(keys[9], (mlp_dim,), jnp.float32),
            w2=jax.random.normal(keys[10], (mlp_dim, dim), jnp.float32) / mlp_dim ** 0.5,
            b2=0.02 * jax.random.normal(keys[11], (dim,), jnp.float32),
        ))

    # Pallas transformer in bf16-operand / f32-accumulate mode.
    params = prepare_params(raw_layers, dim=dim, heads=heads, dim_head=dim_head,
                            compute_dtype=jnp.bfloat16)
    out = transformer_forward(x, params, heads=heads, dim_head=dim_head,
                              tm=256, compute_dtype=jnp.bfloat16)
    out = jax.block_until_ready(out)
    assert out.shape == (B, P, N, dim)

    # (1) Numerics-matched reference (same bf16 operand rounding, f32 accumulation).
    mimic = reference_transformer(x, raw_layers, heads=heads, dim_head=dim_head,
                                  round_dtype=jnp.bfloat16)
    err_mimic = float(jnp.max(jnp.abs(out - mimic)))
    assert err_mimic < 5e-3, f"mismatch vs numerics-matched reference: {err_mimic}"

    # (2) Full-precision f32 reference (loose sanity bound for bf16 compute).
    gold = reference_transformer(x, raw_layers, heads=heads, dim_head=dim_head)
    err_gold = float(jnp.max(jnp.abs(out - gold)))
    assert err_gold < 0.5, f"mismatch vs f32 reference: {err_gold}"

    print("KERNEL_OK")
</pallas_src>

<mosaic_0001>
module attributes {stable_mosaic.version = 11 : i64} {
  func.func @_prenorm_attn_kernel(%arg0: i32, %arg1: memref<1x64x128xbf16, #tpu.memory_space<vmem>>, %arg2: memref<1x128xf32, #tpu.memory_space<vmem>>, %arg3: memref<1x128xf32, #tpu.memory_space<vmem>>, %arg4: memref<128x768xbf16, #tpu.memory_space<vmem>>, %arg5: memref<256x128xbf16, #tpu.memory_space<vmem>>, %arg6: memref<1x128xf32, #tpu.memory_space<vmem>>, %arg7: memref<1x64x128xbf16, #tpu.memory_space<vmem>>) attributes {dimension_semantics = [#tpu.dimension_semantics<parallel>], iteration_bounds = array<i64: 8>, scalar_prefetch = 0 : i64, scratch_operands = 0 : i64, tpu.core_type = #tpu.core_type<tc>, window_params = [{transform_indices = @transform_0, window_bounds = array<i64: 1, 64, 128>}, {pipeline_mode = #tpu.pipeline_mode<synchronous>, transform_indices = @transform_1, window_bounds = array<i64: 1, 128>}, {pipeline_mode = #tpu.pipeline_mode<synchronous>, transform_indices = @transform_2, window_bounds = array<i64: 1, 128>}, {pipeline_mode = #tpu.pipeline_mode<synchronous>, transform_indices = @transform_3, window_bounds = array<i64: 128, 768>}, {pipeline_mode = #tpu.pipeline_mode<synchronous>, transform_indices = @transform_4, window_bounds = array<i64: 256, 128>}, {pipeline_mode = #tpu.pipeline_mode<synchronous>, transform_indices = @transform_5, window_bounds = array<i64: 1, 128>}, {transform_indices = @transform_6, window_bounds = array<i64: 1, 64, 128>}]} {
    %c0 = arith.constant 0 : index
    %c0_0 = arith.constant 0 : index
    %c0_1 = arith.constant 0 : index
    %0 = vector.load %arg1[%c0, %c0_0, %c0_1] : memref<1x64x128xbf16, #tpu.memory_space<vmem>>, vector<1x64x128xbf16>
    %1 = vector.shape_cast %0 : vector<1x64x128xbf16> to vector<64x128xbf16>
    %2 = arith.extf %1 : vector<64x128xbf16> to vector<64x128xf32>
    %c0_2 = arith.constant 0 : index
    %c0_3 = arith.constant 0 : index
    %3 = vector.load %arg2[%c0_2, %c0_3] : memref<1x128xf32, #tpu.memory_space<vmem>>, vector<1x128xf32>
    %c0_4 = arith.constant 0 : index
    %c0_5 = arith.constant 0 : index
    %4 = vector.load %arg3[%c0_4, %c0_5] : memref<1x128xf32, #tpu.memory_space<vmem>>, vector<1x128xf32>
    %cst = arith.constant dense<0.000000e+00> : vector<64xf32>
    %5 = vector.multi_reduction <add>, %2, %cst [1] : vector<64x128xf32> to vector<64xf32>
    %6 = vector.shape_cast %5 : vector<64xf32> to vector<64x1xf32>
    %cst_6 = arith.constant 3.125000e-02 : f32
    %7 = vector.broadcast %cst_6 : f32 to vector<64x1xf32>
    %8 = arith.mulf %6, %7 : vector<64x1xf32>
    %9 = arith.mulf %2, %2 : vector<64x128xf32>
    %cst_7 = arith.constant dense<0.000000e+00> : vector<64xf32>
    %10 = vector.multi_reduction <add>, %9, %cst_7 [1] : vector<64x128xf32> to vector<64xf32>
    %11 = vector.shape_cast %10 : vector<64xf32> to vector<64x1xf32>
    %cst_8 = arith.constant 3.125000e-02 : f32
    %12 = vector.broadcast %cst_8 : f32 to vector<64x1xf32>
    %13 = arith.mulf %11, %12 : vector<64x1xf32>
    %14 = arith.mulf %8, %8 : vector<64x1xf32>
    %15 = arith.subf %13, %14 : vector<64x1xf32>
    %cst_9 = arith.constant 9.99999974E-6 : f32
    %16 = vector.broadcast %cst_9 : f32 to vector<64x1xf32>
    %17 = arith.addf %15, %16 : vector<64x1xf32>
    %18 = math.rsqrt %17 : vector<64x1xf32>
    %19 = vector.broadcast %8 : vector<64x1xf32> to vector<64x128xf32>
    %20 = arith.subf %2, %19 : vector<64x128xf32>
    %21 = vector.broadcast %18 : vector<64x1xf32> to vector<64x128xf32>
    %22 = arith.mulf %20, %21 : vector<64x128xf32>
    %23 = vector.broadcast %3 : vector<1x128xf32> to vector<64x128xf32>
    %24 = arith.mulf %22, %23 : vector<64x128xf32>
    %25 = vector.broadcast %4 : vector<1x128xf32> to vector<64x128xf32>
    %26 = arith.addf %24, %25 : vector<64x128xf32>
    %27 = arith.truncf %26 : vector<64x128xf32> to vector<64x128xbf16>
    %c0_10 = arith.constant 0 : index
    %c0_11 = arith.constant 0 : index
    %28 = vector.load %arg4[%c0_10, %c0_11] : memref<128x768xbf16, #tpu.memory_space<vmem>>, vector<128x768xbf16>
    %cst_12 = arith.constant dense<0.000000e+00> : vector<64x768xf32>
    %29 = tpu.matmul %27, %28, %cst_12 {dimension_numbers = #tpu.dot_dimension_numbers<[1], [0], [0], [1], [0, 0, 1, 1], [], []>} : vector<64x128xbf16>, vector<128x768xbf16>, vector<64x768xf32> -> vector<64x768xf32>
    %cst_13 = arith.constant 0.000000e+00 : f32
    %30 = vector.broadcast %cst_13 : f32 to vector<64x128xf32>
    %31 = vector.extract_strided_slice %29 {offsets = [0, 0], sizes = [64, 128], strides = [1, 1]} : vector<64x768xf32> to vector<64x128xf32>
    %32 = vector.extract_strided_slice %29 {offsets = [0, 256], sizes = [64, 128], strides = [1, 1]} : vector<64x768xf32> to vector<64x128xf32>
    %33 = vector.extract_strided_slice %29 {offsets = [0, 512], sizes = [64, 128], strides = [1, 1]} : vector<64x768xf32> to vector<64x128xf32>
    %34 = arith.truncf %31 : vector<64x128xf32> to vector<64x128xbf16>
    %35 = arith.truncf %32 : vector<64x128xf32> to vector<64x128xbf16>
    %cst_14 = arith.constant dense<0.000000e+00> : vector<64x64xf32>
    %36 = tpu.matmul %34, %35, %cst_14 {dimension_numbers = #tpu.dot_dimension_numbers<[1], [1], [0], [0], [0, 0, 1, 0], [], []>} : vector<64x128xbf16>, vector<64x128xbf16>, vector<64x64xf32> -> vector<64x64xf32>
    %cst_15 = arith.constant 2.500000e-01 : f32
    %37 = vector.broadcast %cst_15 : f32 to vector<64x64xf32>
    %38 = arith.mulf %36, %37 : vector<64x64xf32>
    %cst_16 = arith.constant dense<0xFF800000> : vector<64xf32>
    %39 = vector.multi_reduction <maximumf>, %38, %cst_16 [1] : vector<64x64xf32> to vector<64xf32>
    %40 = vector.shape_cast %39 : vector<64xf32> to vector<64x1xf32>
    %41 = vector.broadcast %40 : vector<64x1xf32> to vector<64x64xf32>
    %42 = arith.subf %38, %41 : vector<64x64xf32>
    %43 = math.exp %42 : vector<64x64xf32>
    %cst_17 = arith.constant dense<0.000000e+00> : vector<64xf32>
    %44 = vector.multi_reduction <add>, %43, %cst_17 [1] : vector<64x64xf32> to vector<64xf32>
    %45 = vector.shape_cast %44 : vector<64xf32> to vector<64x1xf32>
    %46 = vector.broadcast %45 : vector<64x1xf32> to vector<64x64xf32>
    %47 = arith.divf %43, %46 : vector<64x64xf32>
    %48 = arith.truncf %47 : vector<64x64xf32> to vector<64x64xbf16>
    %49 = arith.truncf %33 : vector<64x128xf32> to vector<64x128xbf16>
    %cst_18 = arith.constant dense<0.000000e+00> : vector<64x128xf32>
    %50 = tpu.matmul %48, %49, %cst_18 {dimension_numbers = #tpu.dot_dimension_numbers<[1], [0], [0], [1], [0, 0, 1, 1], [], []>} : vector<64x64xbf16>, vector<64x128xbf16>, vector<64x128xf32> -> vector<64x128xf32>
    %51 = arith.truncf %50 : vector<64x128xf32> to vector<64x128xbf16>
    %c0_19 = arith.constant 0 : index
    %c0_20 = arith.constant 0 : index
    %52 = vector.load %arg5[%c0_19, %c0_20] : memref<256x128xbf16, #tpu.memory_space<vmem>>, vector<128x128xbf16>
    %cst_21 = arith.constant dense<0.000000e+00> : vector<64x128xf32>
    %53 = tpu.matmul %51, %52, %cst_21 {dimension_numbers = #tpu.dot_dimension_numbers<[1], [0], [0], [1], [0, 0, 1, 1], [], []>} : vector<64x128xbf16>, vector<128x128xbf16>, vector<64x128xf32> -> vector<64x128xf32>
    %54 = arith.addf %30, %53 : vector<64x128xf32>
    %55 = vector.extract_strided_slice %29 {offsets = [0, 128], sizes = [64, 128], strides = [1, 1]} : vector<64x768xf32> to vector<64x128xf32>
    %56 = vector.extract_strided_slice %29 {offsets = [0, 384], sizes = [64, 128], strides = [1, 1]} : vector<64x768xf32> to vector<64x128xf32>
    %57 = vector.extract_strided_slice %29 {offsets = [0, 640], sizes = [64, 128], strides = [1, 1]} : vector<64x768xf32> to vector<64x128xf32>
    %58 = arith.truncf %55 : vector<64x128xf32> to vector<64x128xbf16>
    %59 = arith.truncf %56 : vector<64x128xf32> to vector<64x128xbf16>
    %cst_22 = arith.constant dense<0.000000e+00> : vector<64x64xf32>
    %60 = tpu.matmul %58, %59, %cst_22 {dimension_numbers = #tpu.dot_dimension_numbers<[1], [1], [0], [0], [0, 0, 1, 0], [], []>} : vector<64x128xbf16>, vector<64x128xbf16>, vector<64x64xf32> -> vector<64x64xf32>
    %cst_23 = arith.constant 2.500000e-01 : f32
    %61 = vector.broadcast %cst_23 : f32 to vector<64x64xf32>
    %62 = arith.mulf %60, %61 : vector<64x64xf32>
    %cst_24 = arith.constant dense<0xFF800000> : vector<64xf32>
    %63 = vector.multi_reduction <maximumf>, %62, %cst_24 [1] : vector<64x64xf32> to vector<64xf32>
    %64 = vector.shape_cast %63 : vector<64xf32> to vector<64x1xf32>
    %65 = vector.broadcast %64 : vector<64x1xf32> to vector<64x64xf32>
    %66 = arith.subf %62, %65 : vector<64x64xf32>
    %67 = math.exp %66 : vector<64x64xf32>
    %cst_25 = arith.constant dense<0.000000e+00> : vector<64xf32>
    %68 = vector.multi_reduction <add>, %67, %cst_25 [1] : vector<64x64xf32> to vector<64xf32>
    %69 = vector.shape_cast %68 : vector<64xf32> to vector<64x1xf32>
    %70 = vector.broadcast %69 : vector<64x1xf32> to vector<64x64xf32>
    %71 = arith.divf %67, %70 : vector<64x64xf32>
    %72 = arith.truncf %71 : vector<64x64xf32> to vector<64x64xbf16>
    %73 = arith.truncf %57 : vector<64x128xf32> to vector<64x128xbf16>
    %cst_26 = arith.constant dense<0.000000e+00> : vector<64x128xf32>
    %74 = tpu.matmul %72, %73, %cst_26 {dimension_numbers = #tpu.dot_dimension_numbers<[1], [0], [0], [1], [0, 0, 1, 1], [], []>} : vector<64x64xbf16>, vector<64x128xbf16>, vector<64x128xf32> -> vector<64x128xf32>
    %75 = arith.truncf %74 : vector<64x128xf32> to vector<64x128xbf16>
    %c128 = arith.constant 128 : index
    %c0_27 = arith.constant 0 : index
    %76 = vector.load %arg5[%c128, %c0_27] : memref<256x128xbf16, #tpu.memory_space<vmem>>, vector<128x128xbf16>
    %cst_28 = arith.constant dense<0.000000e+00> : vector<64x128xf32>
    %77 = tpu.matmul %75, %76, %cst_28 {dimension_numbers = #tpu.dot_dimension_numbers<[1], [0], [0], [1], [0, 0, 1, 1], [], []>} : vector<64x128xbf16>, vector<128x128xbf16>, vector<64x128xf32> -> vector<64x128xf32>
    %78 = arith.addf %54, %77 : vector<64x128xf32>
    %c0_29 = arith.constant 0 : index
    %c0_30 = arith.constant 0 : index
    %79 = vector.load %arg6[%c0_29, %c0_30] : memref<1x128xf32, #tpu.memory_space<vmem>>, vector<1x128xf32>
    %80 = vector.broadcast %79 : vector<1x128xf32> to vector<64x128xf32>
    %81 = arith.addf %78, %80 : vector<64x128xf32>
    %82 = arith.addf %81, %2 : vector<64x128xf32>
    %83 = arith.truncf %82 : vector<64x128xf32> to vector<64x128xbf16>
    %c0_31 = arith.constant 0 : index
    %c0_32 = arith.constant 0 : index
    %c0_33 = arith.constant 0 : index
    %84 = vector.load %arg7[%c0_31, %c0_32, %c0_33] : memref<1x64x128xbf16, #tpu.memory_space<vmem>>, vector<1x64x128xbf16>
    %85 = vector.shape_cast %84 : vector<1x64x128xbf16> to vector<64x128xbf16>
    %86 = vector.shape_cast %83 : vector<64x128xbf16> to vector<1x64x128xbf16>
    tpu.vector_store %arg7[%c0_31, %c0_32, %c0_33], %86 {strides = array<i32>} : memref<1x64x128xbf16, #tpu.memory_space<vmem>>, vector<1x64x128xbf16>,
    return
  }
  func.func @transform_0(%arg0: i32) -> (i32, i32, i32) {
    %c0_i32 = arith.constant 0 : i32
    %c0_i32_0 = arith.constant 0 : i32
    %c0_i32_1 = arith.constant 0 : i32
    return %arg0, %c0_i32, %c0_i32_0 : i32, i32, i32
  }
  func.func @transform_1(%arg0: i32) -> (i32, i32) {
    %c0_i32 = arith.constant 0 : i32
    %c0_i32_0 = arith.constant 0 : i32
    %c0_i32_1 = arith.constant 0 : i32
    return %c0_i32, %c0_i32_0 : i32, i32
  }
  func.func @transform_2(%arg0: i32) -> (i32, i32) {
    %c0_i32 = arith.constant 0 : i32
    %c0_i32_0 = arith.constant 0 : i32
    %c0_i32_1 = arith.constant 0 : i32
    return %c0_i32, %c0_i32_0 : i32, i32
  }
  func.func @transform_3(%arg0: i32) -> (i32, i32) {
    %c0_i32 = arith.constant 0 : i32
    %c0_i32_0 = arith.constant 0 : i32
    %c0_i32_1 = arith.constant 0 : i32
    return %c0_i32, %c0_i32_0 : i32, i32
  }
  func.func @transform_4(%arg0: i32) -> (i32, i32) {
    %c0_i32 = arith.constant 0 : i32
    %c0_i32_0 = arith.constant 0 : i32
    %c0_i32_1 = arith.constant 0 : i32
    return %c0_i32, %c0_i32_0 : i32, i32
  }
  func.func @transform_5(%arg0: i32) -> (i32, i32) {
    %c0_i32 = arith.constant 0 : i32
    %c0_i32_0 = arith.constant 0 : i32
    %c0_i32_1 = arith.constant 0 : i32
    return %c0_i32, %c0_i32_0 : i32, i32
  }
  func.func @transform_6(%arg0: i32) -> (i32, i32, i32) {
    %c0_i32 = arith.constant 0 : i32
    %c0_i32_0 = arith.constant 0 : i32
    %c0_i32_1 = arith.constant 0 : i32
    return %arg0, %c0_i32, %c0_i32_0 : i32, i32, i32
  }
}

module attributes {stable_mosaic.version = 11 : i64} {
  func.func @_prenorm_ff_kernel(%arg0: i32, %arg1: memref<256x128xbf16, #tpu.memory_space<vmem>>, %arg2: memref<1x128xf32, #tpu.memory_space<vmem>>, %arg3: memref<1x128xf32, #tpu.memory_space<vmem>>, %arg4: memref<128x128xbf16, #tpu.memory_space<vmem>>, %arg5: memref<1x128xf32, #tpu.memory_space<vmem>>, %arg6: memref<128x128xbf16, #tpu.memory_space<vmem>>, %arg7: memref<1x128xf32, #tpu.memory_space<vmem>>, %arg8: memref<256x128xbf16, #tpu.memory_space<vmem>>) attributes {dimension_semantics = [#tpu.dimension_semantics<parallel>], iteration_bounds = array<i64: 2>, scalar_prefetch = 0 : i64, scratch_operands = 0 : i64, tpu.core_type = #tpu.core_type<tc>, window_params = [{transform_indices = @transform_0, window_bounds = array<i64: 256, 128>}, {pipeline_mode = #tpu.pipeline_mode<synchronous>, transform_indices = @transform_1, window_bounds = array<i64: 1, 128>}, {pipeline_mode = #tpu.pipeline_mode<synchronous>, transform_indices = @transform_2, window_bounds = array<i64: 1, 128>}, {pipeline_mode = #tpu.pipeline_mode<synchronous>, transform_indices = @transform_3, window_bounds = array<i64: 128, 128>}, {pipeline_mode = #tpu.pipeline_mode<synchronous>, transform_indices = @transform_4, window_bounds = array<i64: 1, 128>}, {pipeline_mode = #tpu.pipeline_mode<synchronous>, transform_indices = @transform_5, window_bounds = array<i64: 128, 128>}, {pipeline_mode = #tpu.pipeline_mode<synchronous>, transform_indices = @transform_6, window_bounds = array<i64: 1, 128>}, {transform_indices = @transform_7, window_bounds = array<i64: 256, 128>}]} {
    %c0 = arith.constant 0 : index
    %c0_0 = arith.constant 0 : index
    %0 = vector.load %arg1[%c0, %c0_0] : memref<256x128xbf16, #tpu.memory_space<vmem>>, vector<256x128xbf16>
    %1 = arith.extf %0 : vector<256x128xbf16> to vector<256x128xf32>
    %c0_1 = arith.constant 0 : index
    %c0_2 = arith.constant 0 : index
    %2 = vector.load %arg2[%c0_1, %c0_2] : memref<1x128xf32, #tpu.memory_space<vmem>>, vector<1x128xf32>
    %c0_3 = arith.constant 0 : index
    %c0_4 = arith.constant 0 : index
    %3 = vector.load %arg3[%c0_3, %c0_4] : memref<1x128xf32, #tpu.memory_space<vmem>>, vector<1x128xf32>
    %cst = arith.constant dense<0.000000e+00> : vector<256xf32>
    %4 = vector.multi_reduction <add>, %1, %cst [1] : vector<256x128xf32> to vector<256xf32>
    %5 = vector.shape_cast %4 : vector<256xf32> to vector<256x1xf32>
    %cst_5 = arith.constant 3.125000e-02 : f32
    %6 = vector.broadcast %cst_5 : f32 to vector<256x1xf32>
    %7 = arith.mulf %5, %6 : vector<256x1xf32>
    %8 = arith.mulf %1, %1 : vector<256x128xf32>
    %cst_6 = arith.constant dense<0.000000e+00> : vector<256xf32>
    %9 = vector.multi_reduction <add>, %8, %cst_6 [1] : vector<256x128xf32> to vector<256xf32>
    %10 = vector.shape_cast %9 : vector<256xf32> to vector<256x1xf32>
    %cst_7 = arith.constant 3.125000e-02 : f32
    %11 = vector.broadcast %cst_7 : f32 to vector<256x1xf32>
    %12 = arith.mulf %10, %11 : vector<256x1xf32>
    %13 = arith.mulf %7, %7 : vector<256x1xf32>
    %14 = arith.subf %12, %13 : vector<256x1xf32>
    %cst_8 = arith.constant 9.99999974E-6 : f32
    %15 = vector.broadcast %cst_8 : f32 to vector<256x1xf32>
    %16 = arith.addf %14, %15 : vector<256x1xf32>
    %17 = math.rsqrt %16 : vector<256x1xf32>
    %18 = vector.broadcast %7 : vector<256x1xf32> to vector<256x128xf32>
    %19 = arith.subf %1, %18 : vector<256x128xf32>
    %20 = vector.broadcast %17 : vector<256x1xf32> to vector<256x128xf32>
    %21 = arith.mulf %19, %20 : vector<256x128xf32>
    %22 = vector.broadcast %2 : vector<1x128xf32> to vector<256x128xf32>
    %23 = arith.mulf %21, %22 : vector<256x128xf32>
    %24 = vector.broadcast %3 : vector<1x128xf32> to vector<256x128xf32>
    %25 = arith.addf %23, %24 : vector<256x128xf32>
    %26 = arith.truncf %25 : vector<256x128xf32> to vector<256x128xbf16>
    %c0_9 = arith.constant 0 : index
    %c0_10 = arith.constant 0 : index
    %27 = vector.load %arg4[%c0_9, %c0_10] : memref<128x128xbf16, #tpu.memory_space<vmem>>, vector<128x128xbf16>
    %cst_11 = arith.constant dense<0.000000e+00> : vector<256x128xf32>
    %28 = tpu.matmul %26, %27, %cst_11 {dimension_numbers = #tpu.dot_dimension_numbers<[1], [0], [0], [1], [0, 0, 1, 1], [], []>} : vector<256x128xbf16>, vector<128x128xbf16>, vector<256x128xf32> -> vector<256x128xf32>
    %c0_12 = arith.constant 0 : index
    %c0_13 = arith.constant 0 : index
    %29 = vector.load %arg5[%c0_12, %c0_13] : memref<1x128xf32, #tpu.memory_space<vmem>>, vector<1x128xf32>
    %30 = vector.broadcast %29 : vector<1x128xf32> to vector<256x128xf32>
    %31 = arith.addf %28, %30 : vector<256x128xf32>
    %32 = arith.negf %31 : vector<256x128xf32>
    %33 = math.exp %32 : vector<256x128xf32>
    %cst_14 = arith.constant 1.000000e+00 : f32
    %34 = vector.broadcast %cst_14 : f32 to vector<256x128xf32>
    %35 = arith.addf %34, %33 : vector<256x128xf32>
    %36 = arith.divf %34, %35 : vector<256x128xf32>
    %37 = arith.mulf %31, %36 : vector<256x128xf32>
    %38 = arith.truncf %37 : vector<256x128xf32> to vector<256x128xbf16>
    %c0_15 = arith.constant 0 : index
    %c0_16 = arith.constant 0 : index
    %39 = vector.load %arg6[%c0_15, %c0_16] : memref<128x128xbf16, #tpu.memory_space<vmem>>, vector<128x128xbf16>
    %cst_17 = arith.constant dense<0.000000e+00> : vector<256x128xf32>
    %40 = tpu.matmul %38, %39, %cst_17 {dimension_numbers = #tpu.dot_dimension_numbers<[1], [0], [0], [1], [0, 0, 1, 1], [], []>} : vector<256x128xbf16>, vector<128x128xbf16>, vector<256x128xf32> -> vector<256x128xf32>
    %c0_18 = arith.constant 0 : index
    %c0_19 = arith.constant 0 : index
    %41 = vector.load %arg7[%c0_18, %c0_19] : memref<1x128xf32, #tpu.memory_space<vmem>>, vector<1x128xf32>
    %42 = vector.broadcast %41 : vector<1x128xf32> to vector<256x128xf32>
    %43 = arith.addf %40, %42 : vector<256x128xf32>
    %44 = arith.addf %43, %1 : vector<256x128xf32>
    %45 = arith.truncf %44 : vector<256x128xf32> to vector<256x128xbf16>
    %c0_20 = arith.constant 0 : index
    %c0_21 = arith.constant 0 : index
    %46 = vector.load %arg8[%c0_20, %c0_21] : memref<256x128xbf16, #tpu.memory_space<vmem>>, vector<256x128xbf16>
    tpu.vector_store %arg8[%c0_20, %c0_21], %45 {strides = array<i32>} : memref<256x128xbf16, #tpu.memory_space<vmem>>, vector<256x128xbf16>,
    return
  }
  func.func @transform_0(%arg0: i32) -> (i32, i32) {
    %c0_i32 = arith.constant 0 : i32
    %c0_i32_0 = arith.constant 0 : i32
    return %arg0, %c0_i32 : i32, i32
  }
  func.func @transform_1(%arg0: i32) -> (i32, i32) {
    %c0_i32 = arith.constant 0 : i32
    %c0_i32_0 = arith.constant 0 : i32
    %c0_i32_1 = arith.constant 0 : i32
    return %c0_i32, %c0_i32_0 : i32, i32
  }
  func.func @transform_2(%arg0: i32) -> (i32, i32) {
    %c0_i32 = arith.constant 0 : i32
    %c0_i32_0 = arith.constant 0 : i32
    %c0_i32_1 = arith.constant 0 : i32
    return %c0_i32, %c0_i32_0 : i32, i32
  }
  func.func @transform_3(%arg0: i32) -> (i32, i32) {
    %c0_i32 = arith.constant 0 : i32
    %c0_i32_0 = arith.constant 0 : i32
    %c0_i32_1 = arith.constant 0 : i32
    return %c0_i32, %c0_i32_0 : i32, i32
  }
  func.func @transform_4(%arg0: i32) -> (i32, i32) {
    %c0_i32 = arith.constant 0 : i32
    %c0_i32_0 = arith.constant 0 : i32
    %c0_i32_1 = arith.constant 0 : i32
    return %c0_i32, %c0_i32_0 : i32, i32
  }
  func.func @transform_5(%arg0: i32) -> (i32, i32) {
    %c0_i32 = arith.constant 0 : i32
    %c0_i32_0 = arith.constant 0 : i32
    %c0_i32_1 = arith.constant 0 : i32
    return %c0_i32, %c0_i32_0 : i32, i32
  }
  func.func @transform_6(%arg0: i32) -> (i32, i32) {
    %c0_i32 = arith.constant 0 : i32
    %c0_i32_0 = arith.constant 0 : i32
    %c0_i32_1 = arith.constant 0 : i32
    return %c0_i32, %c0_i32_0 : i32, i32
  }
  func.func @transform_7(%arg0: i32) -> (i32, i32) {
    %c0_i32 = arith.constant 0 : i32
    %c0_i32_0 = arith.constant 0 : i32
    return %arg0, %c0_i32 : i32, i32
  }
}

</mosaic_0001>

<bundles_post_ra>
// kernel: transformer_forward.5
= control target key start
LH: loop header
LB: loop body
LE: loop exit
PB: predicated region body
PF: predicated region fallthrough
CT: control target
= control target key end

     0   :  { %s2518_s24 = smov 0   ;;  %s3260_s0 = inlined_call_operand.vmem [shape: bf16[512,128], index: 0, kind: input, shape index: {}]   ;;  %s3261_s1 = inlined_call_operand.vmem [shape: f32[1,128], index: 1, kind: input, shape index: {}]   ;;  %s3262_s2 = inlined_call_operand.vmem [shape: f32[1,128], index: 2, kind: input, shape index: {}]   ;;  %s3263_s3 = inlined_call_operand.vmem [shape: bf16[128,128], index: 3, kind: input, shape index: {}]   ;;  %s3264_s4 = inlined_call_operand.vmem [shape: f32[1,128], index: 4, kind: input, shape index: {}]   ;;  %s3265_s5 = inlined_call_operand.vmem [shape: bf16[128,128], index: 5, kind: input, shape index: {}]   ;;  %s3266_s6 = inlined_call_operand.vmem [shape: f32[1,128], index: 6, kind: input, shape index: {}]   ;;  %s3267_s7 = inlined_call_operand.vmem [shape: bf16[512,128], index: 7, kind: output, shape index: {}]  }
   0x1 LB: > { %s1809_s25 = sadd.s32 4294967295, %s2476_s24   ;;  %p1813_p0 = scmp.ge.s32.totalorder %s2476_s24, 1  ;;  %s2476_s24 = sphi %s2518_s24, %s17_s24  }
   0x2   : > { %p238_p1 = scmp.lt.s32.totalorder %s2476_s24, 3 }
   0x4   : > { %p239_p2 = pnand %p1813_p0, %p238_p1 }
   0x5   : > { %s1814_s26 = sshll.u32 (!%p239_p2), %s1809_s25, 5 }
   0x6   : > { %242 = sbr.rel (%p239_p2) target bundleno = 753 (0x2f1), region = 48  ;;  %p271_p3 = scmp.lt.s32.totalorder (!%p239_p2), %s1814_s26, 63 }
   0xb   : > { %s3269_s26 = smov (!%p271_p3, %s1814_s26), 63  ;;  %v2262_v16 = vld [vmem:[%s3263_s3 + $0x38] sm:$0xff]   ;;  %v2263_v19 = vld [vmem:[%s3263_s3 + $0x30] sm:$0xff]   ;;  %v2264_v23 = vld [vmem:[%s3263_s3 + $0x28] sm:$0xff]  }
   0xc   : > { %s1815_s27 = sshll.u32 %s3269_s26, 2  ;;  %2158 = vmatprep.subr.bf16.mxu0 %v2262_v16  ;;  %v2265_v27 = vld [vmem:[%s3263_s3 + $0x20] sm:$0xff]   ;;  %v2266_v30 = vld [vmem:[%s3263_s3 + $0x18] sm:$0xff]   ;;  %v2267_v33 = vld [vmem:[%s3263_s3 + $0x10] sm:$0xff]  }
   0xd   : > { %s2534_s30 = scalar_lea.vmem %s3260_s0, %s1815_s27  ;;  %2159 = vmatpush3.bf16.msra.mxu0 %v2262_v16  ;;  %v2268_v37 = vld [vmem:[%s3263_s3 + $0x8] sm:$0xff]   ;;  %v2269_v41 = vld [vmem:[%s3263_s3] sm:$0xff]   ;;  %s3181_s10 = scalar_lea.vmem %s3267_s7, %s1815_s27 }
   0xe   : > { %v2080_v0 = vld [vmem:[%s2534_s30 + $0x8] sm:$0xff]   ;;  %v1937_v1 = vld [vmem:[%s2534_s30] sm:$0xff]   ;;  %v2081_v10 = vld [vmem:[%s2534_s30 + $0x10] sm:$0xff]   ;;  %2160 = vmatprep.subr.bf16.mxu0 %v2263_v19 }
   0xf   : > { %v2538_v2 = vunpack.c.l.bf16 %v2080_v0  ;;  %v2540_v3 = vunpack.c.l.bf16 %v1937_v1  ;;  %v2544_v4 = vunpack.c.h.bf16 %v2080_v0  ;;  %v2546_v5 = vunpack.c.h.bf16 %v1937_v1  ;;  %v2082_v13 = vld [vmem:[%s2534_s30 + $0x18] sm:$0xff]   ;;  %v2083_v22 = vld [vmem:[%s2534_s30 + $0x20] sm:$0xff]   ;;  %v2084_v26 = vld [vmem:[%s2534_s30 + $0x28] sm:$0xff]  }
  0x10   : > { %v2559_v11 = vunpack.c.h.bf16 %v2081_v10  ;;  %v2561_v12 = vunpack.c.l.bf16 %v2081_v10  ;;  %v2566_v14 = vunpack.c.h.bf16 %v2082_v13  ;;  %v2568_v15 = vunpack.c.l.bf16 %v2082_v13  ;;  %v2085_v36 = vld [vmem:[%s2534_s30 + $0x30] sm:$0xff]   ;;  %v2086_v40 = vld [vmem:[%s2534_s30 + $0x38] sm:$0xff]   ;;  %v2087_v48 = vld [vmem:[%s2534_s30 + $0x40] sm:$0xff]  }
  0x11   : > { %353 = vadd.xlane.f32.xlu1 %v2538_v2  ;;  %349 = vadd.xlane.f32.xlu0 %v2540_v3  ;;  %v446_v6 = vmul.f32 %v2546_v5, %v2546_v5  ;;  %v445_v7 = vmul.f32 %v2540_v3, %v2540_v3  ;;  %v448_v8 = vmul.f32 %v2544_v4, %v2544_v4  ;;  %v2590_v24 = vunpack.c.h.bf16 %v2083_v22  ;;  %v2088_v51 = vld [vmem:[%s2534_s30 + $0x48] sm:$0xff]   ;;  %v2089_v58 = vld [vmem:[%s2534_s30 + $0x50] sm:$0xff]   ;;  %v2090_v61 = vld [vmem:[%s2534_s30 + $0x58] sm:$0xff]  }
  0x12   : > { %v447_v9 = vmul.f32 %v2538_v2, %v2538_v2  ;;  %v450_v17 = vmul.f32 %v2559_v11, %v2559_v11  ;;  %v449_v18 = vmul.f32 %v2561_v12, %v2561_v12  ;;  %v452_v20 = vmul.f32 %v2566_v14, %v2566_v14  ;;  %2161 = vmatpush3.bf16.msra.mxu0 %v2263_v19  ;;  %v2092_v13 = vld [vmem:[%s2534_s30 + $0x68] sm:$0xff]  }
  0x13   : > { %v451_v21 = vmul.f32 %v2568_v15, %v2568_v15  ;;  %2162 = vmatprep.subr.bf16.mxu0 %v2264_v23  ;;  %v2592_v25 = vunpack.c.l.bf16 %v2083_v22  ;;  %v2600_v28 = vunpack.c.h.bf16 %v2084_v26  ;;  %v2602_v29 = vunpack.c.l.bf16 %v2084_v26  ;;  %v2093_v22 = vld [vmem:[%s2534_s30 + $0x70] sm:$0xff]  }
  0x14   : > { %v454_v31 = vmul.f32 %v2590_v24, %v2590_v24  ;;  %v2624_v38 = vunpack.c.h.bf16 %v2085_v36  ;;  %v2626_v39 = vunpack.c.l.bf16 %v2085_v36  ;;  %v2634_v42 = vunpack.c.h.bf16 %v2086_v40 }
  0x15   : > { %355 = vadd.xlane.f32.xlu1 %v2544_v4  ;;  %351 = vadd.xlane.f32.xlu0 %v2546_v5  ;;  %v453_v32 = vmul.f32 %v2592_v25, %v2592_v25  ;;  %v456_v34 = vmul.f32 %v2600_v28, %v2600_v28  ;;  %v455_v35 = vmul.f32 %v2602_v29, %v2602_v29  ;;  %v2636_v43 = vunpack.c.l.bf16 %v2086_v40 }
  0x16   : > { %2163 = vmatpush3.bf16.msra.mxu0 %v2264_v23  ;;  %v458_v44 = vmul.f32 %v2624_v38, %v2624_v38  ;;  %v457_v45 = vmul.f32 %v2626_v39, %v2626_v39  ;;  %v460_v46 = vmul.f32 %v2634_v42, %v2634_v42  ;;  %v2649_v49 = vunpack.c.h.bf16 %v2087_v48 }
  0x17   : > { %2164 = vmatprep.subr.bf16.mxu0 %v2265_v27  ;;  %v459_v47 = vmul.f32 %v2636_v43, %v2636_v43  ;;  %v2651_v50 = vunpack.c.l.bf16 %v2087_v48  ;;  %v2656_v52 = vunpack.c.h.bf16 %v2088_v51  ;;  %v2658_v53 = vunpack.c.l.bf16 %v2088_v51 }
  0x18   : > { %v462_v54 = vmul.f32 %v2649_v49, %v2649_v49  ;;  %v2671_v59 = vunpack.c.h.bf16 %v2089_v58  ;;  %v2673_v60 = vunpack.c.l.bf16 %v2089_v58  ;;  %v2678_v62 = vunpack.c.h.bf16 %v2090_v61 }
  0x19   : > { %479 = vadd.xlane.f32.xlu1 %v446_v6  ;;  %477 = vadd.xlane.f32.xlu0 %v445_v7  ;;  %v461_v55 = vmul.f32 %v2651_v50, %v2651_v50  ;;  %v464_v56 = vmul.f32 %v2656_v52, %v2656_v52  ;;  %v463_v57 = vmul.f32 %v2658_v53, %v2658_v53  ;;  %v2680_v63 = vunpack.c.l.bf16 %v2090_v61 }
  0x1a   : > { %2165 = vmatpush3.bf16.msra.mxu0 %v2265_v27  ;;  %v466_v0 = vmul.f32 %v2671_v59, %v2671_v59  ;;  %v465_v1 = vmul.f32 %v2673_v60, %v2673_v60  ;;  %v468_v6 = vmul.f32 %v2678_v62, %v2678_v62  ;;  %v2700_v16 = vunpack.c.h.bf16 %v2092_v13  ;;  %v2094_v27 = vld [vmem:[%s2534_s30 + $0x78] sm:$0xff]  }
  0x1b   : > { %2166 = vmatprep.subr.bf16.mxu0 %v2266_v30  ;;  %v467_v7 = vmul.f32 %v2680_v63, %v2680_v63  ;;  %v2715_v23 = vunpack.c.h.bf16 %v2093_v22  ;;  %v2717_v26 = vunpack.c.l.bf16 %v2093_v22 }
  0x1d   : > { %483 = vadd.xlane.f32.xlu1 %v448_v8  ;;  %481 = vadd.xlane.f32.xlu0 %v447_v9  ;;  %v2091_v8 = vld [vmem:[%s2534_s30 + $0x60] sm:$0xff]  }
  0x1e   : > { %2167 = vmatpush3.bf16.msra.mxu0 %v2266_v30  ;;  %v2693_v9 = vunpack.c.h.bf16 %v2091_v8  ;;  %v2695_v10 = vunpack.c.l.bf16 %v2091_v8  ;;  %v2722_v30 = vunpack.c.h.bf16 %v2094_v27 }
  0x1f   : > { %2168 = vmatprep.subr.bf16.mxu0 %v2267_v33 }
  0x20   : > { %v469_v19 = vmul.f32 %v2695_v10, %v2695_v10 }
  0x21   : > { %359 = vadd.xlane.f32.xlu1 %v2559_v11  ;;  %357 = vadd.xlane.f32.xlu0 %v2561_v12 }
  0x22   : > { %2169 = vmatpush3.bf16.msra.mxu0 %v2267_v33  ;;  %v473_v33 = vmul.f32 %v2717_v26, %v2717_v26 }
  0x23   : > { %2170 = vmatprep.subr.bf16.mxu0 %v2268_v37 }
  0x25   : > { %363 = vadd.xlane.f32.xlu1 %v2566_v14  ;;  %361 = vadd.xlane.f32.xlu0 %v2568_v15 }
  0x26   : > { %2171 = vmatpush3.bf16.msra.mxu0 %v2268_v37 }
  0x27   : > { %2172 = vmatprep.subr.bf16.mxu0 %v2269_v41 }
  0x29   : > { %487 = vadd.xlane.f32.xlu1 %v450_v17  ;;  %485 = vadd.xlane.f32.xlu0 %v449_v18  ;;  %v2702_v17 = vunpack.c.l.bf16 %v2092_v13  ;;  %v470_v18 = vmul.f32 %v2693_v9, %v2693_v9 }
  0x2a   : > { %2173 = vmatpush3.bf16.msra.mxu0 %v2269_v41 }
  0x2d   : > { %491 = vadd.xlane.f32.xlu1 %v452_v20  ;;  %489 = vadd.xlane.f32.xlu0 %v451_v21  ;;  %v472_v20 = vmul.f32 %v2700_v16, %v2700_v16  ;;  %v471_v21 = vmul.f32 %v2702_v17, %v2702_v17 }
  0x31   : > { %367 = vadd.xlane.f32.xlu1 %v2590_v24  ;;  %365 = vadd.xlane.f32.xlu0 %v2592_v25 }
  0x35   : > { %371 = vadd.xlane.f32.xlu1 %v2600_v28  ;;  %369 = vadd.xlane.f32.xlu0 %v2602_v29 }
  0x39   : > { %495 = vadd.xlane.f32.xlu1 %v454_v31  ;;  %493 = vadd.xlane.f32.xlu0 %v453_v32  ;;  %v2724_v31 = vunpack.c.l.bf16 %v2094_v27  ;;  %v474_v32 = vmul.f32 %v2715_v23, %v2715_v23 }
  0x3d   : > { %499 = vadd.xlane.f32.xlu1 %v456_v34  ;;  %497 = vadd.xlane.f32.xlu0 %v455_v35  ;;  %v476_v34 = vmul.f32 %v2722_v30, %v2722_v30  ;;  %v475_v35 = vmul.f32 %v2724_v31, %v2724_v31 }
  0x41   : > { %375 = vadd.xlane.f32.xlu1 %v2624_v38  ;;  %373 = vadd.xlane.f32.xlu0 %v2626_v39 }
  0x45   : > { %379 = vadd.xlane.f32.xlu1 %v2634_v42  ;;  %377 = vadd.xlane.f32.xlu0 %v2636_v43 }
  0x49   : > { %503 = vadd.xlane.f32.xlu1 %v458_v44  ;;  %501 = vadd.xlane.f32.xlu0 %v457_v45 }
  0x4d   : > { %507 = vadd.xlane.f32.xlu1 %v460_v46  ;;  %505 = vadd.xlane.f32.xlu0 %v459_v47 }
  0x51   : > { %383 = vadd.xlane.f32.xlu1 %v2649_v49  ;;  %381 = vadd.xlane.f32.xlu0 %v2651_v50 }
  0x55   : > { %387 = vadd.xlane.f32.xlu1 %v2656_v52  ;;  %385 = vadd.xlane.f32.xlu0 %v2658_v53 }
  0x59   : > { %511 = vadd.xlane.f32.xlu1 %v462_v54  ;;  %509 = vadd.xlane.f32.xlu0 %v461_v55 }
  0x5d   : > { %515 = vadd.xlane.f32.xlu1 %v464_v56  ;;  %513 = vadd.xlane.f32.xlu0 %v463_v57 }
  0x61   : > { %391 = vadd.xlane.f32.xlu1 %v2671_v59  ;;  %389 = vadd.xlane.f32.xlu0 %v2673_v60 }
  0x65   : > { %395 = vadd.xlane.f32.xlu1 %v2678_v62  ;;  %393 = vadd.xlane.f32.xlu0 %v2680_v63 }
  0x69   : > { %519 = vadd.xlane.f32.xlu1 %v466_v0  ;;  %517 = vadd.xlane.f32.xlu0 %v465_v1 }
  0x6d   : > { %523 = vadd.xlane.f32.xlu1 %v468_v6  ;;  %521 = vadd.xlane.f32.xlu0 %v467_v7 }
  0x71   : > { %399 = vadd.xlane.f32.xlu1 %v2693_v9  ;;  %397 = vadd.xlane.f32.xlu0 %v2695_v10 }
  0x75   : > { %403 = vadd.xlane.f32.xlu1 %v2700_v16  ;;  %401 = vadd.xlane.f32.xlu0 %v2702_v17 }
  0x79   : > { %527 = vadd.xlane.f32.xlu1 %v470_v18  ;;  %525 = vadd.xlane.f32.xlu0 %v469_v19 }
  0x7d   : > { %531 = vadd.xlane.f32.xlu1 %v472_v20  ;;  %529 = vadd.xlane.f32.xlu0 %v471_v21 }
  0x81   : > { %407 = vadd.xlane.f32.xlu1 %v2715_v23  ;;  %405 = vadd.xlane.f32.xlu0 %v2717_v26 }
  0x85   : > { %411 = vadd.xlane.f32.xlu1 %v2722_v30  ;;  %409 = vadd.xlane.f32.xlu0 %v2724_v31 }
  0x89   : > { %535 = vadd.xlane.f32.xlu1 %v474_v32  ;;  %533 = vadd.xlane.f32.xlu0 %v473_v33 }
  0x8d   : > { %539 = vadd.xlane.f32.xlu1 %v476_v34  ;;  %537 = vadd.xlane.f32.xlu0 %v475_v35 }
  0x9a   : > { %v354_v36 = vpop.xlane.xlu1 %353  ;;  %v350_v37 = vpop.xlane.xlu0 %349 }
  0x9b   : > { %v413_v44 = vmul.f32 0.03125, %v350_v37  ;;  %v2736_v46 = vmul.f32 0.03125, %v354_v36 }
  0x9d   : > { %v573_v54 = vmul.f32 %v413_v44, %v413_v44  ;;  %v575_v0 = vmul.f32 %v2736_v46, %v2736_v46 }
  0x9e   : > { %v356_v40 = vpop.xlane.xlu1 %355  ;;  %v352_v41 = vpop.xlane.xlu0 %351 }
  0x9f   : > { %v414_v45 = vmul.f32 0.03125, %v352_v41  ;;  %v2738_v47 = vmul.f32 0.03125, %v356_v40 }
  0xa1   : > { %v574_v55 = vmul.f32 %v414_v45, %v414_v45  ;;  %v576_v1 = vmul.f32 %v2738_v47, %v2738_v47 }
  0xa2   : > { %v480_v48 = vpop.xlane.xlu1 %479  ;;  %v478_v51 = vpop.xlane.xlu0 %477 }
  0xa3   : > { %v542_v56 = vmul.f32 0.03125, %v480_v48  ;;  %v541_v57 = vmul.f32 0.03125, %v478_v51 }
  0xa5   : > { %v606_v58 = vsub.f32 %v542_v56, %v574_v55  ;;  %v605_v61 = vsub.f32 %v541_v57, %v573_v54 }
  0xa6   : > { %v484_v6 = vpop.xlane.xlu1 %483  ;;  %v482_v7 = vpop.xlane.xlu0 %481 }
  0xa7   : > { %v638_v8 = vadd.f32 1e-05, %v606_v58  ;;  %v637_v13 = vadd.f32 1e-05, %v605_v61  ;;  %v544_v18 = vmul.f32 0.03125, %v484_v6  ;;  %v543_v19 = vmul.f32 0.03125, %v482_v7 }
  0xa8   : > { %v702_v6 = vsub.f32 %v2546_v5, %v414_v45 }
  0xa9   : > { %2278 = vrsqrt.f32 %v638_v8  ;;  %v608_v20 = vsub.f32 %v544_v18, %v576_v1  ;;  %v607_v21 = vsub.f32 %v543_v19, %v575_v0  ;;  %v701_v1 = vsub.f32 %v2540_v3, %v413_v44  ;;  %v2765_v19 = vld [vmem:[%s3261_s1] ss:$0 sm:$0xff] }
  0xaa   : > { %2280 = vrsqrt.f32 %v637_v13  ;;  %v360_v22 = vpop.xlane.xlu1 %359  ;;  %v358_v27 = vpop.xlane.xlu0 %357 }
  0xab   : > { %v640_v32 = vadd.f32 1e-05, %v608_v20  ;;  %v639_v33 = vadd.f32 1e-05, %v607_v21  ;;  %v2744_v36 = vmul.f32 0.03125, %v360_v22  ;;  %v2746_v37 = vmul.f32 0.03125, %v358_v27 }
  0xad   : > { %2282 = vrsqrt.f32 %v640_v32  ;;  %v578_v54 = vmul.f32 %v2744_v36, %v2744_v36  ;;  %v577_v55 = vmul.f32 %v2746_v37, %v2746_v37 }
  0xae   : > { %2284 = vrsqrt.f32 %v639_v33  ;;  %v364_v34 = vpop.xlane.xlu1 %363  ;;  %v362_v35 = vpop.xlane.xlu0 %361  ;;  %v703_v33 = vsub.f32 %v2538_v2, %v2736_v46 }
  0xaf   : > { %v2748_v40 = vmul.f32 0.03125, %v364_v34  ;;  %v2750_v41 = vmul.f32 0.03125, %v362_v35 }
  0xb1   : > { %v580_v7 = vmul.f32 %v2748_v40, %v2748_v40  ;;  %v579_v8 = vmul.f32 %v2750_v41, %v2750_v41 }
  0xb2   : > { %v488_v48 = vpop.xlane.xlu1 %487  ;;  %v486_v51 = vpop.xlane.xlu0 %485 }
  0xb3   : > { %v546_v56 = vmul.f32 0.03125, %v488_v48  ;;  %v545_v57 = vmul.f32 0.03125, %v486_v51  ;;  %v2772_v48 = vld [vmem:[%s3262_s2] ss:$0 sm:$0xff] }
  0xb5   : > { %v610_v58 = vsub.f32 %v546_v56, %v578_v54  ;;  %v609_v61 = vsub.f32 %v545_v57, %v577_v55  ;;  %v704_v54 = vsub.f32 %v2544_v4, %v2738_v47 }
  0xb6   : > { %v2279_v0 = vpop.eup %2278  ;;  %v492_v13 = vpop.xlane.xlu1 %491 }
  0xb7   : > { %v490_v18 = vpop.xlane.xlu0 %489  ;;  %v2281_v20 = vpop.eup %2280  ;;  %v642_v21 = vadd.f32 1e-05, %v610_v58  ;;  %v641_v22 = vadd.f32 1e-05, %v609_v61  ;;  %v548_v27 = vmul.f32 0.03125, %v492_v13  ;;  %v734_v45 = vmul.f32 %v2279_v0, %v702_v6 }
  0xb8   : > { %v547_v44 = vmul.f32 0.03125, %v490_v18  ;;  %v733_v32 = vmul.f32 %v2281_v20, %v701_v1 }
  0xb9   : > { %2286 = vrsqrt.f32 %v642_v21  ;;  %v612_v34 = vsub.f32 %v548_v27, %v580_v7  ;;  %v772_v58 = vmul.f32 %v2765_v19, %v734_v45 }
  0xba   : > { %v611_v35 = vsub.f32 %v547_v44, %v579_v8  ;;  %v2283_v51 = vpop.eup %2282  ;;  %2288 = vrsqrt.f32 %v641_v22  ;;  %v368_v55 = vpop.xlane.xlu1 %367  ;;  %v771_v57 = vmul.f32 %v2765_v19, %v733_v32 }
  0xbb   : > { %v366_v56 = vpop.xlane.xlu0 %365  ;;  %v2285_v46 = vpop.eup %2284  ;;  %v644_v61 = vadd.f32 1e-05, %v612_v34  ;;  %v810_v6 = vadd.f32 %v2772_v48, %v772_v58  ;;  %v736_v8 = vmul.f32 %v2283_v51, %v704_v54  ;;  %v2781_v21 = vmul.f32 0.03125, %v368_v55 }
  0xbc   : > { %v643_v0 = vadd.f32 1e-05, %v611_v35  ;;  %v809_v1 = vadd.f32 %v2772_v48, %v771_v57  ;;  %v735_v7 = vmul.f32 %v2285_v46, %v703_v33  ;;  %v2783_v22 = vmul.f32 0.03125, %v366_v56 }
  0xbd   : > { %2290 = vrsqrt.f32 %v644_v61  ;;  %v774_v27 = vmul.f32 %v2765_v19, %v736_v8  ;;  %v582_v51 = vmul.f32 %v2781_v21, %v2781_v21 }
  0xbe   : > { %2292 = vrsqrt.f32 %v643_v0  ;;  %v372_v13 = vpop.xlane.xlu1 %371  ;;  %v841_v18 = vpack.c.bf16 %v810_v6, %v809_v1  ;;  %v773_v20 = vmul.f32 %v2765_v19, %v735_v7  ;;  %v581_v54 = vmul.f32 %v2783_v22, %v2783_v22 }
  0xbf   : > { %v370_v47 = vpop.xlane.xlu0 %369  ;;  %v2787_v32 = vmul.f32 0.03125, %v372_v13  ;;  %v812_v35 = vadd.f32 %v2772_v48, %v774_v27  ;;  %v706_v0 = vsub.f32 %v2559_v11, %v2744_v36  ;;  %v705_v1 = vsub.f32 %v2561_v12, %v2746_v37 }
  0xc0   : > { %2174 = vmatprep.mubr.bf16.mxu0 %v841_v18  ;;  %v811_v44 = vadd.f32 %v2772_v48, %v773_v20  ;;  %v2789_v45 = vmul.f32 0.03125, %v370_v47  ;;  %v708_v36 = vsub.f32 %v2566_v14, %v2748_v40 }
  0xc1   : > { %v584_v6 = vmul.f32 %v2787_v32, %v2787_v32 }
  0xc2   : > { %v496_v33 = vpop.xlane.xlu1 %495  ;;  %v842_v57 = vpack.c.bf16 %v812_v35, %v811_v44  ;;  %v583_v7 = vmul.f32 %v2789_v45, %v2789_v45 }
  0xc3   : > { %v494_v34 = vpop.xlane.xlu0 %493  ;;  %v550_v55 = vmul.f32 0.03125, %v496_v33 }
  0xc4   : > { %v549_v56 = vmul.f32 0.03125, %v494_v34  ;;  %2175 = vmatmul.mubr.bf16.vlgmr.msra.gmra.mxu0 %v842_v57 }
  0xc5   : > { %v614_v58 = vsub.f32 %v550_v55, %v582_v51 }
  0xc6   : > { %v613_v46 = vsub.f32 %v549_v56, %v581_v54  ;;  %v2287_v61 = vpop.eup %2286  ;;  %v500_v8 = vpop.xlane.xlu1 %499  ;;  %v707_v54 = vsub.f32 %v2568_v15, %v2750_v41 }
  0xc7   : > { %v498_v13 = vpop.xlane.xlu0 %497  ;;  %v2289_v47 = vpop.eup %2288  ;;  %v646_v18 = vadd.f32 1e-05, %v614_v58  ;;  %v552_v27 = vmul.f32 0.03125, %v500_v8  ;;  %v738_v34 = vmul.f32 %v2287_v61, %v706_v0 }
  0xc8   : > { %v645_v20 = vadd.f32 1e-05, %v613_v46  ;;  %v551_v44 = vmul.f32 0.03125, %v498_v13  ;;  %v737_v33 = vmul.f32 %v2289_v47, %v705_v1 }
  0xc9   : > { %2294 = vrsqrt.f32 %v646_v18  ;;  %v616_v37 = vsub.f32 %v552_v27, %v584_v6  ;;  %v776_v58 = vmul.f32 %v2765_v19, %v738_v34 }
  0xca   : > { %v615_v35 = vsub.f32 %v551_v44, %v583_v7  ;;  %v2291_v51 = vpop.eup %2290  ;;  %2296 = vrsqrt.f32 %v645_v20  ;;  %v376_v55 = vpop.xlane.xlu1 %375  ;;  %v775_v57 = vmul.f32 %v2765_v19, %v737_v33 }
  0xcb   : > { %v374_v56 = vpop.xlane.xlu0 %373  ;;  %v2293_v46 = vpop.eup %2292  ;;  %v648_v1 = vadd.f32 1e-05, %v616_v37  ;;  %v814_v40 = vadd.f32 %v2772_v48, %v776_v58  ;;  %v740_v7 = vmul.f32 %v2291_v51, %v708_v36  ;;  %v2813_v18 = vmul.f32 0.03125, %v376_v55 }
  0xcc   : > { %v647_v61 = vadd.f32 1e-05, %v615_v35  ;;  %v813_v0 = vadd.f32 %v2772_v48, %v775_v57  ;;  %v739_v6 = vmul.f32 %v2293_v46, %v707_v54  ;;  %v2815_v20 = vmul.f32 0.03125, %v374_v56 }
  0xcd   : > { %2298 = vrsqrt.f32 %v648_v1  ;;  %v778_v27 = vmul.f32 %v2765_v19, %v740_v7  ;;  %v586_v51 = vmul.f32 %v2813_v18, %v2813_v18 }
  0xce   : > { %2300 = vrsqrt.f32 %v647_v61  ;;  %v380_v8 = vpop.xlane.xlu1 %379  ;;  %v843_v13 = vpack.c.bf16 %v814_v40, %v813_v0  ;;  %v777_v47 = vmul.f32 %v2765_v19, %v739_v6  ;;  %v585_v54 = vmul.f32 %v2815_v20, %v2815_v20 }
  0xcf   : > { %v378_v41 = vpop.xlane.xlu0 %377  ;;  %v2819_v33 = vmul.f32 0.03125, %v380_v8  ;;  %v816_v35 = vadd.f32 %v2772_v48, %v778_v27  ;;  %v710_v61 = vsub.f32 %v2590_v24, %v2781_v21  ;;  %v709_v0 = vsub.f32 %v2592_v25, %v2783_v22 }
  0xd0   : > { %2178 = vmatprep.mubr.bf16.mxu0 %v843_v13  ;;  %v815_v44 = vadd.f32 %v2772_v48, %v777_v47  ;;  %v2821_v34 = vmul.f32 0.03125, %v378_v41  ;;  %v712_v21 = vsub.f32 %v2600_v28, %v2787_v32 }
  0xd1   : > { %v588_v40 = vmul.f32 %v2819_v33, %v2819_v33 }
  0xd2   : > { %v504_v36 = vpop.xlane.xlu1 %503  ;;  %v844_v57 = vpack.c.bf16 %v816_v35, %v815_v44  ;;  %v587_v6 = vmul.f32 %v2821_v34, %v2821_v34 }
  0xd3   : > { %v502_v37 = vpop.xlane.xlu0 %501  ;;  %v554_v55 = vmul.f32 0.03125, %v504_v36 }
  0xd4   : > { %v553_v56 = vmul.f32 0.03125, %v502_v37  ;;  %2179 = vmatmul.mubr.bf16.gmra.mxu0 %v844_v57 }
  0xd5   : > { %v618_v58 = vsub.f32 %v554_v55, %v586_v51 }
  0xd6   : > { %v617_v46 = vsub.f32 %v553_v56, %v585_v54  ;;  %v2295_v1 = vpop.eup %2294  ;;  %v508_v7 = vpop.xlane.xlu1 %507  ;;  %v711_v54 = vsub.f32 %v2602_v29, %v2789_v45 }
  0xd7   : > { %v506_v8 = vpop.xlane.xlu0 %505  ;;  %v2297_v41 = vpop.eup %2296  ;;  %v650_v13 = vadd.f32 1e-05, %v618_v58  ;;  %v556_v27 = vmul.f32 0.03125, %v508_v7  ;;  %v742_v37 = vmul.f32 %v2295_v1, %v710_v61 }
  0xd8   : > { %v649_v47 = vadd.f32 1e-05, %v617_v46  ;;  %v555_v44 = vmul.f32 0.03125, %v506_v8  ;;  %v741_v36 = vmul.f32 %v2297_v41, %v709_v0 }
  0xd9   : > { %2302 = vrsqrt.f32 %v650_v13  ;;  %v620_v22 = vsub.f32 %v556_v27, %v588_v40  ;;  %v780_v58 = vmul.f32 %v2765_v19, %v742_v37 }
  0xda   : > { %v619_v35 = vsub.f32 %v555_v44, %v587_v6  ;;  %v2299_v51 = vpop.eup %2298  ;;  %2304 = vrsqrt.f32 %v649_v47  ;;  %v384_v55 = vpop.xlane.xlu1 %383  ;;  %v779_v57 = vmul.f32 %v2765_v19, %v741_v36 }
  0xdb   : > { %v382_v56 = vpop.xlane.xlu0 %381  ;;  %v2301_v46 = vpop.eup %2300  ;;  %v652_v0 = vadd.f32 1e-05, %v620_v22  ;;  %v818_v32 = vadd.f32 %v2772_v48, %v780_v58  ;;  %v744_v6 = vmul.f32 %v2299_v51, %v712_v21  ;;  %v2845_v13 = vmul.f32 0.03125, %v384_v55 }
  0xdc   : > { %v651_v1 = vadd.f32 1e-05, %v619_v35  ;;  %v817_v61 = vadd.f32 %v2772_v48, %v779_v57  ;;  %v743_v40 = vmul.f32 %v2301_v46, %v711_v54  ;;  %v2847_v47 = vmul.f32 0.03125, %v382_v56 }
  0xdd   : > { %2306 = vrsqrt.f32 %v652_v0  ;;  %v782_v27 = vmul.f32 %v2765_v19, %v744_v6  ;;  %v590_v51 = vmul.f32 %v2845_v13, %v2845_v13 }
  0xde   : > { %2308 = vrsqrt.f32 %v651_v1  ;;  %v388_v7 = vpop.xlane.xlu1 %387  ;;  %v845_v8 = vpack.c.bf16 %v818_v32, %v817_v61  ;;  %v781_v41 = vmul.f32 %v2765_v19, %v743_v40  ;;  %v589_v54 = vmul.f32 %v2847_v47, %v2847_v47 }
  0xdf   : > { %v386_v45 = vpop.xlane.xlu0 %385  ;;  %v2851_v36 = vmul.f32 0.03125, %v388_v7  ;;  %v820_v35 = vadd.f32 %v2772_v48, %v782_v27  ;;  %v714_v1 = vsub.f32 %v2624_v38, %v2813_v18  ;;  %v713_v61 = vsub.f32 %v2626_v39, %v2815_v20 }
  0xe0   : > { %2182 = vmatprep.mubr.bf16.mxu0 %v845_v8  ;;  %v819_v44 = vadd.f32 %v2772_v48, %v781_v41  ;;  %v2853_v37 = vmul.f32 0.03125, %v386_v45  ;;  %v716_v18 = vsub.f32 %v2634_v42, %v2819_v33 }
  0xe1   : > { %v592_v32 = vmul.f32 %v2851_v36, %v2851_v36 }
  0xe2   : > { %v512_v21 = vpop.xlane.xlu1 %511  ;;  %v846_v57 = vpack.c.bf16 %v820_v35, %v819_v44  ;;  %v591_v40 = vmul.f32 %v2853_v37, %v2853_v37 }
  0xe3   : > { %v510_v22 = vpop.xlane.xlu0 %509  ;;  %v558_v55 = vmul.f32 0.03125, %v512_v21 }
  0xe4   : > { %v557_v56 = vmul.f32 0.03125, %v510_v22  ;;  %2183 = vmatmul.mubr.bf16.gmra.mxu0 %v846_v57 }
  0xe5   : > { %v622_v58 = vsub.f32 %v558_v55, %v590_v51 }
  0xe6   : > { %v621_v46 = vsub.f32 %v557_v56, %v589_v54  ;;  %v2303_v0 = vpop.eup %2302  ;;  %v516_v6 = vpop.xlane.xlu1 %515  ;;  %v715_v54 = vsub.f32 %v2636_v43, %v2821_v34 }
  0xe7   : > { %v514_v7 = vpop.xlane.xlu0 %513  ;;  %v2305_v45 = vpop.eup %2304  ;;  %v654_v8 = vadd.f32 1e-05, %v622_v58  ;;  %v560_v27 = vmul.f32 0.03125, %v516_v6  ;;  %v746_v22 = vmul.f32 %v2303_v0, %v714_v1 }
  0xe8   : > { %v653_v41 = vadd.f32 1e-05, %v621_v46  ;;  %v559_v44 = vmul.f32 0.03125, %v514_v7  ;;  %v745_v21 = vmul.f32 %v2305_v45, %v713_v61 }
  0xe9   : > { %2310 = vrsqrt.f32 %v654_v8  ;;  %v624_v20 = vsub.f32 %v560_v27, %v592_v32  ;;  %v784_v58 = vmul.f32 %v2765_v19, %v746_v22 }
  0xea   : > { %v623_v35 = vsub.f32 %v559_v44, %v591_v40  ;;  %v2307_v51 = vpop.eup %2306  ;;  %2312 = vrsqrt.f32 %v653_v41  ;;  %v392_v55 = vpop.xlane.xlu1 %391  ;;  %v783_v57 = vmul.f32 %v2765_v19, %v745_v21 }
  0xeb   : > { %v390_v56 = vpop.xlane.xlu0 %389  ;;  %v2309_v46 = vpop.eup %2308  ;;  %v656_v61 = vadd.f32 1e-05, %v624_v20  ;;  %v822_v33 = vadd.f32 %v2772_v48, %v784_v58  ;;  %v748_v40 = vmul.f32 %v2307_v51, %v716_v18  ;;  %v2877_v8 = vmul.f32 0.03125, %v392_v55 }
  0xec   : > { %v655_v0 = vadd.f32 1e-05, %v623_v35  ;;  %v821_v1 = vadd.f32 %v2772_v48, %v783_v57  ;;  %v747_v32 = vmul.f32 %v2309_v46, %v715_v54  ;;  %v2879_v41 = vmul.f32 0.03125, %v390_v56 }
  0xed   : > { %2314 = vrsqrt.f32 %v656_v61  ;;  %v786_v27 = vmul.f32 %v2765_v19, %v748_v40  ;;  %v594_v51 = vmul.f32 %v2877_v8, %v2877_v8 }
  0xee   : > { %2316 = vrsqrt.f32 %v655_v0  ;;  %v396_v6 = vpop.xlane.xlu1 %395  ;;  %v847_v7 = vpack.c.bf16 %v822_v33, %v821_v1  ;;  %v785_v45 = vmul.f32 %v2765_v19, %v747_v32  ;;  %v593_v54 = vmul.f32 %v2879_v41, %v2879_v41 }
  0xef   : > { %v394_v34 = vpop.xlane.xlu0 %393  ;;  %v2883_v21 = vmul.f32 0.03125, %v396_v6  ;;  %v824_v35 = vadd.f32 %v2772_v48, %v786_v27  ;;  %v718_v0 = vsub.f32 %v2649_v49, %v2845_v13  ;;  %v717_v1 = vsub.f32 %v2651_v50, %v2847_v47 }
  0xf0   : > { %2186 = vmatprep.mubr.bf16.mxu0 %v847_v7  ;;  %v823_v44 = vadd.f32 %v2772_v48, %v785_v45  ;;  %v2885_v22 = vmul.f32 0.03125, %v394_v34  ;;  %v720_v13 = vsub.f32 %v2656_v52, %v2851_v36 }
  0xf1   : > { %v596_v33 = vmul.f32 %v2883_v21, %v2883_v21 }
  0xf2   : > { %v520_v18 = vpop.xlane.xlu1 %519  ;;  %v848_v57 = vpack.c.bf16 %v824_v35, %v823_v44  ;;  %v595_v32 = vmul.f32 %v2885_v22, %v2885_v22 }
  0xf3   : > { %v518_v20 = vpop.xlane.xlu0 %517  ;;  %v562_v55 = vmul.f32 0.03125, %v520_v18 }
  0xf4   : > { %v561_v56 = vmul.f32 0.03125, %v518_v20  ;;  %2187 = vmatmul.mubr.bf16.gmra.mxu0 %v848_v57 }
  0xf5   : > { %v626_v58 = vsub.f32 %v562_v55, %v594_v51 }
  0xf6   : > { %v625_v46 = vsub.f32 %v561_v56, %v593_v54  ;;  %v2311_v61 = vpop.eup %2310  ;;  %v524_v40 = vpop.xlane.xlu1 %523  ;;  %v719_v54 = vsub.f32 %v2658_v53, %v2853_v37 }
  0xf7   : > { %v522_v6 = vpop.xlane.xlu0 %521  ;;  %v2313_v34 = vpop.eup %2312  ;;  %v658_v7 = vadd.f32 1e-05, %v626_v58  ;;  %v564_v27 = vmul.f32 0.03125, %v524_v40  ;;  %v750_v20 = vmul.f32 %v2311_v61, %v718_v0 }
  0xf8   : > { %v657_v45 = vadd.f32 1e-05, %v625_v46  ;;  %v563_v44 = vmul.f32 0.03125, %v522_v6  ;;  %v749_v18 = vmul.f32 %v2313_v34, %v717_v1 }
  0xf9   : > { %2318 = vrsqrt.f32 %v658_v7  ;;  %v628_v47 = vsub.f32 %v564_v27, %v596_v33  ;;  %v788_v58 = vmul.f32 %v2765_v19, %v750_v20 }
  0xfa   : > { %v627_v35 = vsub.f32 %v563_v44, %v595_v32  ;;  %v2315_v51 = vpop.eup %2314  ;;  %2320 = vrsqrt.f32 %v657_v45  ;;  %v400_v55 = vpop.xlane.xlu1 %399  ;;  %v787_v57 = vmul.f32 %v2765_v19, %v749_v18 }
  0xfb   : > { %v398_v56 = vpop.xlane.xlu0 %397  ;;  %v2317_v46 = vpop.eup %2316  ;;  %v660_v1 = vadd.f32 1e-05, %v628_v47  ;;  %v826_v36 = vadd.f32 %v2772_v48, %v788_v58  ;;  %v752_v32 = vmul.f32 %v2315_v51, %v720_v13  ;;  %v2909_v7 = vmul.f32 0.03125, %v400_v55 }
  0xfc   : > { %v659_v61 = vadd.f32 1e-05, %v627_v35  ;;  %v825_v0 = vadd.f32 %v2772_v48, %v787_v57  ;;  %v751_v33 = vmul.f32 %v2317_v46, %v719_v54  ;;  %v2911_v45 = vmul.f32 0.03125, %v398_v56 }
  0xfd   : > { %2322 = vrsqrt.f32 %v660_v1  ;;  %v790_v27 = vmul.f32 %v2765_v19, %v752_v32  ;;  %v598_v51 = vmul.f32 %v2909_v7, %v2909_v7 }
  0xfe   : > { %2324 = vrsqrt.f32 %v659_v61  ;;  %v404_v40 = vpop.xlane.xlu1 %403  ;;  %v849_v6 = vpack.c.bf16 %v826_v36, %v825_v0  ;;  %v789_v34 = vmul.f32 %v2765_v19, %v751_v33  ;;  %v597_v54 = vmul.f32 %v2911_v45, %v2911_v45 }
  0xff   : > { %v402_v37 = vpop.xlane.xlu0 %401  ;;  %v2915_v18 = vmul.f32 0.03125, %v404_v40  ;;  %v828_v35 = vadd.f32 %v2772_v48, %v790_v27  ;;  %v722_v61 = vsub.f32 %v2671_v59, %v2877_v8  ;;  %v721_v0 = vsub.f32 %v2673_v60, %v2879_v41 }
 0x100   : > { %2190 = vmatprep.mubr.bf16.mxu0 %v849_v6  ;;  %v827_v44 = vadd.f32 %v2772_v48, %v789_v34  ;;  %v2917_v20 = vmul.f32 0.03125, %v402_v37  ;;  %v724_v8 = vsub.f32 %v2678_v62, %v2883_v21 }
 0x101   : > { %v600_v36 = vmul.f32 %v2915_v18, %v2915_v18 }
 0x102   : > { %v528_v13 = vpop.xlane.xlu1 %527  ;;  %v850_v57 = vpack.c.bf16 %v828_v35, %v827_v44  ;;  %v599_v33 = vmul.f32 %v2917_v20, %v2917_v20 }
 0x103   : > { %v526_v47 = vpop.xlane.xlu0 %525  ;;  %v566_v55 = vmul.f32 0.03125, %v528_v13 }
 0x104   : > { %v565_v56 = vmul.f32 0.03125, %v526_v47  ;;  %2191 = vmatmul.mubr.bf16.gmra.mxu0 %v850_v57 }
 0x105   : > { %v630_v58 = vsub.f32 %v566_v55, %v598_v51 }
 0x106   : > { %v629_v46 = vsub.f32 %v565_v56, %v597_v54  ;;  %v2319_v1 = vpop.eup %2318  ;;  %v532_v32 = vpop.xlane.xlu1 %531  ;;  %v723_v54 = vsub.f32 %v2680_v63, %v2885_v22 }
 0x107   : > { %v530_v40 = vpop.xlane.xlu0 %529  ;;  %v2321_v37 = vpop.eup %2320  ;;  %v662_v6 = vadd.f32 1e-05, %v630_v58  ;;  %v568_v27 = vmul.f32 0.03125, %v532_v32  ;;  %v754_v47 = vmul.f32 %v2319_v1, %v722_v61 }
 0x108   : > { %v661_v34 = vadd.f32 1e-05, %v629_v46  ;;  %v567_v44 = vmul.f32 0.03125, %v530_v40  ;;  %v753_v13 = vmul.f32 %v2321_v37, %v721_v0 }
 0x109   : > { %2326 = vrsqrt.f32 %v662_v6  ;;  %v632_v41 = vsub.f32 %v568_v27, %v600_v36  ;;  %v792_v58 = vmul.f32 %v2765_v19, %v754_v47 }
 0x10a   : > { %v631_v35 = vsub.f32 %v567_v44, %v599_v33  ;;  %v2323_v51 = vpop.eup %2322  ;;  %2328 = vrsqrt.f32 %v661_v34  ;;  %v408_v55 = vpop.xlane.xlu1 %407  ;;  %v791_v57 = vmul.f32 %v2765_v19, %v753_v13 }
 0x10b   : > { %v406_v56 = vpop.xlane.xlu0 %405  ;;  %v2325_v46 = vpop.eup %2324  ;;  %v664_v0 = vadd.f32 1e-05, %v632_v41  ;;  %v830_v21 = vadd.f32 %v2772_v48, %v792_v58  ;;  %v756_v33 = vmul.f32 %v2323_v51, %v724_v8  ;;  %v2941_v6 = vmul.f32 0.03125, %v408_v55  ;;  %v2270_v51 = vld [vmem:[%s3265_s5 + $0x38] sm:$0xff]  }
 0x10c   : > { %v663_v1 = vadd.f32 1e-05, %v631_v35  ;;  %v829_v61 = vadd.f32 %v2772_v48, %v791_v57  ;;  %v755_v36 = vmul.f32 %v2325_v46, %v723_v54  ;;  %v2943_v34 = vmul.f32 0.03125, %v406_v56  ;;  %2206 = vmatprep.subr.bf16.mxu1 %v2270_v51 }
 0x10d   : > { %2330 = vrsqrt.f32 %v664_v0  ;;  %v794_v27 = vmul.f32 %v2765_v19, %v756_v33  ;;  %v602_v54 = vmul.f32 %v2941_v6, %v2941_v6  ;;  %2207 = vmatpush3.bf16.msra.mxu1 %v2270_v51 }
 0x10e   : > { %2332 = vrsqrt.f32 %v663_v1  ;;  %v412_v32 = vpop.xlane.xlu1 %411  ;;  %v851_v40 = vpack.c.bf16 %v830_v21, %v829_v61  ;;  %v793_v37 = vmul.f32 %v2765_v19, %v755_v36  ;;  %v601_v55 = vmul.f32 %v2943_v34, %v2943_v34 }
 0x10f   : > { %v410_v22 = vpop.xlane.xlu0 %409  ;;  %v2947_v13 = vmul.f32 0.03125, %v412_v32  ;;  %v832_v35 = vadd.f32 %v2772_v48, %v794_v27  ;;  %v726_v61 = vsub.f32 %v2693_v9, %v2909_v7  ;;  %v725_v21 = vsub.f32 %v2695_v10, %v2911_v45  ;;  %v2271_v7 = vld [vmem:[%s3265_s5 + $0x30] sm:$0xff]  }
 0x110   : > { %2194 = vmatprep.mubr.bf16.mxu0 %v851_v40  ;;  %v831_v44 = vadd.f32 %v2772_v48, %v793_v37  ;;  %v2949_v47 = vmul.f32 0.03125, %v410_v22  ;;  %v728_v45 = vsub.f32 %v2700_v16, %v2915_v18  ;;  %2208 = vmatprep.subr.bf16.mxu1 %v2271_v7  ;;  %v2272_v18 = vld [vmem:[%s3265_s5 + $0x28] sm:$0xff]  }
 0x111   : > { %v604_v36 = vmul.f32 %v2947_v13, %v2947_v13  ;;  %2209 = vmatpush3.bf16.msra.mxu1 %v2271_v7  ;;  %v729_v7 = vsub.f32 %v2717_v26, %v2943_v34 }
 0x112   : > { %v536_v8 = vpop.xlane.xlu1 %535  ;;  %v852_v58 = vpack.c.bf16 %v832_v35, %v831_v44  ;;  %v603_v33 = vmul.f32 %v2949_v47, %v2949_v47  ;;  %2210 = vmatprep.subr.bf16.mxu1 %v2272_v18 }
 0x113   : > { %v534_v41 = vpop.xlane.xlu0 %533  ;;  %v570_v56 = vmul.f32 0.03125, %v536_v8 }
 0x114   : > { %v569_v57 = vmul.f32 0.03125, %v534_v41  ;;  %2195 = vmatmul.mubr.bf16.gmra.mxu0 %v852_v58 }
 0x115   : > { %v634_v46 = vsub.f32 %v570_v56, %v602_v54  ;;  %v727_v56 = vsub.f32 %v2702_v17, %v2917_v20  ;;  %2211 = vmatpush3.bf16.msra.mxu1 %v2272_v18 }
 0x116   : > { %v633_v0 = vsub.f32 %v569_v57, %v601_v55  ;;  %v2327_v1 = vpop.eup %2326  ;;  %v540_v32 = vpop.xlane.xlu1 %539 }
 0x117   : > { %v538_v22 = vpop.xlane.xlu0 %537  ;;  %v2329_v40 = vpop.eup %2328  ;;  %v666_v37 = vadd.f32 1e-05, %v634_v46  ;;  %v572_v44 = vmul.f32 0.03125, %v540_v32  ;;  %v758_v35 = vmul.f32 %v2327_v1, %v726_v61 }
 0x118   : > { %v665_v27 = vadd.f32 1e-05, %v633_v0  ;;  %v571_v8 = vmul.f32 0.03125, %v538_v22  ;;  %v757_v41 = vmul.f32 %v2329_v40, %v725_v21 }
 0x119   : > { %2334 = vrsqrt.f32 %v666_v37  ;;  %v636_v51 = vsub.f32 %v572_v44, %v604_v36  ;;  %v796_v58 = vmul.f32 %v2765_v19, %v758_v35  ;;  %v2273_v37 = vld [vmem:[%s3265_s5 + $0x20] sm:$0xff]  }
 0x11a   : > { %v635_v54 = vsub.f32 %v571_v8, %v603_v33  ;;  %v2331_v55 = vpop.eup %2330  ;;  %2336 = vrsqrt.f32 %v665_v27  ;;  %v795_v57 = vmul.f32 %v2765_v19, %v757_v41  ;;  %2212 = vmatprep.subr.bf16.mxu1 %v2273_v37  ;;  %v2274_v8 = vld [vmem:[%s3265_s5 + $0x18] sm:$0xff]   ;;  %v730_v41 = vsub.f32 %v2715_v23, %v2941_v6 }
 0x11b   : > { %v2333_v46 = vpop.eup %2332  ;;  %v668_v0 = vadd.f32 1e-05, %v636_v51  ;;  %v760_v61 = vmul.f32 %v2331_v55, %v728_v45  ;;  %v834_v36 = vadd.f32 %v2772_v48, %v796_v58  ;;  %2213 = vmatpush3.bf16.msra.mxu1 %v2273_v37  ;;  %v731_v58 = vsub.f32 %v2724_v31, %v2949_v47 }
 0x11c   : > { %v667_v1 = vadd.f32 1e-05, %v635_v54  ;;  %v833_v21 = vadd.f32 %v2772_v48, %v795_v57  ;;  %v759_v20 = vmul.f32 %v2333_v46, %v727_v56  ;;  %2214 = vmatprep.subr.bf16.mxu1 %v2274_v8  ;;  %v2275_v54 = vld [vmem:[%s3265_s5 + $0x10] sm:$0xff]   ;;  %v732_v56 = vsub.f32 %v2722_v30, %v2947_v13 }
 0x11d   : > { %2338 = vrsqrt.f32 %v668_v0  ;;  %v798_v33 = vmul.f32 %v2765_v19, %v760_v61  ;;  %v2276_v61 = vld [vmem:[%s3265_s5 + $0x8] sm:$0xff]  }
 0x11e   : > { %2340 = vrsqrt.f32 %v667_v1  ;;  %v853_v32 = vpack.c.bf16 %v834_v36, %v833_v21  ;;  %v797_v22 = vmul.f32 %v2765_v19, %v759_v20 }
 0x11f   : > { %v836_v40 = vadd.f32 %v2772_v48, %v798_v33  ;;  %2215 = vmatpush3.bf16.msra.mxu1 %v2274_v8  ;;  %v2277_v33 = vld [vmem:[%s3265_s5] sm:$0xff]  }
 0x120   : > { %2198 = vmatprep.mubr.bf16.mxu0 %v853_v32  ;;  %v835_v27 = vadd.f32 %v2772_v48, %v797_v22  ;;  %2216 = vmatprep.subr.bf16.mxu1 %v2275_v54 }
 0x122   : > { %v854_v44 = vpack.c.bf16 %v836_v40, %v835_v27  ;;  %v3019_v40 = vld [vmem:[%s3264_s4] ss:$0 sm:$0xff] }
 0x123   : > { %2217 = vmatpush3.bf16.msra.mxu1 %v2275_v54 }
 0x124   : > { %2199 = vmatmul.mubr.bf16.gmra.mxu0 %v854_v44  ;;  %2218 = vmatprep.subr.bf16.mxu1 %v2276_v61 }
 0x126   : > { %v2335_v35 = vpop.eup %2334 }
 0x127   : > { %v2337_v45 = vpop.eup %2336  ;;  %v762_v51 = vmul.f32 %v2335_v35, %v730_v41  ;;  %2219 = vmatpush3.bf16.msra.mxu1 %v2276_v61 }
 0x128   : > { %v761_v55 = vmul.f32 %v2337_v45, %v729_v7  ;;  %2220 = vmatprep.subr.bf16.mxu1 %v2277_v33 }
 0x129   : > { %v800_v57 = vmul.f32 %v2765_v19, %v762_v51 }
 0x12a   : > { %v2339_v6 = vpop.eup %2338  ;;  %v799_v34 = vmul.f32 %v2765_v19, %v761_v55 }
 0x12b   : > { %v2341_v46 = vpop.eup %2340  ;;  %v838_v0 = vadd.f32 %v2772_v48, %v800_v57  ;;  %v764_v1 = vmul.f32 %v2339_v6, %v732_v56  ;;  %2221 = vmatpush3.bf16.msra.mxu1 %v2277_v33 }
 0x12c   : > { %v837_v13 = vadd.f32 %v2772_v48, %v799_v34  ;;  %v763_v18 = vmul.f32 %v2341_v46, %v731_v58 }
 0x12d   : > { %v802_v21 = vmul.f32 %v2765_v19, %v764_v1 }
 0x12e   : > { %v855_v36 = vpack.c.bf16 %v838_v0, %v837_v13  ;;  %v801_v47 = vmul.f32 %v2765_v19, %v763_v18 }
 0x12f   : > { %v840_v20 = vadd.f32 %v2772_v48, %v802_v21 }
 0x130   : > { %2202 = vmatprep.mubr.bf16.mxu0 %v855_v36  ;;  %v839_v32 = vadd.f32 %v2772_v48, %v801_v47 }
 0x132   : > { %v856_v22 = vpack.c.bf16 %v840_v20, %v839_v32 }
 0x134   : > { %2203 = vmatmul.mubr.bf16.gmra.mxu0 %v856_v22 }
 0x184   : > { %v2176_v19 = vpop.f32.mrf.mxu0 }
 0x185   : > { %v3022_v37 = vadd.f32 %v2176_v19, %v3019_v40 }
 0x186   : > { %v962_v27 = vpop.f32.mrf.mxu0 }
 0x187   : > { %v1831_v44 = vmul.f32 -1.442695, %v3022_v37  ;;  %v3026_v8 = vadd.f32 %v3019_v40, %v962_v27 }
 0x188   : > { %v2177_v48 = vpop.f32.mrf.mxu0 }
 0x189   : > { %2342 = vpow2.f32 %v1831_v44  ;;  %v1829_v41 = vmul.f32 -1.442695, %v3026_v8  ;;  %v974_v35 = vadd.f32 %v2177_v48, %v3019_v40 }
 0x18a   : > { %v965_v7 = vpop.f32.mrf.mxu0 }
 0x18b   : > { %2344 = vpow2.f32 %v1829_v41  ;;  %v1832_v45 = vmul.f32 -1.442695, %v974_v35  ;;  %v966_v51 = vadd.f32 %v3019_v40, %v965_v7 }
 0x18d   : > { %2346 = vpow2.f32 %v1832_v45  ;;  %v1830_v54 = vmul.f32 -1.442695, %v966_v51 }
 0x18f   : > { %2348 = vpow2.f32 %v1830_v54 }
 0x194   : > { %v2180_v55 = vpop.f32.mrf.mxu0 }
 0x195   : > { %v3032_v56 = vadd.f32 %v2180_v55, %v3019_v40 }
 0x196   : > { %v2343_v57 = vpop.eup %2342  ;;  %v978_v6 = vpop.f32.mrf.mxu0 }
 0x197   : > { %v1187_v58 = vadd.f32 1.0, %v2343_v57  ;;  %v1835_v34 = vmul.f32 -1.442695, %v3032_v56  ;;  %v3036_v46 = vadd.f32 %v3019_v40, %v978_v6 }
 0x198   : > { %v2345_v0 = vpop.eup %2344  ;;  %v2181_v1 = vpop.f32.mrf.mxu0 }
 0x199   : > { %2350 = vrcp.f32 %v1187_v58  ;;  %v1185_v61 = vadd.f32 1.0, %v2345_v0  ;;  %v1833_v13 = vmul.f32 -1.442695, %v3036_v46  ;;  %v3040_v18 = vadd.f32 %v2181_v1, %v3019_v40 }
 0x19a   : > { %v2347_v21 = vpop.eup %2346  ;;  %2352 = vpow2.f32 %v1835_v34  ;;  %v981_v36 = vpop.f32.mrf.mxu0 }
 0x19b   : > { %2354 = vrcp.f32 %v1185_v61  ;;  %v1188_v47 = vadd.f32 1.0, %v2347_v21  ;;  %v1836_v20 = vmul.f32 -1.442695, %v3040_v18  ;;  %v3044_v33 = vadd.f32 %v3019_v40, %v981_v36 }
 0x19c   : > { %v2349_v32 = vpop.eup %2348  ;;  %2356 = vpow2.f32 %v1833_v13 }
 0x19d   : > { %2358 = vrcp.f32 %v1188_v47  ;;  %v1186_v22 = vadd.f32 1.0, %v2349_v32  ;;  %v1834_v19 = vmul.f32 -1.442695, %v3044_v33 }
 0x19e   : > { %2360 = vpow2.f32 %v1836_v20 }
 0x19f   : > { %2362 = vrcp.f32 %v1186_v22 }
 0x1a0   : > { %2364 = vpow2.f32 %v1834_v19 }
 0x1a4   : > { %v2184_v27 = vpop.f32.mrf.mxu0 }
 0x1a5   : > { %v3048_v44 = vadd.f32 %v2184_v27, %v3019_v40 }
 0x1a6   : > { %v2351_v48 = vpop.eup %2350  ;;  %v994_v41 = vpop.f32.mrf.mxu0 }
 0x1a7   : > { %v2353_v7 = vpop.eup %2352  ;;  %v1839_v45 = vmul.f32 -1.442695, %v3048_v44  ;;  %v3052_v54 = vadd.f32 %v3019_v40, %v994_v41 }
 0x1a8   : > { %v2355_v55 = vpop.eup %2354  ;;  %v1191_v57 = vadd.f32 1.0, %v2353_v7  ;;  %v2185_v6 = vpop.f32.mrf.mxu0 }
 0x1a9   : > { %v2357_v58 = vpop.eup %2356  ;;  %2366 = vpow2.f32 %v1839_v45  ;;  %v1837_v34 = vmul.f32 -1.442695, %v3052_v54  ;;  %v3056_v0 = vadd.f32 %v2185_v6, %v3019_v40  ;;  %v1281_v41 = vmul.f32 %v2355_v55, %v3026_v8 }
 0x1aa   : > { %v2359_v1 = vpop.eup %2358  ;;  %2368 = vrcp.f32 %v1191_v57  ;;  %v1189_v61 = vadd.f32 1.0, %v2357_v58  ;;  %v997_v13 = vpop.f32.mrf.mxu0  ;;  %v1283_v45 = vmul.f32 %v2351_v48, %v3022_v37 }
 0x1ab   : > { %v2361_v21 = vpop.eup %2360  ;;  %2370 = vpow2.f32 %v1837_v34  ;;  %v1840_v36 = vmul.f32 -1.442695, %v3056_v0  ;;  %v3060_v47 = vadd.f32 %v3019_v40, %v997_v13  ;;  %v1284_v32 = vmul.f32 %v2359_v1, %v974_v35 }
 0x1ac   : > { %v2363_v20 = vpop.eup %2362  ;;  %2372 = vrcp.f32 %v1189_v61  ;;  %v1192_v22 = vadd.f32 1.0, %v2361_v21 }
 0x1ad   : > { %v2365_v19 = vpop.eup %2364  ;;  %2374 = vpow2.f32 %v1840_v36  ;;  %v1838_v27 = vmul.f32 -1.442695, %v3060_v47  ;;  %v1282_v7 = vmul.f32 %v2363_v20, %v966_v51  ;;  %v1314_v58 = vpack.c.bf16 %v1284_v32, %v1283_v45 }
 0x1ae   : > { %2376 = vrcp.f32 %v1192_v22  ;;  %v1190_v57 = vadd.f32 1.0, %v2365_v19 }
 0x1af   : > { %2378 = vpow2.f32 %v1838_v27  ;;  %v1313_v6 = vpack.c.bf16 %v1282_v7, %v1281_v41 }
 0x1b0   : > { %2380 = vrcp.f32 %v1190_v57 }
 0x1b1   : > { %2222 = vmatprep.mubr.bf16.mxu1 %v1313_v6 }
 0x1b2   : > { %2223 = vmatmul.mubr.bf16.vlgmr.msra.gmra.mxu1 %v1314_v58 }
 0x1b4   : > { %v2188_v35 = vpop.f32.mrf.mxu0 }
 0x1b5   : > { %v3066_v34 = vadd.f32 %v2188_v35, %v3019_v40 }
 0x1b6   : > { %v2367_v1 = vpop.eup %2366  ;;  %v1010_v61 = vpop.f32.mrf.mxu0 }
 0x1b7   : > { %v2369_v13 = vpop.eup %2368  ;;  %v1195_v21 = vadd.f32 1.0, %v2367_v1  ;;  %v1843_v8 = vmul.f32 -1.442695, %v3066_v34  ;;  %v3070_v37 = vadd.f32 %v3019_v40, %v1010_v61 }
 0x1b8   : > { %v2371_v51 = vpop.eup %2370  ;;  %v2189_v48 = vpop.f32.mrf.mxu0 }
 0x1b9   : > { %v2373_v55 = vpop.eup %2372  ;;  %2382 = vrcp.f32 %v1195_v21  ;;  %v1193_v36 = vadd.f32 1.0, %v2371_v51  ;;  %v1841_v20 = vmul.f32 -1.442695, %v3070_v37  ;;  %v3074_v32 = vadd.f32 %v2189_v48, %v3019_v40 }
 0x1ba   : > { %v2375_v22 = vpop.eup %2374  ;;  %2384 = vpow2.f32 %v1843_v8  ;;  %v1013_v19 = vpop.f32.mrf.mxu0  ;;  %v1285_v61 = vmul.f32 %v2373_v55, %v3036_v46  ;;  %v1287_v8 = vmul.f32 %v2369_v13, %v3032_v56 }
 0x1bb   : > { %v2377_v27 = vpop.eup %2376  ;;  %2386 = vrcp.f32 %v1193_v36  ;;  %v1196_v41 = vadd.f32 1.0, %v2375_v22  ;;  %v1844_v7 = vmul.f32 -1.442695, %v3074_v32  ;;  %v3078_v45 = vadd.f32 %v3019_v40, %v1013_v19 }
 0x1bc   : > { %v2379_v57 = vpop.eup %2378  ;;  %2388 = vpow2.f32 %v1841_v20  ;;  %v1288_v58 = vmul.f32 %v2377_v27, %v3040_v18 }
 0x1bd   : > { %v2381_v6 = vpop.eup %2380  ;;  %2390 = vrcp.f32 %v1196_v41  ;;  %v1194_v35 = vadd.f32 1.0, %v2379_v57  ;;  %v1842_v1 = vmul.f32 -1.442695, %v3078_v45 }
 0x1be   : > { %v1286_v21 = vmul.f32 %v2381_v6, %v3044_v33  ;;  %2392 = vpow2.f32 %v1844_v7  ;;  %v1316_v48 = vpack.c.bf16 %v1288_v58, %v1287_v8 }
 0x1bf   : > { %2394 = vrcp.f32 %v1194_v35 }
 0x1c0   : > { %2396 = vpow2.f32 %v1842_v1  ;;  %v1315_v51 = vpack.c.bf16 %v1286_v21, %v1285_v61 }
 0x1c2   : > { %2226 = vmatprep.mubr.bf16.mxu1 %v1315_v51 }
 0x1c3   : > { %2227 = vmatmul.mubr.bf16.gmra.mxu1 %v1316_v48 }
 0x1c4   : > { %v2192_v36 = vpop.f32.mrf.mxu0 }
 0x1c5   : > { %v3086_v18 = vadd.f32 %v2192_v36, %v3019_v40 }
 0x1c6   : > { %v2383_v20 = vpop.eup %2382  ;;  %v1026_v22 = vpop.f32.mrf.mxu0 }
 0x1c7   : > { %v2385_v19 = vpop.eup %2384  ;;  %v1847_v46 = vmul.f32 -1.442695, %v3086_v18  ;;  %v3090_v33 = vadd.f32 %v3019_v40, %v1026_v22 }
 0x1c8   : > { %v2387_v55 = vpop.eup %2386  ;;  %v1199_v56 = vadd.f32 1.0, %v2385_v19  ;;  %v2193_v13 = vpop.f32.mrf.mxu0 }
 0x1c9   : > { %v2389_v27 = vpop.eup %2388  ;;  %2398 = vpow2.f32 %v1847_v46  ;;  %v1845_v41 = vmul.f32 -1.442695, %v3090_v33  ;;  %v3094_v7 = vadd.f32 %v2193_v13, %v3019_v40  ;;  %v1289_v36 = vmul.f32 %v2387_v55, %v3052_v54 }
 0x1ca   : > { %v2391_v57 = vpop.eup %2390  ;;  %2400 = vrcp.f32 %v1199_v56  ;;  %v1197_v6 = vadd.f32 1.0, %v2389_v27  ;;  %v1029_v58 = vpop.f32.mrf.mxu0  ;;  %v1291_v46 = vmul.f32 %v2383_v20, %v3048_v44 }
 0x1cb   : > { %v2393_v35 = vpop.eup %2392  ;;  %2402 = vpow2.f32 %v1845_v41  ;;  %v1848_v1 = vmul.f32 -1.442695, %v3094_v7  ;;  %v3098_v61 = vadd.f32 %v3019_v40, %v1029_v58  ;;  %v1292_v8 = vmul.f32 %v2391_v57, %v3056_v0 }
 0x1cc   : > { %v2395_v21 = vpop.eup %2394  ;;  %2404 = vrcp.f32 %v1197_v6  ;;  %v1200_v51 = vadd.f32 1.0, %v2393_v35 }
 0x1cd   : > { %v2397_v48 = vpop.eup %2396  ;;  %v1290_v22 = vmul.f32 %v2395_v21, %v3060_v47  ;;  %2406 = vpow2.f32 %v1848_v1  ;;  %v1846_v19 = vmul.f32 -1.442695, %v3098_v61  ;;  %v1318_v27 = vpack.c.bf16 %v1292_v8, %v1291_v46 }
 0x1ce   : > { %2408 = vrcp.f32 %v1200_v51  ;;  %v1198_v56 = vadd.f32 1.0, %v2397_v48 }
 0x1cf   : > { %2410 = vpow2.f32 %v1846_v19  ;;  %v1317_v13 = vpack.c.bf16 %v1290_v22, %v1289_v36 }
 0x1d0   : > { %2412 = vrcp.f32 %v1198_v56 }
 0x1d1   : > { %2230 = vmatprep.mubr.bf16.mxu1 %v1317_v13 }
 0x1d2   : > { %2231 = vmatmul.mubr.bf16.gmra.mxu1 %v1318_v27 }
 0x1d4   : > { %v2196_v0 = vpop.f32.mrf.mxu0 }
 0x1d5   : > { %v3106_v41 = vadd.f32 %v2196_v0, %v3019_v40 }
 0x1d6   : > { %v2399_v54 = vpop.eup %2398  ;;  %v1042_v55 = vpop.f32.mrf.mxu0 }
 0x1d7   : > { %v2401_v47 = vpop.eup %2400  ;;  %v1203_v57 = vadd.f32 1.0, %v2399_v54  ;;  %v1851_v6 = vmul.f32 -1.442695, %v3106_v41  ;;  %v3110_v44 = vadd.f32 %v3019_v40, %v1042_v55 }
 0x1d8   : > { %v2403_v20 = vpop.eup %2402  ;;  %v2197_v58 = vpop.f32.mrf.mxu0 }
 0x1d9   : > { %v2405_v35 = vpop.eup %2404  ;;  %2414 = vrcp.f32 %v1203_v57  ;;  %v1201_v1 = vadd.f32 1.0, %v2403_v20  ;;  %v1849_v21 = vmul.f32 -1.442695, %v3110_v44  ;;  %v3114_v8 = vadd.f32 %v2197_v58, %v3019_v40 }
 0x1da   : > { %v2407_v51 = vpop.eup %2406  ;;  %2416 = vpow2.f32 %v1851_v6  ;;  %v1045_v48 = vpop.f32.mrf.mxu0  ;;  %v1293_v55 = vmul.f32 %v2405_v35, %v3070_v37  ;;  %v1295_v6 = vmul.f32 %v2401_v47, %v3066_v34 }
 0x1db   : > { %v2409_v36 = vpop.eup %2408  ;;  %2418 = vrcp.f32 %v1201_v1  ;;  %v1204_v22 = vadd.f32 1.0, %v2407_v51  ;;  %v1852_v19 = vmul.f32 -1.442695, %v3114_v8  ;;  %v3118_v46 = vadd.f32 %v3019_v40, %v1045_v48 }
 0x1dc   : > { %v2411_v56 = vpop.eup %2410  ;;  %2420 = vpow2.f32 %v1849_v21  ;;  %v1296_v27 = vmul.f32 %v2409_v36, %v3074_v32 }
 0x1dd   : > { %v2413_v13 = vpop.eup %2412  ;;  %2422 = vrcp.f32 %v1204_v22  ;;  %v1202_v0 = vadd.f32 1.0, %v2411_v56  ;;  %v1850_v54 = vmul.f32 -1.442695, %v3118_v46 }
 0x1de   : > { %v1294_v57 = vmul.f32 %v2413_v13, %v3078_v45  ;;  %2424 = vpow2.f32 %v1852_v19  ;;  %v1320_v58 = vpack.c.bf16 %v1296_v27, %v1295_v6 }
 0x1df   : > { %2426 = vrcp.f32 %v1202_v0 }
 0x1e0   : > { %2428 = vpow2.f32 %v1850_v54  ;;  %v1319_v20 = vpack.c.bf16 %v1294_v57, %v1293_v55 }
 0x1e2   : > { %2234 = vmatprep.mubr.bf16.mxu1 %v1319_v20 }
 0x1e3   : > { %2235 = vmatmul.mubr.bf16.gmra.mxu1 %v1320_v58 }
 0x1e4   : > { %v2200_v1 = vpop.f32.mrf.mxu0 }
 0x1e5   : > { %v3126_v32 = vadd.f32 %v2200_v1, %v3019_v40 }
 0x1e6   : > { %v1058_v21 = vpop.f32.mrf.mxu0  ;;  %v2415_v45 = vpop.eup %2414 }
 0x1e7   : > { %v1855_v51 = vmul.f32 -1.442695, %v3126_v32  ;;  %v3130_v37 = vadd.f32 %v3019_v40, %v1058_v21  ;;  %v2417_v48 = vpop.eup %2416 }
 0x1e8   : > { %v2201_v35 = vpop.f32.mrf.mxu0  ;;  %v2419_v36 = vpop.eup %2418  ;;  %v1207_v55 = vadd.f32 1.0, %v2417_v48 }
 0x1e9   : > { %2430 = vpow2.f32 %v1855_v51  ;;  %v1853_v34 = vmul.f32 -1.442695, %v3130_v37  ;;  %v3134_v47 = vadd.f32 %v2201_v35, %v3019_v40  ;;  %v2421_v19 = vpop.eup %2420  ;;  %v1297_v21 = vmul.f32 %v2419_v36, %v3090_v33 }
 0x1ea   : > { %v1061_v22 = vpop.f32.mrf.mxu0  ;;  %v2423_v27 = vpop.eup %2422  ;;  %v1205_v0 = vadd.f32 1.0, %v2421_v19  ;;  %v1299_v35 = vmul.f32 %v2415_v45, %v3086_v18 }
 0x1eb   : > { %2432 = vpow2.f32 %v1853_v34  ;;  %v1856_v56 = vmul.f32 -1.442695, %v3134_v47  ;;  %v3138_v13 = vadd.f32 %v3019_v40, %v1061_v22  ;;  %v2425_v54 = vpop.eup %2424  ;;  %v1300_v20 = vmul.f32 %v2423_v27, %v3094_v7 }
 0x1ec   : > { %v2427_v6 = vpop.eup %2426  ;;  %v1208_v58 = vadd.f32 1.0, %v2425_v54 }
 0x1ed   : > { %2434 = vpow2.f32 %v1856_v56  ;;  %v1854_v57 = vmul.f32 -1.442695, %v3138_v13  ;;  %v2429_v1 = vpop.eup %2428  ;;  %v1298_v51 = vmul.f32 %v2427_v6, %v3098_v61  ;;  %v1322_v22 = vpack.c.bf16 %v1300_v20, %v1299_v35 }
 0x1ee   : > { %2436 = vrcp.f32 %v1205_v0  ;;  %v1206_v34 = vadd.f32 1.0, %v2429_v1 }
 0x1ef   : > { %2438 = vpow2.f32 %v1854_v57  ;;  %v1321_v48 = vpack.c.bf16 %v1298_v51, %v1297_v21 }
 0x1f0   : > { %2440 = vrcp.f32 %v1208_v58 }
 0x1f1   : > { %2442 = vrcp.f32 %v1207_v55  ;;  %2238 = vmatprep.mubr.bf16.mxu1 %v1321_v48 }
 0x1f2   : > { %2444 = vrcp.f32 %v1206_v34  ;;  %2239 = vmatmul.mubr.bf16.gmra.mxu1 %v1322_v22 }
 0x1f4   : > { %v2204_v19 = vpop.f32.mrf.mxu0 }
 0x1f5   : > { %v3146_v7 = vadd.f32 %v2204_v19, %v3019_v40 }
 0x1f6   : > { %v2431_v56 = vpop.eup %2430  ;;  %v1074_v27 = vpop.f32.mrf.mxu0 }
 0x1f7   : > { %v1211_v33 = vadd.f32 1.0, %v2431_v56  ;;  %v1859_v61 = vmul.f32 -1.442695, %v3146_v7  ;;  %v3150_v36 = vadd.f32 %v3019_v40, %v1074_v27 }
 0x1f8   : > { %v2433_v18 = vpop.eup %2432  ;;  %v2205_v45 = vpop.f32.mrf.mxu0 }
 0x1f9   : > { %2446 = vrcp.f32 %v1211_v33  ;;  %v1209_v0 = vadd.f32 1.0, %v2433_v18  ;;  %v1857_v54 = vmul.f32 -1.442695, %v3150_v36  ;;  %v1086_v55 = vadd.f32 %v2205_v45, %v3019_v40 }
 0x1fa   : > { %v2435_v57 = vpop.eup %2434  ;;  %2448 = vpow2.f32 %v1859_v61  ;;  %v1077_v6 = vpop.f32.mrf.mxu0 }
 0x1fb   : > { %v2437_v20 = vpop.eup %2436  ;;  %2450 = vrcp.f32 %v1209_v0  ;;  %v1212_v58 = vadd.f32 1.0, %v2435_v57  ;;  %v1860_v1 = vmul.f32 -1.442695, %v1086_v55  ;;  %v1078_v21 = vadd.f32 %v3019_v40, %v1077_v6 }
 0x1fc   : > { %v2439_v51 = vpop.eup %2438  ;;  %2452 = vpow2.f32 %v1857_v54  ;;  %v1301_v27 = vmul.f32 %v2437_v20, %v3110_v44 }
 0x1fd   : > { %v2441_v35 = vpop.eup %2440  ;;  %2454 = vrcp.f32 %v1212_v58  ;;  %v1210_v34 = vadd.f32 1.0, %v2439_v51  ;;  %v1858_v48 = vmul.f32 -1.442695, %v1078_v21 }
 0x1fe   : > { %v2443_v22 = vpop.eup %2442  ;;  %2456 = vpow2.f32 %v1860_v1  ;;  %v1304_v56 = vmul.f32 %v2441_v35, %v3114_v8 }
 0x1ff   : > { %v2445_v19 = vpop.eup %2444  ;;  %2458 = vrcp.f32 %v1210_v34  ;;  %v1303_v61 = vmul.f32 %v2443_v22, %v3106_v41 }
 0x200   : > { %v1302_v33 = vmul.f32 %v2445_v19, %v3118_v46  ;;  %2460 = vpow2.f32 %v1858_v48 }
 0x201   : > { %v1324_v18 = vpack.c.bf16 %v1304_v56, %v1303_v61 }
 0x202   : > { %v1323_v40 = vpack.c.bf16 %v1302_v33, %v1301_v27 }
 0x204   : > { %2242 = vmatprep.mubr.bf16.mxu1 %v1323_v40 }
 0x205   : > { %2243 = vmatmul.mubr.bf16.gmra.mxu1 %v1324_v18 }
 0x206   : > { %v2447_v45 = vpop.eup %2446 }
 0x207   : > { %v2449_v0 = vpop.eup %2448  ;;  %v1307_v34 = vmul.f32 %v2447_v45, %v3126_v32 }
 0x208   : > { %v2451_v54 = vpop.eup %2450  ;;  %v1215_v8 = vadd.f32 1.0, %v2449_v0  ;;  %v3168_v0 = vld [vmem:[%s3266_s6] ss:$0 sm:$0xff] }
 0x209   : > { %v2453_v57 = vpop.eup %2452  ;;  %v1305_v35 = vmul.f32 %v2451_v54, %v3130_v37 }
 0x20a   : > { %v2455_v6 = vpop.eup %2454  ;;  %v1213_v58 = vadd.f32 1.0, %v2453_v57 }
 0x20b   : > { %v2457_v1 = vpop.eup %2456  ;;  %v1308_v44 = vmul.f32 %v2455_v6, %v3134_v47 }
 0x20c   : > { %v2459_v51 = vpop.eup %2458  ;;  %v1216_v20 = vadd.f32 1.0, %v2457_v1  ;;  %2462 = vrcp.f32 %v1213_v58 }
 0x20d   : > { %v2461_v46 = vpop.eup %2460  ;;  %v1306_v41 = vmul.f32 %v2459_v51, %v3138_v13  ;;  %v1326_v19 = vpack.c.bf16 %v1308_v44, %v1307_v34 }
 0x20e   : > { %2464 = vrcp.f32 %v1216_v20  ;;  %v1214_v48 = vadd.f32 1.0, %v2461_v46 }
 0x20f   : > { %2466 = vrcp.f32 %v1215_v8  ;;  %v1325_v22 = vpack.c.bf16 %v1306_v41, %v1305_v35 }
 0x210   : > { %2468 = vrcp.f32 %v1214_v48 }
 0x211   : > { %2246 = vmatprep.mubr.bf16.mxu1 %v1325_v22 }
 0x212   : > { %2247 = vmatmul.mubr.bf16.gmra.mxu1 %v1326_v19 }
 0x219   : > { %v2463_v56 = vpop.eup %2462 }
 0x21a   : > { %v1309_v37 = vmul.f32 %v2463_v56, %v3150_v36 }
 0x21b   : > { %v2465_v27 = vpop.eup %2464 }
 0x21c   : > { %v2467_v47 = vpop.eup %2466  ;;  %v1312_v61 = vmul.f32 %v2465_v27, %v1086_v55 }
 0x21d   : > { %v2469_v33 = vpop.eup %2468  ;;  %v1311_v13 = vmul.f32 %v2467_v47, %v3146_v7 }
 0x21e   : > { %v1310_v40 = vmul.f32 %v2469_v33, %v1078_v21 }
 0x21f   : > { %v1328_v18 = vpack.c.bf16 %v1312_v61, %v1311_v13 }
 0x220   : > { %v1327_v32 = vpack.c.bf16 %v1310_v40, %v1309_v37 }
 0x222   : > { %2250 = vmatprep.mubr.bf16.mxu1 %v1327_v32 }
 0x223   : > { %2251 = vmatmul.mubr.bf16.gmra.mxu1 %v1328_v18 }
 0x272   : > { %v2224_v45 = vpop.f32.mrf.mxu1 }
 0x273   : > { %v1443_v57 = vadd.f32 %v2224_v45, %v3168_v0 }
 0x274   : > { %v1434_v54 = vpop.f32.mrf.mxu1 }
 0x275   : > { %v1435_v36 = vadd.f32 %v3168_v0, %v1434_v54  ;;  %v1563_v6 = vadd.f32 %v2538_v2, %v1443_v57 }
 0x276   : > { %v2225_v55 = vpop.f32.mrf.mxu1 }
 0x277   : > { %v1446_v21 = vadd.f32 %v2225_v55, %v3168_v0  ;;  %v1561_v8 = vadd.f32 %v2540_v3, %v1435_v36 }
 0x278   : > { %v1437_v7 = vpop.f32.mrf.mxu1 }
 0x279   : > { %v1564_v58 = vadd.f32 %v2544_v4, %v1446_v21  ;;  %v1438_v1 = vadd.f32 %v3168_v0, %v1437_v7 }
 0x27b   : > { %v2008_v51 = vpack.c.bf16 %v1564_v58, %v1563_v6  ;;  %v1562_v44 = vadd.f32 %v2546_v5, %v1438_v1 }
 0x27d   : > { %2095 = vst [vmem:[%s3181_s10 + $0x8] sm:$0xff] %v2008_v51   ;;  %v2003_v2 = vpack.c.bf16 %v1562_v44, %v1561_v8 }
 0x27f   : > { %2004 = vst [vmem:[%s3181_s10] sm:$0xff] %v2003_v2  }
 0x283   : > { %v2228_v4 = vpop.f32.mrf.mxu1 }
 0x284   : > { %v1459_v46 = vadd.f32 %v2228_v4, %v3168_v0 }
 0x285   : > { %v1450_v20 = vpop.f32.mrf.mxu1 }
 0x286   : > { %v1451_v41 = vadd.f32 %v3168_v0, %v1450_v20  ;;  %v1567_v3 = vadd.f32 %v2568_v15, %v1459_v46 }
 0x287   : > { %v2229_v35 = vpop.f32.mrf.mxu1 }
 0x288   : > { %v1462_v34 = vadd.f32 %v2229_v35, %v3168_v0  ;;  %v1565_v19 = vadd.f32 %v2561_v12, %v1451_v41 }
 0x289   : > { %v1453_v48 = vpop.f32.mrf.mxu1 }
 0x28a   : > { %v1568_v22 = vadd.f32 %v2566_v14, %v1462_v34  ;;  %v1454_v5 = vadd.f32 %v3168_v0, %v1453_v48 }
 0x28c   : > { %v2018_v56 = vpack.c.bf16 %v1568_v22, %v1567_v3  ;;  %v1566_v27 = vadd.f32 %v2559_v11, %v1454_v5 }
 0x28e   : > { %2097 = vst [vmem:[%s3181_s10 + $0x18] sm:$0xff] %v2018_v56   ;;  %v2013_v47 = vpack.c.bf16 %v1566_v27, %v1565_v19 }
 0x290   : > { %2096 = vst [vmem:[%s3181_s10 + $0x10] sm:$0xff] %v2013_v47  }
 0x292   : > { %v2232_v33 = vpop.f32.mrf.mxu1 }
 0x293   : > { %v1475_v37 = vadd.f32 %v2232_v33, %v3168_v0 }
 0x294   : > { %v1466_v61 = vpop.f32.mrf.mxu1 }
 0x295   : > { %v1467_v15 = vadd.f32 %v3168_v0, %v1466_v61  ;;  %v1571_v12 = vadd.f32 %v2602_v29, %v1475_v37 }
 0x296   : > { %v2233_v40 = vpop.f32.mrf.mxu1 }
 0x297   : > { %v1478_v14 = vadd.f32 %v2233_v40, %v3168_v0  ;;  %v1569_v18 = vadd.f32 %v2592_v25, %v1467_v15 }
 0x298   : > { %v1469_v13 = vpop.f32.mrf.mxu1 }
 0x299   : > { %v1572_v32 = vadd.f32 %v2600_v28, %v1478_v14  ;;  %v1470_v11 = vadd.f32 %v3168_v0, %v1469_v13 }
 0x29b   : > { %v2028_v45 = vpack.c.bf16 %v1572_v32, %v1571_v12  ;;  %v1570_v54 = vadd.f32 %v2590_v24, %v1470_v11 }
 0x29d   : > { %2099 = vst [vmem:[%s3181_s10 + $0x28] sm:$0xff] %v2028_v45   ;;  %v2023_v57 = vpack.c.bf16 %v1570_v54, %v1569_v18 }
 0x29f   : > { %2098 = vst [vmem:[%s3181_s10 + $0x20] sm:$0xff] %v2023_v57  }
 0x2a3   : > { %v2236_v55 = vpop.f32.mrf.mxu1 }
 0x2a4   : > { %v1491_v21 = vadd.f32 %v2236_v55, %v3168_v0 }
 0x2a5   : > { %v1482_v36 = vpop.f32.mrf.mxu1 }
 0x2a6   : > { %v1483_v29 = vadd.f32 %v3168_v0, %v1482_v36  ;;  %v1575_v25 = vadd.f32 %v2636_v43, %v1491_v21 }
 0x2a7   : > { %v2237_v7 = vpop.f32.mrf.mxu1 }
 0x2a8   : > { %v1494_v28 = vadd.f32 %v2237_v7, %v3168_v0  ;;  %v1573_v1 = vadd.f32 %v2626_v39, %v1483_v29 }
 0x2a9   : > { %v1485_v6 = vpop.f32.mrf.mxu1 }
 0x2aa   : > { %v1576_v58 = vadd.f32 %v2634_v42, %v1494_v28  ;;  %v1486_v24 = vadd.f32 %v3168_v0, %v1485_v6 }
 0x2ac   : > { %v2038_v8 = vpack.c.bf16 %v1576_v58, %v1575_v25  ;;  %v1574_v51 = vadd.f32 %v2624_v38, %v1486_v24 }
 0x2ae   : > { %2101 = vst [vmem:[%s3181_s10 + $0x38] sm:$0xff] %v2038_v8   ;;  %v2033_v44 = vpack.c.bf16 %v1574_v51, %v1573_v1 }
 0x2b0   : > { %2100 = vst [vmem:[%s3181_s10 + $0x30] sm:$0xff] %v2033_v44  }
 0x2b2   : > { %v2240_v2 = vpop.f32.mrf.mxu1 }
 0x2b3   : > { %v1507_v20 = vadd.f32 %v2240_v2, %v3168_v0 }
 0x2b4   : > { %v1498_v4 = vpop.f32.mrf.mxu1 }
 0x2b5   : > { %v1499_v43 = vadd.f32 %v3168_v0, %v1498_v4  ;;  %v1579_v39 = vadd.f32 %v2658_v53, %v1507_v20 }
 0x2b6   : > { %v2241_v46 = vpop.f32.mrf.mxu1 }
 0x2b7   : > { %v1510_v42 = vadd.f32 %v2241_v46, %v3168_v0  ;;  %v1577_v34 = vadd.f32 %v2651_v50, %v1499_v43 }
 0x2b8   : > { %v1501_v35 = vpop.f32.mrf.mxu1 }
 0x2b9   : > { %v1580_v41 = vadd.f32 %v2656_v52, %v1510_v42  ;;  %v1502_v38 = vadd.f32 %v3168_v0, %v1501_v35 }
 0x2bb   : > { %v2048_v48 = vpack.c.bf16 %v1580_v41, %v1579_v39  ;;  %v1578_v3 = vadd.f32 %v2649_v49, %v1502_v38 }
 0x2bd   : > { %2103 = vst [vmem:[%s3181_s10 + $0x48] sm:$0xff] %v2048_v48   ;;  %v2043_v22 = vpack.c.bf16 %v1578_v3, %v1577_v34 }
 0x2bf   : > { %2102 = vst [vmem:[%s3181_s10 + $0x40] sm:$0xff] %v2043_v22  }
 0x2c5   : > { %v2244_v5 = vpop.f32.mrf.mxu1 }
 0x2c6   : > { %v1523_v56 = vadd.f32 %v2244_v5, %v3168_v0 }
 0x2c7   : > { %v1514_v19 = vpop.f32.mrf.mxu1 }
 0x2c8   : > { %v1515_v53 = vadd.f32 %v3168_v0, %v1514_v19  ;;  %v1583_v50 = vadd.f32 %v2680_v63, %v1523_v56 }
 0x2c9   : > { %v2245_v27 = vpop.f32.mrf.mxu1 }
 0x2ca   : > { %v1526_v52 = vadd.f32 %v2245_v27, %v3168_v0  ;;  %v1581_v61 = vadd.f32 %v2673_v60, %v1515_v53 }
 0x2cb   : > { %v1517_v47 = vpop.f32.mrf.mxu1 }
 0x2cc   : > { %v1584_v33 = vadd.f32 %v2678_v62, %v1526_v52  ;;  %v1518_v49 = vadd.f32 %v3168_v0, %v1517_v47 }
 0x2ce   : > { %v2058_v37 = vpack.c.bf16 %v1584_v33, %v1583_v50  ;;  %v1582_v40 = vadd.f32 %v2671_v59, %v1518_v49 }
 0x2d0   : > { %2105 = vst [vmem:[%s3181_s10 + $0x58] sm:$0xff] %v2058_v37   ;;  %v2053_v15 = vpack.c.bf16 %v1582_v40, %v1581_v61 }
 0x2d2   : > { %2104 = vst [vmem:[%s3181_s10 + $0x50] sm:$0xff] %v2053_v15   ;;  %v2248_v14 = vpop.f32.mrf.mxu1 }
 0x2d3   : > { %v1539_v12 = vadd.f32 %v2248_v14, %v3168_v0 }
 0x2d4   : > { %v1530_v13 = vpop.f32.mrf.mxu1 }
 0x2d5   : > { %v1531_v63 = vadd.f32 %v3168_v0, %v1530_v13  ;;  %v1587_v60 = vadd.f32 %v2702_v17, %v1539_v12 }
 0x2d6   : > { %v2249_v32 = vpop.f32.mrf.mxu1 }
 0x2d7   : > { %v1542_v62 = vadd.f32 %v2249_v32, %v3168_v0  ;;  %v1585_v45 = vadd.f32 %v2695_v10, %v1531_v63 }
 0x2d8   : > { %v1533_v11 = vpop.f32.mrf.mxu1 }
 0x2d9   : > { %v1588_v18 = vadd.f32 %v2700_v16, %v1542_v62  ;;  %v1534_v59 = vadd.f32 %v3168_v0, %v1533_v11 }
 0x2db   : > { %v2068_v54 = vpack.c.bf16 %v1588_v18, %v1587_v60  ;;  %v1586_v57 = vadd.f32 %v2693_v9, %v1534_v59 }
 0x2dd   : > { %2107 = vst [vmem:[%s3181_s10 + $0x68] sm:$0xff] %v2068_v54   ;;  %v2063_v55 = vpack.c.bf16 %v1586_v57, %v1585_v45 }
 0x2df   : > { %2106 = vst [vmem:[%s3181_s10 + $0x60] sm:$0xff] %v2063_v55  }
 0x2e3   : > { %v2252_v36 = vpop.f32.mrf.mxu1 }
 0x2e4   : > { %v1555_v7 = vadd.f32 %v2252_v36, %v3168_v0 }
 0x2e5   : > { %v1546_v21 = vpop.f32.mrf.mxu1 }
 0x2e6   : > { %v1547_v17 = vadd.f32 %v3168_v0, %v1546_v21  ;;  %v1591_v10 = vadd.f32 %v2724_v31, %v1555_v7 }
 0x2e7   : > { %v2253_v29 = vpop.f32.mrf.mxu1 }
 0x2e8   : > { %v1558_v16 = vadd.f32 %v2253_v29, %v3168_v0  ;;  %v1589_v25 = vadd.f32 %v2717_v26, %v1547_v17 }
 0x2e9   : > { %v1549_v28 = vpop.f32.mrf.mxu1 }
 0x2ea   : > { %v1592_v6 = vadd.f32 %v2722_v30, %v1558_v16  ;;  %v1550_v9 = vadd.f32 %v3168_v0, %v1549_v28 }
 0x2ec   : > { %v2078_v58 = vpack.c.bf16 %v1592_v6, %v1591_v10  ;;  %v1590_v24 = vadd.f32 %v2715_v23, %v1550_v9 }
 0x2ee   : > { %2109 = vst [vmem:[%s3181_s10 + $0x78] sm:$0xff] %v2078_v58   ;;  %v2073_v1 = vpack.c.bf16 %v1590_v24, %v1589_v25 }
 0x2f0   : > { %2108 = vst [vmem:[%s3181_s10 + $0x70] sm:$0xff] %v2073_v1  }
 0x2f1 PF: > { %s17_s24 = sadd.s32 1, %s2476_s24  }
 0x2f2   : > { %p14_p4 = scmp.ge.s32.totalorder %s17_s24, 4  }
 0x2f4   :  { %16 = sbr.rel (!%p14_p4) target bundleno = 1 (0x1), region = 78 }

// kernel: transformer_forward.4
= control target key start
LH: loop header
LB: loop body
LE: loop exit
PB: predicated region body
PF: predicated region fallthrough
CT: control target
= control target key end

     0   :  { %s2342_s21 = smov 0   ;;  %s2901_s0 = inlined_call_operand.vmem [shape: bf16[8,64,128], index: 0, kind: input, shape index: {}]   ;;  %s2902_s1 = inlined_call_operand.vmem [shape: f32[1,128], index: 1, kind: input, shape index: {}]   ;;  %s2903_s2 = inlined_call_operand.vmem [shape: f32[1,128], index: 2, kind: input, shape index: {}]   ;;  %s2904_s3 = inlined_call_operand.vmem [shape: bf16[128,768], index: 3, kind: input, shape index: {}]   ;;  %s2905_s4 = inlined_call_operand.vmem [shape: bf16[256,128], index: 4, kind: input, shape index: {}]   ;;  %s2906_s5 = inlined_call_operand.vmem [shape: f32[1,128], index: 5, kind: input, shape index: {}]   ;;  %s2907_s6 = inlined_call_operand.vmem [shape: bf16[8,64,128], index: 6, kind: output, shape index: {}]  }
   0x1 LB: > { %s1807_s22 = sadd.s32 4294967295, %s2304_s21   ;;  %p1811_p0 = scmp.ge.s32.totalorder %s2304_s21, 1  ;;  %s2304_s21 = sphi %s2342_s21, %s16_s21  }
   0x2   : > { %p212_p1 = scmp.lt.s32.totalorder %s2304_s21, 9 }
   0x4   : > { %p213_p2 = pnand %p1811_p0, %p212_p1 }
   0x5   : > { %p242_p3 = scmp.lt.s32.totalorder (!%p213_p2), %s1807_s22, 7 }
   0x6   : > { %216 = sbr.rel (%p213_p2) target bundleno = 1399 (0x577), region = 44 }
   0xb   : > { %s2909_s22 = smov (!%p242_p3, %s1807_s22), 7  ;;  %v2130_v11 = vld [vmem:[%s2904_s3 + $0x154] ss:$24 sps:$4 sm:$0xff]   ;;  %v2134_v13 = vld [vmem:[%s2904_s3 + $0x150] ss:$24 sps:$4 sm:$0xff]   ;;  %v2306_v53 = vmov 0  }
   0xc   : > { %s1901_s23 = sshll.u32 %s2909_s22, 5  ;;  %v2132_v12 = vld [vmem:[%s2904_s3 + $0x15c] ss:$24 sps:$4 sm:$0xff]   ;;  %v2135_v14 = vld [vmem:[%s2904_s3 + $0x158] ss:$24 sps:$4 sm:$0xff]   ;;  %695 = vmatprep.subr.bf16.mxu0 %v2130_v11  ;;  %727 = vmatprep.mubr.bf16.mxu0 %v2306_v53  ;;  %vm995_vm0 = vcmask 523264  }
   0xd   : > { %s2358_s26 = scalar_lea.vmem %s2901_s0, %s1901_s23  ;;  %768 = vmatprep.subr.bf16.mxu1 %v2132_v12  ;;  %696 = vmatpush1.bf16.msra.mxu0 %v2134_v13  ;;  %v2136_v17 = vld [vmem:[%s2904_s3 + $0x124] ss:$24 sps:$4 sm:$0xff]   ;;  %v2140_v20 = vld [vmem:[%s2904_s3 + $0x120] ss:$24 sps:$4 sm:$0xff]   ;;  %v2142_v24 = vld [vmem:[%s2904_s3 + $0xf4] ss:$24 sps:$4 sm:$0xff]   ;;  %s251_s13 = scalar_lea.vmem %s2907_s6, %s1901_s23 }
   0xe   : > { %v1912_v0 = vld [vmem:[%s2358_s26] sm:$0xff]   ;;  %v1947_v3 = vld [vmem:[%s2358_s26 + $0x8] sm:$0xff]   ;;  %v1948_v8 = vld [vmem:[%s2358_s26 + $0x10] sm:$0xff]   ;;  %769 = vmatpush1.bf16.msra.mxu1 %v2135_v14  ;;  %697 = vmatprep.subr.bf16.mxu0 %v2136_v17 }
   0xf   : > { %v2361_v1 = vunpack.c.l.bf16 %v1912_v0  ;;  %v2363_v2 = vunpack.c.h.bf16 %v1912_v0  ;;  %v2372_v6 = vunpack.c.l.bf16 %v1947_v3  ;;  %v2374_v7 = vunpack.c.h.bf16 %v1947_v3  ;;  %v2138_v18 = vld [vmem:[%s2904_s3 + $0x12c] ss:$24 sps:$4 sm:$0xff]   ;;  %v1949_v19 = vld [vmem:[%s2358_s26 + $0x18] sm:$0xff]   ;;  %v2141_v21 = vld [vmem:[%s2904_s3 + $0x128] ss:$24 sps:$4 sm:$0xff]   ;;  %800 = vmatprep.mubr.bf16.mxu1 %v2306_v53 }
  0x10   : > { %v2395_v15 = vunpack.c.l.bf16 %v1948_v8  ;;  %v2397_v16 = vunpack.c.h.bf16 %v1948_v8  ;;  %770 = vmatprep.subr.bf16.mxu1 %v2138_v18  ;;  %v2144_v25 = vld [vmem:[%s2904_s3 + $0xfc] ss:$24 sps:$4 sm:$0xff]   ;;  %v2146_v26 = vld [vmem:[%s2904_s3 + $0xf0] ss:$24 sps:$4 sm:$0xff]   ;;  %v2430_v28 = vunpack.c.l.bf16 %v1949_v19  ;;  %v2432_v29 = vunpack.c.h.bf16 %v1949_v19  ;;  %v2150_v31 = vld [vmem:[%s2904_s3 + $0xcc] ss:$24 sps:$4 sm:$0xff]  }
  0x11   : > { %271 = vadd.xlane.f32.xlu0 %v2361_v1  ;;  %v295_v4 = vmul.f32 %v2361_v1, %v2361_v1  ;;  %v296_v5 = vmul.f32 %v2363_v2, %v2363_v2  ;;  %v297_v9 = vmul.f32 %v2372_v6, %v2372_v6  ;;  %v298_v10 = vmul.f32 %v2374_v7, %v2374_v7  ;;  %v2147_v27 = vld [vmem:[%s2904_s3 + $0xf8] ss:$24 sps:$4 sm:$0xff]   ;;  %v2148_v30 = vld [vmem:[%s2904_s3 + $0xc4] ss:$24 sps:$4 sm:$0xff]   ;;  %v2153_v33 = vld [vmem:[%s2904_s3 + $0xc8] ss:$24 sps:$4 sm:$0xff]  }
  0x12   : > { %v299_v22 = vmul.f32 %v2395_v15, %v2395_v15  ;;  %698 = vmatpush1.bf16.msra.mxu0 %v2140_v20  ;;  %v300_v23 = vmul.f32 %v2397_v16, %v2397_v16  ;;  %771 = vmatpush1.bf16.msra.mxu1 %v2141_v21  ;;  %v2152_v32 = vld [vmem:[%s2904_s3 + $0xc0] ss:$24 sps:$4 sm:$0xff]   ;;  %v301_v34 = vmul.f32 %v2430_v28, %v2430_v28  ;;  %v2154_v36 = vld [vmem:[%s2904_s3 + $0x94] ss:$24 sps:$4 sm:$0xff]   ;;  %v2158_v38 = vld [vmem:[%s2904_s3 + $0x90] ss:$24 sps:$4 sm:$0xff]  }
  0x13   : > { %303 = vadd.xlane.f32.xlu1 %v295_v4  ;;  %699 = vmatprep.subr.bf16.mxu0 %v2142_v24  ;;  %v302_v35 = vmul.f32 %v2432_v29, %v2432_v29  ;;  %v2156_v37 = vld [vmem:[%s2904_s3 + $0x9c] ss:$24 sps:$4 sm:$0xff]   ;;  %v2159_v39 = vld [vmem:[%s2904_s3 + $0x98] ss:$24 sps:$4 sm:$0xff]   ;;  %v2162_v41 = vld [vmem:[%s2904_s3 + $0x6c] ss:$24 sps:$4 sm:$0xff]  }
  0x14   : > { %772 = vmatprep.subr.bf16.mxu1 %v2144_v25  ;;  %v2160_v40 = vld [vmem:[%s2904_s3 + $0x64] ss:$24 sps:$4 sm:$0xff]   ;;  %v2164_v42 = vld [vmem:[%s2904_s3 + $0x60] ss:$24 sps:$4 sm:$0xff]   ;;  %v2166_v44 = vld [vmem:[%s2904_s3 + $0x34] ss:$24 sps:$4 sm:$0xff]  }
  0x15   : > { %273 = vadd.xlane.f32.xlu0 %v2363_v2  ;;  %v2165_v43 = vld [vmem:[%s2904_s3 + $0x68] ss:$24 sps:$4 sm:$0xff]   ;;  %v2168_v45 = vld [vmem:[%s2904_s3 + $0x3c] ss:$24 sps:$4 sm:$0xff]   ;;  %v2171_v47 = vld [vmem:[%s2904_s3 + $0x38] ss:$24 sps:$4 sm:$0xff]  }
  0x16   : > { %700 = vmatpush1.bf16.msra.mxu0 %v2146_v26  ;;  %773 = vmatpush1.bf16.msra.mxu1 %v2147_v27  ;;  %v2170_v46 = vld [vmem:[%s2904_s3 + $0x30] ss:$24 sps:$4 sm:$0xff]   ;;  %v2172_v48 = vld [vmem:[%s2904_s3 + $0x4] ss:$24 sps:$4 sm:$0xff]   ;;  %v2176_v50 = vld [vmem:[%s2904_s3] ss:$24 sps:$4 sm:$0xff]  }
  0x17   : > { %305 = vadd.xlane.f32.xlu1 %v296_v5  ;;  %701 = vmatprep.subr.bf16.mxu0 %v2148_v30  ;;  %v2174_v49 = vld [vmem:[%s2904_s3 + $0xc] ss:$24 sps:$4 sm:$0xff]   ;;  %v2177_v51 = vld [vmem:[%s2904_s3 + $0x8] ss:$24 sps:$4 sm:$0xff]  }
  0x18   : > { %774 = vmatprep.subr.bf16.mxu1 %v2150_v31  ;;  %v2180_v52 = vld [vmem:[%s2904_s3 + $0x164] ss:$24 sps:$4 sm:$0xff]  }
  0x19   : > { %275 = vadd.xlane.f32.xlu0 %v2372_v6 }
  0x1a   : > { %702 = vmatpush1.bf16.msra.mxu0 %v2152_v32  ;;  %775 = vmatpush1.bf16.msra.mxu1 %v2153_v33 }
  0x1b   : > { %277 = vadd.xlane.f32.xlu1 %v2374_v7  ;;  %703 = vmatprep.subr.bf16.mxu0 %v2154_v36 }
  0x1c   : > { %776 = vmatprep.subr.bf16.mxu1 %v2156_v37 }
  0x1d   : > { %307 = vadd.xlane.f32.xlu0 %v297_v9 }
  0x1e   : > { %704 = vmatpush1.bf16.msra.mxu0 %v2158_v38  ;;  %777 = vmatpush1.bf16.msra.mxu1 %v2159_v39 }
  0x1f   : > { %309 = vadd.xlane.f32.xlu1 %v298_v10  ;;  %705 = vmatprep.subr.bf16.mxu0 %v2160_v40 }
  0x20   : > { %778 = vmatprep.subr.bf16.mxu1 %v2162_v41 }
  0x21   : > { %279 = vadd.xlane.f32.xlu0 %v2395_v15 }
  0x22   : > { %706 = vmatpush1.bf16.msra.mxu0 %v2164_v42  ;;  %779 = vmatpush1.bf16.msra.mxu1 %v2165_v43 }
  0x23   : > { %281 = vadd.xlane.f32.xlu1 %v2397_v16  ;;  %707 = vmatprep.subr.bf16.mxu0 %v2166_v44  ;;  %v2527_v44 = vld [vmem:[%s2902_s1] ss:$0 sm:$0xff] }
  0x24   : > { %780 = vmatprep.subr.bf16.mxu1 %v2168_v45 }
  0x25   : > { %311 = vadd.xlane.f32.xlu0 %v299_v22 }
  0x26   : > { %708 = vmatpush1.bf16.msra.mxu0 %v2170_v46  ;;  %781 = vmatpush1.bf16.msra.mxu1 %v2171_v47 }
  0x27   : > { %313 = vadd.xlane.f32.xlu1 %v300_v23  ;;  %709 = vmatprep.subr.bf16.mxu0 %v2172_v48 }
  0x28   : > { %782 = vmatprep.subr.bf16.mxu1 %v2174_v49 }
  0x29   : > { %283 = vadd.xlane.f32.xlu0 %v2430_v28 }
  0x2a   : > { %710 = vmatpush1.bf16.msra.mxu0 %v2176_v50  ;;  %783 = vmatpush1.bf16.msra.mxu1 %v2177_v51 }
  0x2b   : > { %285 = vadd.xlane.f32.xlu1 %v2432_v29  ;;  %841 = vmatprep.subr.bf16.mxu0 %v2180_v52 }
  0x2d   : > { %315 = vadd.xlane.f32.xlu0 %v301_v34 }
  0x2f   : > { %317 = vadd.xlane.f32.xlu1 %v302_v35 }
  0x9a   : > { %v272_v54 = vpop.xlane.xlu0 %271 }
  0x9b   : > { %v287_v55 = vmul.f32 0.03125, %v272_v54 }
  0x9c   : > { %v304_v56 = vpop.xlane.xlu1 %303 }
  0x9d   : > { %v327_v57 = vmul.f32 %v287_v55, %v287_v55  ;;  %v319_v58 = vmul.f32 0.03125, %v304_v56  ;;  %v359_v34 = vsub.f32 %v2361_v1, %v287_v55  ;;  %v2538_v56 = vld [vmem:[%s2903_s2] ss:$0 sm:$0xff] }
  0x9e   : > { %v274_v59 = vpop.xlane.xlu0 %273 }
  0x9f   : > { %v335_v60 = vsub.f32 %v319_v58, %v327_v57  ;;  %v288_v61 = vmul.f32 0.03125, %v274_v59 }
  0xa0   : > { %v306_v62 = vpop.xlane.xlu1 %305 }
  0xa1   : > { %v343_v63 = vadd.f32 1e-05, %v335_v60  ;;  %v328_v0 = vmul.f32 %v288_v61, %v288_v61  ;;  %v320_v3 = vmul.f32 0.03125, %v306_v62  ;;  %v360_v46 = vsub.f32 %v2363_v2, %v288_v61 }
  0xa2   : > { %v276_v4 = vpop.xlane.xlu0 %275 }
  0xa3   : > { %2218 = vrsqrt.f32 %v343_v63  ;;  %v336_v5 = vsub.f32 %v320_v3, %v328_v0  ;;  %v2505_v8 = vmul.f32 0.03125, %v276_v4 }
  0xa4   : > { %v278_v9 = vpop.xlane.xlu1 %277 }
  0xa5   : > { %v344_v10 = vadd.f32 1e-05, %v336_v5  ;;  %v329_v11 = vmul.f32 %v2505_v8, %v2505_v8  ;;  %v2509_v12 = vmul.f32 0.03125, %v278_v9  ;;  %v361_v59 = vsub.f32 %v2372_v6, %v2505_v8 }
  0xa6   : > { %v308_v13 = vpop.xlane.xlu0 %307 }
  0xa7   : > { %2220 = vrsqrt.f32 %v344_v10  ;;  %v321_v14 = vmul.f32 0.03125, %v308_v13  ;;  %v330_v18 = vmul.f32 %v2509_v12, %v2509_v12  ;;  %v362_v4 = vsub.f32 %v2374_v7, %v2509_v12  ;;  %v2178_v10 = vld [vmem:[%s2904_s3 + $0x160] ss:$24 sps:$4 sm:$0xff]   ;;  %v2181_v12 = vld [vmem:[%s2904_s3 + $0x130] ss:$24 sps:$4 sm:$0xff]  }
  0xa8   : > { %v310_v17 = vpop.xlane.xlu1 %309 }
  0xa9   : > { %v337_v19 = vsub.f32 %v321_v14, %v329_v11  ;;  %v322_v20 = vmul.f32 0.03125, %v310_v17  ;;  %v2183_v14 = vld [vmem:[%s2904_s3 + $0x134] ss:$24 sps:$4 sm:$0xff]  }
  0xaa   : > { %v280_v21 = vpop.xlane.xlu0 %279 }
  0xab   : > { %v345_v22 = vadd.f32 1e-05, %v337_v19  ;;  %v338_v23 = vsub.f32 %v322_v20, %v330_v18  ;;  %v2513_v24 = vmul.f32 0.03125, %v280_v21  ;;  %v2186_v21 = vld [vmem:[%s2904_s3 + $0x104] ss:$24 sps:$4 sm:$0xff]  }
  0xac   : > { %v282_v25 = vpop.xlane.xlu1 %281 }
  0xad   : > { %2222 = vrsqrt.f32 %v345_v22  ;;  %v346_v26 = vadd.f32 1e-05, %v338_v23  ;;  %v331_v27 = vmul.f32 %v2513_v24, %v2513_v24  ;;  %v2517_v30 = vmul.f32 0.03125, %v282_v25 }
  0xae   : > { %v312_v31 = vpop.xlane.xlu0 %311  ;;  %v363_v22 = vsub.f32 %v2395_v15, %v2513_v24  ;;  %v2189_v24 = vld [vmem:[%s2904_s3 + $0xd4] ss:$24 sps:$4 sm:$0xff]  }
  0xaf   : > { %2224 = vrsqrt.f32 %v346_v26  ;;  %v323_v32 = vmul.f32 0.03125, %v312_v31  ;;  %v332_v36 = vmul.f32 %v2517_v30, %v2517_v30 }
  0xb0   : > { %v2219_v33 = vpop.eup %2218  ;;  %v314_v35 = vpop.xlane.xlu1 %313 }
  0xb1   : > { %v339_v37 = vsub.f32 %v323_v32, %v331_v27  ;;  %v324_v38 = vmul.f32 0.03125, %v314_v35  ;;  %v367_v40 = vmul.f32 %v2219_v33, %v359_v34  ;;  %v364_v27 = vsub.f32 %v2397_v16, %v2517_v30  ;;  %v2184_v32 = vld [vmem:[%s2904_s3 + $0x100] ss:$24 sps:$4 sm:$0xff]   ;;  %v2187_v30 = vld [vmem:[%s2904_s3 + $0xd0] ss:$24 sps:$4 sm:$0xff]  }
  0xb2   : > { %v284_v39 = vpop.xlane.xlu0 %283 }
  0xb3   : > { %v347_v41 = vadd.f32 1e-05, %v339_v37  ;;  %v340_v42 = vsub.f32 %v324_v38, %v332_v36  ;;  %v2522_v43 = vmul.f32 0.03125, %v284_v39  ;;  %v381_v54 = vmul.f32 %v2527_v44, %v367_v40  ;;  %v2192_v38 = vld [vmem:[%s2904_s3 + $0xa4] ss:$24 sps:$4 sm:$0xff]  }
  0xb4   : > { %v2221_v45 = vpop.eup %2220  ;;  %v286_v47 = vpop.xlane.xlu1 %285 }
  0xb5   : > { %2226 = vrsqrt.f32 %v347_v41  ;;  %v348_v48 = vadd.f32 1e-05, %v340_v42  ;;  %v333_v49 = vmul.f32 %v2522_v43, %v2522_v43  ;;  %v2532_v50 = vmul.f32 0.03125, %v286_v47  ;;  %v2190_v47 = vld [vmem:[%s2904_s3 + $0xa0] ss:$24 sps:$4 sm:$0xff]  }
  0xb6   : > { %v316_v51 = vpop.xlane.xlu0 %315  ;;  %v368_v52 = vmul.f32 %v2221_v45, %v360_v46  ;;  %v395_v0 = vadd.f32 %v2538_v56, %v381_v54  ;;  %v365_v39 = vsub.f32 %v2430_v28, %v2522_v43  ;;  %v2195_v43 = vld [vmem:[%s2904_s3 + $0x74] ss:$24 sps:$4 sm:$0xff]  }
  0xb7   : > { %2228 = vrsqrt.f32 %v348_v48  ;;  %v325_v55 = vmul.f32 0.03125, %v316_v51  ;;  %v334_v60 = vmul.f32 %v2532_v50, %v2532_v50  ;;  %v366_v45 = vsub.f32 %v2432_v29, %v2532_v50  ;;  %v2193_v50 = vld [vmem:[%s2904_s3 + $0x70] ss:$24 sps:$4 sm:$0xff]  }
  0xb8   : > { %v318_v57 = vpop.xlane.xlu1 %317  ;;  %v382_v58 = vmul.f32 %v2527_v44, %v368_v52 }
  0xb9   : > { %v341_v61 = vsub.f32 %v325_v55, %v333_v49  ;;  %v326_v62 = vmul.f32 0.03125, %v318_v57  ;;  %v2198_v55 = vld [vmem:[%s2904_s3 + $0x44] ss:$24 sps:$4 sm:$0xff]  }
  0xba   : > { %v2223_v63 = vpop.eup %2222  ;;  %v396_v3 = vadd.f32 %v2538_v56, %v382_v58 }
  0xbb   : > { %v349_v5 = vadd.f32 1e-05, %v341_v61  ;;  %v342_v9 = vsub.f32 %v326_v62, %v334_v60  ;;  %v369_v8 = vmul.f32 %v2223_v63, %v361_v59  ;;  %v2196_v60 = vld [vmem:[%s2904_s3 + $0x40] ss:$24 sps:$4 sm:$0xff]   ;;  %v2199_v61 = vld [vmem:[%s2904_s3 + $0x10] ss:$24 sps:$4 sm:$0xff]  }
  0xbc   : > { %v2225_v11 = vpop.eup %2224  ;;  %v2552_v13 = vpack.c.bf16 %v396_v3, %v395_v0 }
  0xbd   : > { %2230 = vrsqrt.f32 %v349_v5  ;;  %v350_v17 = vadd.f32 1e-05, %v342_v9  ;;  %v370_v18 = vmul.f32 %v2225_v11, %v362_v4  ;;  %v383_v19 = vmul.f32 %v2527_v44, %v369_v8 }
  0xbe   : > { %728 = vmatmul.mubr.bf16.vlgmr.msra.gmra.mxu0 %v2552_v13  ;;  %801 = vmatmul.mubr.bf16.vlgmr.msra.gmra.mxu1 %v2552_v13 }
  0xbf   : > { %2232 = vrsqrt.f32 %v350_v17  ;;  %842 = vmatpush1.bf16.msra.mxu0 %v2178_v10  ;;  %737 = vmatprep.mubr.bf16.mxu0 %v2306_v53  ;;  %v384_v20 = vmul.f32 %v2527_v44, %v370_v18  ;;  %v397_v23 = vadd.f32 %v2538_v56, %v383_v19 }
  0xc0   : > { %843 = vmatprep.subr.bf16.mxu0 %v2183_v14  ;;  %810 = vmatprep.mubr.bf16.mxu1 %v2306_v53 }
  0xc1   : > { %v398_v25 = vadd.f32 %v2538_v56, %v384_v20 }
  0xc2   : > { %v2227_v26 = vpop.eup %2226 }
  0xc3   : > { %844 = vmatpush1.bf16.msra.mxu0 %v2181_v12  ;;  %v404_v31 = vpack.c.bf16 %v398_v25, %v397_v23  ;;  %v371_v33 = vmul.f32 %v2227_v26, %v363_v22 }
  0xc4   : > { %v2229_v34 = vpop.eup %2228  ;;  %845 = vmatprep.subr.bf16.mxu0 %v2186_v21 }
  0xc5   : > { %v372_v35 = vmul.f32 %v2229_v34, %v364_v27  ;;  %v385_v36 = vmul.f32 %v2527_v44, %v371_v33 }
  0xc6   : > { %738 = vmatmul.mubr.bf16.gmra.mxu0 %v404_v31  ;;  %811 = vmatmul.mubr.bf16.gmra.mxu1 %v404_v31 }
  0xc7   : > { %846 = vmatpush1.bf16.msra.mxu0 %v2184_v32  ;;  %747 = vmatprep.mubr.bf16.mxu0 %v2306_v53  ;;  %v386_v37 = vmul.f32 %v2527_v44, %v372_v35  ;;  %v399_v40 = vadd.f32 %v2538_v56, %v385_v36 }
  0xc8   : > { %847 = vmatprep.subr.bf16.mxu0 %v2189_v24  ;;  %820 = vmatprep.mubr.bf16.mxu1 %v2306_v53 }
  0xc9   : > { %v400_v41 = vadd.f32 %v2538_v56, %v386_v37 }
  0xca   : > { %v2231_v42 = vpop.eup %2230 }
  0xcb   : > { %848 = vmatpush1.bf16.msra.mxu0 %v2187_v30  ;;  %v405_v46 = vpack.c.bf16 %v400_v41, %v399_v40  ;;  %v373_v48 = vmul.f32 %v2231_v42, %v365_v39 }
  0xcc   : > { %v2233_v49 = vpop.eup %2232  ;;  %849 = vmatprep.subr.bf16.mxu0 %v2192_v38 }
  0xcd   : > { %v374_v51 = vmul.f32 %v2233_v49, %v366_v45  ;;  %v387_v52 = vmul.f32 %v2527_v44, %v373_v48 }
  0xce   : > { %748 = vmatmul.mubr.bf16.gmra.mxu0 %v405_v46  ;;  %821 = vmatmul.mubr.bf16.gmra.mxu1 %v405_v46 }
  0xcf   : > { %850 = vmatpush1.bf16.msra.mxu0 %v2190_v47  ;;  %757 = vmatprep.mubr.bf16.mxu0 %v2306_v53  ;;  %v388_v54 = vmul.f32 %v2527_v44, %v374_v51  ;;  %v401_v57 = vadd.f32 %v2538_v56, %v387_v52  ;;  %v2201_v44 = vld [vmem:[%s2904_s3 + $0x14] ss:$24 sps:$4 sm:$0xff]  }
  0xd0   : > { %851 = vmatprep.subr.bf16.mxu0 %v2195_v43  ;;  %830 = vmatprep.mubr.bf16.mxu1 %v2306_v53 }
  0xd1   : > { %v402_v58 = vadd.f32 %v2538_v56, %v388_v54 }
  0xd3   : > { %852 = vmatpush1.bf16.msra.mxu0 %v2193_v50  ;;  %v406_v59 = vpack.c.bf16 %v402_v58, %v401_v57 }
  0xd4   : > { %853 = vmatprep.subr.bf16.mxu0 %v2198_v55 }
  0xd6   : > { %758 = vmatmul.mubr.bf16.gmra.mxu0 %v406_v59  ;;  %831 = vmatmul.mubr.bf16.gmra.mxu1 %v406_v59 }
  0xd7   : > { %854 = vmatpush1.bf16.msra.mxu0 %v2196_v60  ;;  %873 = vmatprep.mubr.bf16.mxu0 %v2306_v53 }
  0xd8   : > { %855 = vmatprep.subr.bf16.mxu0 %v2201_v44 }
  0xdb   : > { %856 = vmatpush1.bf16.msra.mxu0 %v2199_v61 }
  0xde   : > { %874 = vmatmul.mubr.bf16.vlgmr.msra.gmra.mxu0 %v2552_v13 }
  0xdf   : > { %883 = vmatprep.mubr.bf16.mxu0 %v2306_v53 }
  0xe6   : > { %884 = vmatmul.mubr.bf16.gmra.mxu0 %v404_v31 }
  0xe7   : > { %893 = vmatprep.mubr.bf16.mxu0 %v2306_v53 }
  0xee   : > { %894 = vmatmul.mubr.bf16.gmra.mxu0 %v405_v46 }
  0xef   : > { %903 = vmatprep.mubr.bf16.mxu0 %v2306_v53 }
  0xf6   : > { %904 = vmatmul.mubr.bf16.gmra.mxu0 %v406_v59 }
 0x17e   : > { %v729_v56 = vpop.f32.mrf.mxu0  ;;  %v802_v62 = vpop.f32.mrf.mxu1 }
 0x180   : > { %v731_v63 = vpop.f32.mrf.mxu0  ;;  %v804_v0 = vpop.f32.mrf.mxu1 }
 0x182   : > { %v733_v3 = vpop.f32.mrf.mxu0  ;;  %v806_v4 = vpop.f32.mrf.mxu1 }
 0x183   : > { %v914_v5 = vpack.c.bf16 %v733_v3, %v729_v56  ;;  %v918_v55 = vpack.c.bf16 %v806_v4, %v802_v62 }
 0x184   : > { %v735_v9 = vpop.f32.mrf.mxu0  ;;  %v808_v10 = vpop.f32.mrf.mxu1 }
 0x185   : > { %v1189_v8 = vpack.c.bf16 %v735_v9, %v731_v63  ;;  %2017 = vmatprep.mubr.bf16.mxu1 %v914_v5  ;;  %v1193_v59 = vpack.c.bf16 %v808_v10, %v804_v0 }
 0x186   : > { %v2629_v11 = vpop.f32.mrf.mxu0  ;;  %v812_v13 = vpop.f32.mrf.mxu1 }
 0x187   : > { %2049 = vmatprep.mubr.bf16.mxu0 %v1189_v8 }
 0x188   : > { %v2631_v14 = vpop.f32.mrf.mxu0  ;;  %v814_v17 = vpop.f32.mrf.mxu1 }
 0x18a   : > { %v2633_v53 = vpop.f32.mrf.mxu0  ;;  %v816_v18 = vpop.f32.mrf.mxu1 }
 0x18b   : > { %v919_v48 = vpack.c.bf16 %v816_v18, %v812_v13  ;;  %v915_v62 = vpack.c.bf16 %v2633_v53, %v2629_v11 }
 0x18c   : > { %v2635_v19 = vpop.f32.mrf.mxu0  ;;  %v818_v12 = vpop.f32.mrf.mxu1 }
 0x18d   : > { %v1194_v51 = vpack.c.bf16 %v818_v12, %v814_v17  ;;  %v1190_v0 = vpack.c.bf16 %v2635_v19, %v2631_v14 }
 0x18e   : > { %v2637_v20 = vpop.f32.mrf.mxu0  ;;  %v822_v21 = vpop.f32.mrf.mxu1 }
 0x190   : > { %v2639_v22 = vpop.f32.mrf.mxu0  ;;  %v824_v23 = vpop.f32.mrf.mxu1 }
 0x192   : > { %v753_v25 = vpop.f32.mrf.mxu0  ;;  %v826_v26 = vpop.f32.mrf.mxu1 }
 0x193   : > { %v920_v39 = vpack.c.bf16 %v826_v26, %v822_v21  ;;  %v916_v9 = vpack.c.bf16 %v753_v25, %v2637_v20 }
 0x194   : > { %v2641_v27 = vpop.f32.mrf.mxu0  ;;  %v828_v31 = vpop.f32.mrf.mxu1 }
 0x195   : > { %v1195_v42 = vpack.c.bf16 %v828_v31, %v824_v23  ;;  %v1191_v8 = vpack.c.bf16 %v2641_v27, %v2639_v22 }
 0x196   : > { %v2643_v32 = vpop.f32.mrf.mxu0  ;;  %v832_v33 = vpop.f32.mrf.mxu1 }
 0x198   : > { %v2645_v34 = vpop.f32.mrf.mxu0  ;;  %v834_v24 = vpop.f32.mrf.mxu1 }
 0x19a   : > { %v2647_v35 = vpop.f32.mrf.mxu0  ;;  %v836_v36 = vpop.f32.mrf.mxu1 }
 0x19b   : > { %v921_v30 = vpack.c.bf16 %v836_v36, %v832_v33  ;;  %v917_v11 = vpack.c.bf16 %v2647_v35, %v2643_v32 }
 0x19c   : > { %v2649_v37 = vpop.f32.mrf.mxu0  ;;  %v838_v38 = vpop.f32.mrf.mxu1 }
 0x19d   : > { %v1196_v40 = vpack.c.bf16 %v838_v38, %v834_v24  ;;  %2009 = vmatprep.subr.bf16.mxu1 %v921_v30  ;;  %v1192_v14 = vpack.c.bf16 %v2649_v37, %v2645_v34 }
 0x19e   : > { %v875_v41 = vpop.f32.mrf.mxu0  ;;  %2010 = vmatpush3.bf16.xpose.msra.mxu1 %v921_v30 }
 0x19f   : > { %2011 = vmatprep.subr.bf16.mxu1 %v920_v39  ;;  %2041 = vmatprep.subr.bf16.mxu0 %v1196_v40 }
 0x1a0   : > { %v877_v45 = vpop.f32.mrf.mxu0  ;;  %2042 = vmatpush3.bf16.xpose.msra.mxu0 %v1196_v40 }
 0x1a1   : > { %2043 = vmatprep.subr.bf16.mxu0 %v1195_v42 }
 0x1a2   : > { %v879_v46 = vpop.f32.mrf.mxu0 }
 0x1a3   : > { %v1088_v17 = vpack.c.bf16 %v879_v46, %v875_v41 }
 0x1a4   : > { %v881_v47 = vpop.f32.mrf.mxu0 }
 0x1a5   : > { %v2651_v49 = vpack.c.bf16 %v881_v47, %v877_v45 }
 0x1a6   : > { %v885_v43 = vpop.f32.mrf.mxu0  ;;  %2012 = vmatpush3.bf16.xpose.msra.mxu1 %v920_v39 }
 0x1a7   : > { %2013 = vmatprep.subr.bf16.mxu1 %v919_v48 }
 0x1a8   : > { %v887_v52 = vpop.f32.mrf.mxu0  ;;  %2044 = vmatpush3.bf16.xpose.msra.mxu0 %v1195_v42 }
 0x1a9   : > { %2045 = vmatprep.subr.bf16.mxu0 %v1194_v51 }
 0x1aa   : > { %v889_v50 = vpop.f32.mrf.mxu0 }
 0x1ab   : > { %v1089_v13 = vpack.c.bf16 %v889_v50, %v885_v43 }
 0x1ac   : > { %v891_v54 = vpop.f32.mrf.mxu0 }
 0x1ad   : > { %v2653_v57 = vpack.c.bf16 %v891_v54, %v887_v52 }
 0x1ae   : > { %v895_v58 = vpop.f32.mrf.mxu0  ;;  %2014 = vmatpush3.bf16.xpose.msra.mxu1 %v919_v48 }
 0x1af   : > { %2015 = vmatprep.subr.bf16.mxu1 %v918_v55 }
 0x1b0   : > { %v897_v60 = vpop.f32.mrf.mxu0  ;;  %2046 = vmatpush3.bf16.xpose.msra.mxu0 %v1194_v51 }
 0x1b1   : > { %2047 = vmatprep.subr.bf16.mxu0 %v1193_v59 }
 0x1b2   : > { %v899_v44 = vpop.f32.mrf.mxu0 }
 0x1b3   : > { %v1090_v10 = vpack.c.bf16 %v899_v44, %v895_v58 }
 0x1b4   : > { %v901_v61 = vpop.f32.mrf.mxu0 }
 0x1b5   : > { %v2655_v56 = vpack.c.bf16 %v901_v61, %v897_v60 }
 0x1b6   : > { %v905_v63 = vpop.f32.mrf.mxu0  ;;  %2016 = vmatpush3.bf16.xpose.msra.mxu1 %v918_v55 }
 0x1b8   : > { %v907_v3 = vpop.f32.mrf.mxu0  ;;  %2048 = vmatpush3.bf16.xpose.msra.mxu0 %v1193_v59 }
 0x1ba   : > { %v909_v5 = vpop.f32.mrf.mxu0 }
 0x1bb   : > { %v1091_v4 = vpack.c.bf16 %v909_v5, %v905_v63 }
 0x1bc   : > { %v911_v53 = vpop.f32.mrf.mxu0 }
 0x1bd   : > { %2018 = vmatmul.mubr.bf16.vlgmr.msra.gmra.mxu1 %v915_v62  ;;  %2025 = vmatprep.subr.bf16.mxu1 %v1091_v4  ;;  %v2668_v18 = vpack.c.bf16 %v911_v53, %v907_v3 }
 0x1be   : > { %2021 = vmatprep.mubr.bf16.mxu1 %v916_v9  ;;  %2026 = vmatpush3.bf16.msra.mxu1 %v1091_v4 }
 0x1bf   : > { %2027 = vmatprep.subr.bf16.mxu1 %v1090_v10  ;;  %2050 = vmatmul.mubr.bf16.vlgmr.msra.gmra.mxu0 %v1190_v0 }
 0x1c0   : > { %2053 = vmatprep.mubr.bf16.mxu0 %v1191_v8 }
 0x1c2   : > { %2028 = vmatpush3.bf16.msra.mxu1 %v1090_v10 }
 0x1c3   : > { %2029 = vmatprep.subr.bf16.mxu1 %v1089_v13 }
 0x1c5   : > { %2022 = vmatmul.mubr.bf16.gmra.mxu1 %v917_v11 }
 0x1c6   : > { %2030 = vmatpush3.bf16.msra.mxu1 %v1089_v13 }
 0x1c7   : > { %2031 = vmatprep.subr.bf16.mxu1 %v1088_v17  ;;  %2054 = vmatmul.mubr.bf16.gmra.mxu0 %v1192_v14 }
 0x1ca   : > { %2032 = vmatpush3.bf16.msra.mxu1 %v1088_v17 }
 0x1cb   : > { %2057 = vmatprep.subr.bf16.mxu1 %v2668_v18 }
 0x27d   : > { %v2019_v19 = vpop.f32.mrf.mxu1 }
 0x27e   : > { %v2673_v25 = vmul.f32 0.25, %v2019_v19 }
 0x27f   : > { %v956_v12 = vpop.f32.mrf.mxu1  ;;  %v2051_v20 = vpop.f32.mrf.mxu0 }
 0x280   : > { %v2671_v21 = vmul.f32 0.25, %v956_v12  ;;  %v1002_v24 = vsel %vm995_vm0, %v2673_v25, -inf  ;;  %v2694_v50 = vmul.f32 0.25, %v2051_v20 }
 0x281   : > { %v2020_v22 = vpop.f32.mrf.mxu1  ;;  %v1231_v23 = vpop.f32.mrf.mxu0 }
 0x282   : > { %v996_v26 = vsel %vm995_vm0, %v2671_v21, -inf  ;;  %v2677_v34 = vmul.f32 0.25, %v2020_v22  ;;  %v2687_v47 = vmul.f32 0.25, %v1231_v23  ;;  %v1276_v61 = vsel %vm995_vm0, %v2694_v50, -inf }
 0x283   : > { %997 = vmax.xlane.f32.xlu0 %v996_v26  ;;  %v959_v27 = vpop.f32.mrf.mxu1  ;;  %v2052_v31 = vpop.f32.mrf.mxu0 }
 0x284   : > { %v988_v32 = vmul.f32 0.25, %v959_v27  ;;  %v1005_v40 = vsel %vm995_vm0, %v2677_v34, -inf  ;;  %v1270_v58 = vsel %vm995_vm0, %v2687_v47, -inf  ;;  %v2702_v60 = vmul.f32 0.25, %v2052_v31 }
 0x285   : > { %v2023_v33 = vpop.f32.mrf.mxu1  ;;  %v1234_v36 = vpop.f32.mrf.mxu0 }
 0x286   : > { %v999_v35 = vsel %vm995_vm0, %v988_v32, -inf  ;;  %v2682_v39 = vmul.f32 0.25, %v2023_v33  ;;  %v2696_v54 = vmul.f32 0.25, %v1234_v36  ;;  %v1279_v4 = vsel %vm995_vm0, %v2702_v60, -inf }
 0x287   : > { %1003 = vmax.xlane.f32.xlu0 %v1002_v24  ;;  %1000 = vmax.xlane.f32.xlu1 %v999_v35  ;;  %v972_v30 = vpop.f32.mrf.mxu1  ;;  %v2055_v42 = vpop.f32.mrf.mxu0 }
 0x288   : > { %v991_v37 = vmul.f32 0.25, %v972_v30  ;;  %v1014_v43 = vsel %vm995_vm0, %v2682_v39, -inf  ;;  %v1273_v63 = vsel %vm995_vm0, %v2696_v54, -inf  ;;  %v2710_v5 = vmul.f32 0.25, %v2055_v42 }
 0x289   : > { %v2024_v38 = vpop.f32.mrf.mxu1  ;;  %v1247_v52 = vpop.f32.mrf.mxu0 }
 0x28a   : > { %v1008_v41 = vsel %vm995_vm0, %v991_v37, -inf  ;;  %v2689_v48 = vmul.f32 0.25, %v2024_v38  ;;  %v2704_v44 = vmul.f32 0.25, %v1247_v52  ;;  %v1288_v10 = vsel %vm995_vm0, %v2710_v5, -inf }
 0x28b   : > { %1006 = vmax.xlane.f32.xlu1 %v1005_v40  ;;  %1009 = vmax.xlane.f32.xlu0 %v1008_v41  ;;  %v975_v45 = vpop.f32.mrf.mxu1  ;;  %v2056_v59 = vpop.f32.mrf.mxu0 }
 0x28c   : > { %v992_v46 = vmul.f32 0.25, %v975_v45  ;;  %v1017_v55 = vsel %vm995_vm0, %v2689_v48, -inf  ;;  %v1282_v9 = vsel %vm995_vm0, %v2704_v44, -inf  ;;  %v2718_v0 = vmul.f32 0.25, %v2056_v59 }
 0x28d   : > { %v1250_v3 = vpop.f32.mrf.mxu0 }
 0x28e   : > { %v1011_v51 = vsel %vm995_vm0, %v992_v46, -inf  ;;  %v2712_v62 = vmul.f32 0.25, %v1250_v3  ;;  %v1291_v13 = vsel %vm995_vm0, %v2718_v0, -inf }
 0x28f   : > { %1015 = vmax.xlane.f32.xlu0 %v1014_v43  ;;  %1012 = vmax.xlane.f32.xlu1 %v1011_v51 }
 0x290   : > { %v1285_v8 = vsel %vm995_vm0, %v2712_v62, -inf }
 0x293   : > { %1018 = vmax.xlane.f32.xlu1 %v1017_v55  ;;  %1271 = vmax.xlane.f32.xlu0 %v1270_v58 }
 0x297   : > { %1277 = vmax.xlane.f32.xlu0 %v1276_v61  ;;  %1274 = vmax.xlane.f32.xlu1 %v1273_v63 }
 0x29b   : > { %1280 = vmax.xlane.f32.xlu1 %v1279_v4  ;;  %1283 = vmax.xlane.f32.xlu0 %v1282_v9 }
 0x29f   : > { %1289 = vmax.xlane.f32.xlu0 %v1288_v10  ;;  %1286 = vmax.xlane.f32.xlu1 %v1285_v8 }
 0x2a3   : > { %1292 = vmax.xlane.f32.xlu1 %v1291_v13 }
 0x30c   : > { %v998_v11 = vpop.xlane.xlu0 %997 }
 0x30d   : > { %v1020_v14 = vsub.f32 %v2671_v21, %v998_v11 }
 0x30f   : > { %v1028_v17 = vmul.f32 1.442695, %v1020_v14 }
 0x310   : > { %v1004_v53 = vpop.xlane.xlu0 %1003  ;;  %v1001_v19 = vpop.xlane.xlu1 %1000 }
 0x311   : > { %2234 = vpow2.f32 %v1028_v17  ;;  %v1022_v12 = vsub.f32 %v2673_v25, %v1004_v53  ;;  %v1021_v20 = vsub.f32 %v988_v32, %v1001_v19 }
 0x313   : > { %v1032_v22 = vmul.f32 1.442695, %v1022_v12  ;;  %v1030_v23 = vmul.f32 1.442695, %v1021_v20 }
 0x314   : > { %v1007_v26 = vpop.xlane.xlu1 %1006  ;;  %v1010_v27 = vpop.xlane.xlu0 %1009 }
 0x315   : > { %2236 = vpow2.f32 %v1032_v22  ;;  %v1023_v31 = vsub.f32 %v2677_v34, %v1007_v26  ;;  %v1024_v33 = vsub.f32 %v991_v37, %v1010_v27 }
 0x316   : > { %2238 = vpow2.f32 %v1030_v23 }
 0x317   : > { %v1034_v24 = vmul.f32 1.442695, %v1023_v31  ;;  %v1036_v35 = vmul.f32 1.442695, %v1024_v33 }
 0x318   : > { %v1016_v36 = vpop.xlane.xlu0 %1015  ;;  %v1013_v21 = vpop.xlane.xlu1 %1012 }
 0x319   : > { %2240 = vpow2.f32 %v1034_v24  ;;  %v1026_v30 = vsub.f32 %v2682_v39, %v1016_v36  ;;  %v1025_v38 = vsub.f32 %v992_v46, %v1013_v21 }
 0x31a   : > { %2242 = vpow2.f32 %v1036_v35 }
 0x31b   : > { %v1040_v25 = vmul.f32 1.442695, %v1026_v30  ;;  %v1038_v32 = vmul.f32 1.442695, %v1025_v38 }
 0x31c   : > { %v1019_v40 = vpop.xlane.xlu1 %1018  ;;  %v1272_v41 = vpop.xlane.xlu0 %1271 }
 0x31d   : > { %2244 = vpow2.f32 %v1040_v25  ;;  %v1027_v42 = vsub.f32 %v2689_v48, %v1019_v40  ;;  %v1294_v34 = vsub.f32 %v2687_v47, %v1272_v41 }
 0x31e   : > { %v2732_v37 = vpop.eup %2234  ;;  %2246 = vpow2.f32 %v1038_v32 }
 0x31f   : > { %v1042_v45 = vmul.f32 1.442695, %v1027_v42  ;;  %v1302_v43 = vmul.f32 1.442695, %v1294_v34  ;;  %v1044_v51 = vsel %vm995_vm0, %v2732_v37, 0.0 }
 0x320   : > { %v1278_v39 = vpop.xlane.xlu0 %1277  ;;  %v1275_v46 = vpop.xlane.xlu1 %1274  ;;  %1045 = vadd.xlane.f32.xlu0 %v1044_v51 }
 0x321   : > { %2248 = vpow2.f32 %v1042_v45  ;;  %v1296_v52 = vsub.f32 %v2694_v50, %v1278_v39  ;;  %v1295_v55 = vsub.f32 %v2696_v54, %v1275_v46  ;;  %v2206_v39 = vld [vmem:[%s2905_s4 + $0x78] sm:$0xff]   ;;  %v2208_v46 = vld [vmem:[%s2905_s4 + $0x70] sm:$0xff]  }
 0x322   : > { %v2738_v58 = vpop.eup %2236  ;;  %2250 = vpow2.f32 %v1302_v43  ;;  %2073 = vmatprep.subr.bf16.mxu0 %v2206_v39 }
 0x323   : > { %v2740_v47 = vpop.eup %2238  ;;  %v1306_v48 = vmul.f32 1.442695, %v1296_v52  ;;  %v1304_v59 = vmul.f32 1.442695, %v1295_v55  ;;  %v1050_v61 = vsel %vm995_vm0, %v2738_v58, 0.0  ;;  %2074 = vmatpush3.bf16.msra.mxu0 %v2206_v39 }
 0x324   : > { %v1281_v63 = vpop.xlane.xlu1 %1280  ;;  %1051 = vadd.xlane.f32.xlu0 %v1050_v61  ;;  %v1284_v3 = vpop.xlane.xlu0 %1283  ;;  %v1047_v4 = vsel %vm995_vm0, %v2740_v47, 0.0  ;;  %2075 = vmatprep.subr.bf16.mxu0 %v2208_v46 }
 0x325   : > { %2252 = vpow2.f32 %v1306_v48  ;;  %v1297_v50 = vsub.f32 %v2702_v60, %v1281_v63  ;;  %v1298_v54 = vsub.f32 %v2704_v44, %v1284_v3  ;;  %1048 = vadd.xlane.f32.xlu1 %v1047_v4 }
 0x326   : > { %v2748_v9 = vpop.eup %2240  ;;  %2254 = vpow2.f32 %v1304_v59 }
 0x327   : > { %v2750_v10 = vpop.eup %2242  ;;  %v1308_v8 = vmul.f32 1.442695, %v1297_v50  ;;  %v1310_v13 = vmul.f32 1.442695, %v1298_v54  ;;  %v1053_v11 = vsel %vm995_vm0, %v2748_v9, 0.0  ;;  %2076 = vmatpush3.bf16.msra.mxu0 %v2208_v46 }
 0x328   : > { %v1056_v14 = vsel %vm995_vm0, %v2750_v10, 0.0  ;;  %v1290_v17 = vpop.xlane.xlu0 %1289  ;;  %v1287_v53 = vpop.xlane.xlu1 %1286 }
 0x329   : > { %2256 = vpow2.f32 %v1308_v8  ;;  %1057 = vadd.xlane.f32.xlu0 %v1056_v14  ;;  %v1300_v60 = vsub.f32 %v2710_v5, %v1290_v17  ;;  %1054 = vadd.xlane.f32.xlu1 %v1053_v11  ;;  %v1299_v44 = vsub.f32 %v2712_v62, %v1287_v53 }
 0x32a   : > { %v2758_v19 = vpop.eup %2244  ;;  %2258 = vpow2.f32 %v1310_v13 }
 0x32b   : > { %v2760_v12 = vpop.eup %2246  ;;  %v1314_v20 = vmul.f32 1.442695, %v1300_v60  ;;  %v1312_v22 = vmul.f32 1.442695, %v1299_v44  ;;  %v1062_v23 = vsel %vm995_vm0, %v2758_v19, 0.0 }
 0x32c   : > { %v1059_v26 = vsel %vm995_vm0, %v2760_v12, 0.0  ;;  %v1293_v27 = vpop.xlane.xlu1 %1292 }
 0x32d   : > { %2260 = vpow2.f32 %v1314_v20  ;;  %1063 = vadd.xlane.f32.xlu0 %v1062_v23  ;;  %1060 = vadd.xlane.f32.xlu1 %v1059_v26  ;;  %v1301_v5 = vsub.f32 %v2718_v0, %v1293_v27 }
 0x32e   : > { %v2767_v62 = vpop.eup %2248  ;;  %2262 = vpow2.f32 %v1312_v22 }
 0x32f   : > { %v2769_v31 = vpop.eup %2250  ;;  %v1316_v33 = vmul.f32 1.442695, %v1301_v5  ;;  %v1065_v24 = vsel %vm995_vm0, %v2767_v62, 0.0 }
 0x330   : > { %v1318_v35 = vsel %vm995_vm0, %v2769_v31, 0.0 }
 0x331   : > { %2264 = vpow2.f32 %v1316_v33  ;;  %1319 = vadd.xlane.f32.xlu0 %v1318_v35  ;;  %1066 = vadd.xlane.f32.xlu1 %v1065_v24 }
 0x332   : > { %v2775_v36 = vpop.eup %2252 }
 0x333   : > { %v2777_v21 = vpop.eup %2254  ;;  %v1324_v0 = vsel %vm995_vm0, %v2775_v36, 0.0 }
 0x334   : > { %v1321_v30 = vsel %vm995_vm0, %v2777_v21, 0.0 }
 0x335   : > { %1325 = vadd.xlane.f32.xlu0 %v1324_v0  ;;  %1322 = vadd.xlane.f32.xlu1 %v1321_v30 }
 0x336   : > { %v2783_v38 = vpop.eup %2256 }
 0x337   : > { %v2785_v25 = vpop.eup %2258  ;;  %v1327_v32 = vsel %vm995_vm0, %v2783_v38, 0.0 }
 0x338   : > { %v1330_v40 = vsel %vm995_vm0, %v2785_v25, 0.0 }
 0x339   : > { %1331 = vadd.xlane.f32.xlu0 %v1330_v40  ;;  %1328 = vadd.xlane.f32.xlu1 %v1327_v32 }
 0x33a   : > { %v2791_v41 = vpop.eup %2260 }
 0x33b   : > { %v2793_v42 = vpop.eup %2262  ;;  %v1336_v34 = vsel %vm995_vm0, %v2791_v41, 0.0 }
 0x33c   : > { %v1333_v45 = vsel %vm995_vm0, %v2793_v42, 0.0 }
 0x33d   : > { %1337 = vadd.xlane.f32.xlu0 %v1336_v34  ;;  %1334 = vadd.xlane.f32.xlu1 %v1333_v45 }
 0x33e   : > { %v2799_v43 = vpop.eup %2264 }
 0x33f   : > { %v1339_v51 = vsel %vm995_vm0, %v2799_v43, 0.0 }
 0x341   : > { %1340 = vadd.xlane.f32.xlu1 %v1339_v51 }
 0x3a9   : > { %v1046_v52 = vpop.xlane.xlu0 %1045 }
 0x3aa   : > { %2266 = vrcp.f32 %v1046_v52 }
 0x3ad   : > { %v1052_v55 = vpop.xlane.xlu0 %1051 }
 0x3ae   : > { %v1049_v48 = vpop.xlane.xlu1 %1048 }
 0x3af   : > { %2268 = vrcp.f32 %v1049_v48 }
 0x3b0   : > { %2270 = vrcp.f32 %v1052_v55 }
 0x3b2   : > { %v1058_v59 = vpop.xlane.xlu0 %1057  ;;  %v1055_v61 = vpop.xlane.xlu1 %1054 }
 0x3b3   : > { %2272 = vrcp.f32 %v1055_v61 }
 0x3b4   : > { %2274 = vrcp.f32 %v1058_v59 }
 0x3b6   : > { %v1064_v63 = vpop.xlane.xlu0 %1063  ;;  %v1061_v3 = vpop.xlane.xlu1 %1060 }
 0x3b7   : > { %2276 = vrcp.f32 %v1061_v3  ;;  %v2267_v4 = vpop.eup %2266 }
 0x3b8   : > { %2278 = vrcp.f32 %v1064_v63  ;;  %v1069_v13 = vmul.f32 %v2267_v4, %v2732_v37  ;;  %v2211_v4 = vld [vmem:[%s2905_s4 + $0x8] sm:$0xff]  }
 0x3ba   : > { %v1320_v50 = vpop.xlane.xlu0 %1319  ;;  %v1067_v54 = vpop.xlane.xlu1 %1066 }
 0x3bb   : > { %2280 = vrcp.f32 %v1067_v54  ;;  %v2213_v54 = vld [vmem:[%s2905_s4] sm:$0xff]  }
 0x3bc   : > { %v2269_v8 = vpop.eup %2268  ;;  %2282 = vrcp.f32 %v1320_v50  ;;  %v2212_v50 = vld [vmem:[%s2905_s4 + $0x60] sm:$0xff]  }
 0x3bd   : > { %v1071_v11 = vmul.f32 %v2269_v8, %v2740_v47  ;;  %v2271_v53 = vpop.eup %2270  ;;  %v2214_v8 = vld [vmem:[%s2905_s4 + $0x58] sm:$0xff]  }
 0x3be   : > { %v1326_v14 = vpop.xlane.xlu0 %1325  ;;  %v1323_v17 = vpop.xlane.xlu1 %1322  ;;  %v1073_v20 = vmul.f32 %v2271_v53, %v2738_v58 }
 0x3bf   : > { %v1084_v60 = vpack.c.bf16 %v1071_v11, %v1069_v13  ;;  %2284 = vrcp.f32 %v1323_v17  ;;  %v2215_v13 = vld [vmem:[%s2905_s4 + $0x50] sm:$0xff]   ;;  %v2216_v11 = vld [vmem:[%s2905_s4 + $0x48] sm:$0xff]  }
 0x3c0   : > { %v2273_v44 = vpop.eup %2272  ;;  %2286 = vrcp.f32 %v1326_v14  ;;  %v2217_v14 = vld [vmem:[%s2905_s4 + $0x40] sm:$0xff]  }
 0x3c1   : > { %2033 = vmatprep.mubr.msk.bf16.mxu1 %vm995_vm0, %v1084_v60  ;;  %v1075_v22 = vmul.f32 %v2273_v44, %v2748_v9  ;;  %v2275_v27 = vpop.eup %2274 }
 0x3c2   : > { %v1332_v23 = vpop.xlane.xlu0 %1331  ;;  %v1329_v26 = vpop.xlane.xlu1 %1328  ;;  %v1077_v24 = vmul.f32 %v2275_v27, %v2750_v10 }
 0x3c3   : > { %v1085_v37 = vpack.c.bf16 %v1075_v22, %v1073_v20  ;;  %2288 = vrcp.f32 %v1329_v26 }
 0x3c4   : > { %v2277_v47 = vpop.eup %2276  ;;  %2290 = vrcp.f32 %v1332_v23 }
 0x3c5   : > { %2034 = vmatmul.mubr.msk.bf16.vlgmr.msra.gmra.mxu1 %vm995_vm0, %v1085_v37  ;;  %v1079_v35 = vmul.f32 %v2277_v47, %v2760_v12  ;;  %v2279_v0 = vpop.eup %2278 }
 0x3c6   : > { %v1338_v5 = vpop.xlane.xlu0 %1337  ;;  %v1335_v33 = vpop.xlane.xlu1 %1334  ;;  %2058 = vmatpush3.bf16.msra.mxu1 %v2668_v18  ;;  %v1081_v32 = vmul.f32 %v2279_v0, %v2758_v19 }
 0x3c7   : > { %2059 = vmatprep.subr.bf16.mxu1 %v2655_v56  ;;  %2292 = vrcp.f32 %v1335_v33  ;;  %v1086_v58 = vpack.c.bf16 %v1079_v35, %v1077_v24 }
 0x3c8   : > { %v2281_v9 = vpop.eup %2280  ;;  %2294 = vrcp.f32 %v1338_v5 }
 0x3c9   : > { %2037 = vmatprep.mubr.msk.bf16.mxu1 %vm995_vm0, %v1086_v58  ;;  %v1083_v40 = vmul.f32 %v2281_v9, %v2767_v62  ;;  %v2283_v34 = vpop.eup %2282 }
 0x3ca   : > { %v1341_v30 = vpop.xlane.xlu1 %1340  ;;  %2060 = vmatpush3.bf16.msra.mxu1 %v2655_v56  ;;  %v1343_v12 = vmul.f32 %v2283_v34, %v2769_v31  ;;  %v2202_v56 = vld [vmem:[%s2905_s4 + $0x38] sm:$0xff]  }
 0x3cb   : > { %2296 = vrcp.f32 %v1341_v30  ;;  %2061 = vmatprep.subr.bf16.mxu1 %v2653_v57  ;;  %v1087_v18 = vpack.c.bf16 %v1083_v40, %v1081_v32 }
 0x3cc   : > { %v2285_v10 = vpop.eup %2284 }
 0x3cd   : > { %2038 = vmatmul.mubr.msk.bf16.gmra.mxu1 %vm995_vm0, %v1087_v18  ;;  %v1345_v45 = vmul.f32 %v2285_v10, %v2777_v21  ;;  %v2287_v51 = vpop.eup %2286 }
 0x3ce   : > { %2062 = vmatpush3.bf16.msra.mxu1 %v2653_v57  ;;  %v1347_v39 = vmul.f32 %v2287_v51, %v2775_v36  ;;  %v2203_v57 = vld [vmem:[%s2905_s4 + $0x30] sm:$0xff]  }
 0x3cf   : > { %2063 = vmatprep.subr.bf16.mxu1 %v2651_v49  ;;  %v1358_v19 = vpack.c.bf16 %v1345_v45, %v1343_v12 }
 0x3d0   : > { %v2289_v62 = vpop.eup %2288 }
 0x3d1   : > { %v1349_v46 = vmul.f32 %v2289_v62, %v2783_v38  ;;  %2065 = vmatprep.mubr.msk.bf16.mxu1 %vm995_vm0, %v1358_v19  ;;  %v2291_v31 = vpop.eup %2290 }
 0x3d2   : > { %2064 = vmatpush3.bf16.msra.mxu1 %v2651_v49  ;;  %v1351_v48 = vmul.f32 %v2291_v31, %v2785_v25  ;;  %v2204_v49 = vld [vmem:[%s2905_s4 + $0x28] sm:$0xff]   ;;  %v2205_v25 = vld [vmem:[%s2905_s4 + $0x20] sm:$0xff]  }
 0x3d3   : > { %v1359_v21 = vpack.c.bf16 %v1349_v46, %v1347_v39  ;;  %2097 = vmatprep.subr.bf16.mxu1 %v2202_v56  ;;  %v1890_v46 = vld [vmem:[%s2906_s5] ss:$0 sm:$0xff] }
 0x3d4   : > { %v2293_v52 = vpop.eup %2292 }
 0x3d5   : > { %v2295_v55 = vpop.eup %2294  ;;  %2066 = vmatmul.mubr.msk.bf16.vlgmr.msra.gmra.mxu1 %vm995_vm0, %v1359_v21  ;;  %v1353_v36 = vmul.f32 %v2293_v52, %v2793_v42  ;;  %v2207_v42 = vld [vmem:[%s2905_s4 + $0x18] sm:$0xff]  }
 0x3d6   : > { %2098 = vmatpush3.bf16.msra.mxu1 %v2202_v56  ;;  %v1355_v61 = vmul.f32 %v2295_v55, %v2791_v41  ;;  %v2209_v41 = vld [vmem:[%s2905_s4 + $0x10] sm:$0xff]  }
 0x3d7   : > { %v1360_v59 = vpack.c.bf16 %v1353_v36, %v1351_v48  ;;  %2099 = vmatprep.subr.bf16.mxu1 %v2203_v57 }
 0x3d8   : > { %v2297_v38 = vpop.eup %2296 }
 0x3d9   : > { %v1357_v63 = vmul.f32 %v2297_v38, %v2799_v43  ;;  %2069 = vmatprep.mubr.msk.bf16.mxu1 %vm995_vm0, %v1360_v59  ;;  %v2210_v43 = vld [vmem:[%s2905_s4 + $0x68] sm:$0xff]  }
 0x3da   : > { %2100 = vmatpush3.bf16.msra.mxu1 %v2203_v57  ;;  %2077 = vmatprep.subr.bf16.mxu0 %v2210_v43 }
 0x3db   : > { %v1361_v3 = vpack.c.bf16 %v1357_v63, %v1355_v61  ;;  %2101 = vmatprep.subr.bf16.mxu1 %v2204_v49  ;;  %2078 = vmatpush3.bf16.msra.mxu0 %v2210_v43 }
 0x3dc   : > { %2079 = vmatprep.subr.bf16.mxu0 %v2212_v50 }
 0x3dd   : > { %2070 = vmatmul.mubr.msk.bf16.gmra.mxu1 %vm995_vm0, %v1361_v3 }
 0x3de   : > { %2102 = vmatpush3.bf16.msra.mxu1 %v2204_v49 }
 0x3df   : > { %2103 = vmatprep.subr.bf16.mxu1 %v2205_v25  ;;  %2080 = vmatpush3.bf16.msra.mxu0 %v2212_v50 }
 0x3e0   : > { %2081 = vmatprep.subr.bf16.mxu0 %v2214_v8 }
 0x3e2   : > { %2104 = vmatpush3.bf16.msra.mxu1 %v2205_v25 }
 0x3e3   : > { %2105 = vmatprep.subr.bf16.mxu1 %v2207_v42  ;;  %2082 = vmatpush3.bf16.msra.mxu0 %v2214_v8 }
 0x3e4   : > { %2083 = vmatprep.subr.bf16.mxu0 %v2215_v13 }
 0x3e6   : > { %2106 = vmatpush3.bf16.msra.mxu1 %v2207_v42 }
 0x3e7   : > { %2107 = vmatprep.subr.bf16.mxu1 %v2209_v41  ;;  %2084 = vmatpush3.bf16.msra.mxu0 %v2215_v13 }
 0x3e8   : > { %2085 = vmatprep.subr.bf16.mxu0 %v2216_v11 }
 0x3ea   : > { %2108 = vmatpush3.bf16.msra.mxu1 %v2209_v41 }
 0x3eb   : > { %2109 = vmatprep.subr.bf16.mxu1 %v2211_v4  ;;  %2086 = vmatpush3.bf16.msra.mxu0 %v2216_v11 }
 0x3ec   : > { %2087 = vmatprep.subr.bf16.mxu0 %v2217_v14 }
 0x3ee   : > { %2110 = vmatpush3.bf16.msra.mxu1 %v2211_v4 }
 0x3ef   : > { %2111 = vmatprep.subr.bf16.mxu1 %v2213_v54  ;;  %2088 = vmatpush3.bf16.msra.mxu0 %v2217_v14 }
 0x3f2   : > { %2112 = vmatpush3.bf16.msra.mxu1 %v2213_v54 }
 0x485   : > { %v2035_v17 = vpop.f32.mrf.mxu1 }
 0x487   : > { %v1138_v53 = vpop.f32.mrf.mxu1 }
 0x489   : > { %v2036_v60 = vpop.f32.mrf.mxu1 }
 0x48a   : > { %v1170_v22 = vpack.c.bf16 %v2036_v60, %v2035_v17 }
 0x48b   : > { %v1141_v44 = vpop.f32.mrf.mxu1 }
 0x48c   : > { %v1169_v20 = vpack.c.bf16 %v1141_v44, %v1138_v53 }
 0x48d   : > { %v2039_v23 = vpop.f32.mrf.mxu1 }
 0x48e   : > { %2113 = vmatprep.mubr.bf16.mxu1 %v1169_v20 }
 0x48f   : > { %v1154_v26 = vpop.f32.mrf.mxu1  ;;  %2114 = vmatmul.mubr.bf16.vlgmr.msra.gmra.mxu1 %v1170_v22 }
 0x491   : > { %v2040_v27 = vpop.f32.mrf.mxu1 }
 0x492   : > { %v1172_v5 = vpack.c.bf16 %v2040_v27, %v2039_v23 }
 0x493   : > { %v1157_v37 = vpop.f32.mrf.mxu1 }
 0x494   : > { %v1171_v47 = vpack.c.bf16 %v1157_v37, %v1154_v26 }
 0x495   : > { %v2067_v33 = vpop.f32.mrf.mxu1 }
 0x496   : > { %2117 = vmatprep.mubr.bf16.mxu1 %v1171_v47 }
 0x497   : > { %v1412_v24 = vpop.f32.mrf.mxu1  ;;  %2118 = vmatmul.mubr.bf16.gmra.mxu1 %v1172_v5 }
 0x499   : > { %v2068_v35 = vpop.f32.mrf.mxu1 }
 0x49a   : > { %v1444_v9 = vpack.c.bf16 %v2068_v35, %v2067_v33 }
 0x49b   : > { %v1415_v0 = vpop.f32.mrf.mxu1 }
 0x49c   : > { %v1443_v58 = vpack.c.bf16 %v1415_v0, %v1412_v24 }
 0x49d   : > { %v2071_v30 = vpop.f32.mrf.mxu1 }
 0x49e   : > { %2089 = vmatprep.mubr.bf16.mxu0 %v1443_v58 }
 0x49f   : > { %v1428_v32 = vpop.f32.mrf.mxu1  ;;  %2090 = vmatmul.mubr.bf16.vlgmr.msra.gmra.mxu0 %v1444_v9 }
 0x4a1   : > { %v2072_v40 = vpop.f32.mrf.mxu1 }
 0x4a2   : > { %v1446_v10 = vpack.c.bf16 %v2072_v40, %v2071_v30 }
 0x4a3   : > { %v1431_v34 = vpop.f32.mrf.mxu1 }
 0x4a4   : > { %v1445_v18 = vpack.c.bf16 %v1431_v34, %v1428_v32 }
 0x4a6   : > { %2093 = vmatprep.mubr.bf16.mxu0 %v1445_v18 }
 0x4a7   : > { %2094 = vmatmul.mubr.bf16.gmra.mxu0 %v1446_v10 }
 0x54f   : > { %v2115_v12 = vpop.f32.mrf.mxu1 }
 0x551   : > { %v1658_v45 = vpop.f32.mrf.mxu1 }
 0x553   : > { %v2116_v51 = vpop.f32.mrf.mxu1 }
 0x555   : > { %v1661_v19 = vpop.f32.mrf.mxu1 }
 0x557   : > { %v2119_v39 = vpop.f32.mrf.mxu1 }
 0x559   : > { %v1674_v48 = vpop.f32.mrf.mxu1 }
 0x55b   : > { %v2120_v41 = vpop.f32.mrf.mxu1 }
 0x55d   : > { %v1677_v14 = vpop.f32.mrf.mxu1 }
 0x55f   : > { %v2091_v56 = vpop.f32.mrf.mxu0 }
 0x560   : > { %v1667_v62 = vadd.f32 %v2115_v12, %v2091_v56 }
 0x561   : > { %v1545_v31 = vpop.f32.mrf.mxu0 }
 0x562   : > { %v1659_v21 = vadd.f32 %v1658_v45, %v1545_v31  ;;  %v1698_v52 = vadd.f32 %v1890_v46, %v1667_v62 }
 0x563   : > { %v2092_v57 = vpop.f32.mrf.mxu0 }
 0x564   : > { %v1670_v55 = vadd.f32 %v2116_v51, %v2092_v57  ;;  %v1696_v38 = vadd.f32 %v1890_v46, %v1659_v21  ;;  %v1706_v63 = vadd.f32 %v2372_v6, %v1698_v52 }
 0x565   : > { %v1548_v36 = vpop.f32.mrf.mxu0 }
 0x566   : > { %v1699_v59 = vadd.f32 %v1890_v46, %v1670_v55  ;;  %v1662_v49 = vadd.f32 %v1661_v19, %v1548_v36  ;;  %v1704_v4 = vadd.f32 %v2361_v1, %v1696_v38 }
 0x567   : > { %v2095_v61 = vpop.f32.mrf.mxu0 }
 0x568   : > { %v1707_v3 = vadd.f32 %v2374_v7, %v1699_v59  ;;  %v1697_v25 = vadd.f32 %v1890_v46, %v1662_v49  ;;  %v1683_v42 = vadd.f32 %v2119_v39, %v2095_v61 }
 0x569   : > { %v1561_v43 = vpop.f32.mrf.mxu0 }
 0x56a   : > { %v1935_v50 = vpack.c.bf16 %v1707_v3, %v1706_v63  ;;  %v1705_v54 = vadd.f32 %v2363_v2, %v1697_v25  ;;  %v1675_v8 = vadd.f32 %v1674_v48, %v1561_v43  ;;  %v1702_v11 = vadd.f32 %v1890_v46, %v1683_v42 }
 0x56b   : > { %v2096_v13 = vpop.f32.mrf.mxu0 }
 0x56c   : > { %1950 = vst [vmem:[%s251_s13 + $0x8] sm:$0xff] %v1935_v50   ;;  %v1930_v6 = vpack.c.bf16 %v1705_v54, %v1704_v4  ;;  %v1686_v7 = vadd.f32 %v2120_v41, %v2096_v13  ;;  %v1700_v53 = vadd.f32 %v1890_v46, %v1675_v8  ;;  %v1710_v20 = vadd.f32 %v2430_v28, %v1702_v11 }
 0x56d   : > { %v1564_v17 = vpop.f32.mrf.mxu0 }
 0x56e   : > { %1931 = vst [vmem:[%s251_s13] sm:$0xff] %v1930_v6   ;;  %v1703_v60 = vadd.f32 %v1890_v46, %v1686_v7  ;;  %v1678_v44 = vadd.f32 %v1677_v14, %v1564_v17  ;;  %v1708_v23 = vadd.f32 %v2395_v15, %v1700_v53 }
 0x570   : > { %v1711_v22 = vadd.f32 %v2432_v29, %v1703_v60  ;;  %v1701_v1 = vadd.f32 %v1890_v46, %v1678_v44 }
 0x572   : > { %v1945_v2 = vpack.c.bf16 %v1711_v22, %v1710_v20  ;;  %v1709_v26 = vadd.f32 %v2397_v16, %v1701_v1 }
 0x574   : > { %1952 = vst [vmem:[%s251_s13 + $0x18] sm:$0xff] %v1945_v2   ;;  %v1940_v27 = vpack.c.bf16 %v1709_v26, %v1708_v23 }
 0x576   : > { %1951 = vst [vmem:[%s251_s13 + $0x10] sm:$0xff] %v1940_v27  }
 0x577 PF: > { %s16_s21 = sadd.s32 1, %s2304_s21  }
 0x578   : > { %p13_p4 = scmp.ge.s32.totalorder %s16_s21, 10  }
 0x57a   :  { %15 = sbr.rel (!%p13_p4) target bundleno = 1 (0x1), region = 74 }

</bundles_post_ra>
